<compile_context>
chip_gen: v5e
topology: v5e:2x2
jax: 0.10.0
libtpu: 0.0.40
codegen_flags: <defaults>
</compile_context>

<pallas_src>
import jax
import jax.numpy as jnp
from jax.experimental import pallas as pl
from jax.experimental.pallas import tpu as pltpu


# ----------------------------- in-kernel helpers -----------------------------
def _mm_bias_relu(a, w_ref, b_ref):
    """relu(a @ W + b): bf16 operands (native MXU), f32 accumulation.

    a: (..., K) f32; w_ref: (K, Cout) bf16; b_ref: (1, Cout) f32.
    Leading dims are flattened so M = prod(leading) fills the MXU rows.
    """
    lead = a.shape[:-1]
    kdim = a.shape[-1]
    m = 1
    for d in lead:
        m *= d
    y = jnp.dot(a.reshape(m, kdim).astype(jnp.bfloat16), w_ref[...],
                preferred_element_type=jnp.float32)
    y = jnp.maximum(y + b_ref[...], 0.0)
    return y.reshape(lead + (w_ref.shape[1],))


def _conv_s1(h, w_ref, b_ref, k):
    """k-tap, stride-1, pad=(k-1)//2 'same' conv + ReLU on (Bb, T, Cin).

    The k taps are concatenated along the lane (channel) axis so the whole layer
    is ONE big-K matmul (K = k*Cin).  w_ref: (k*Cin, Cout) bf16, row blocks
    ordered [tap0 | tap1 | ... | tap_{k-1}] where tap i reads x[t + i - pad].
    """
    Bb, T, Cin = h.shape
    pad = (k - 1) // 2
    z = jnp.zeros((Bb, pad, Cin), h.dtype)
    hp = jnp.concatenate([z, h, z], axis=1)                  # (Bb, T + k - 1, Cin)
    taps = [hp[:, i:i + T, :] for i in range(k)]             # tap i -> x[t + i - pad]
    stacked = jnp.concatenate(taps, axis=-1)                 # (Bb, T, k*Cin)
    return _mm_bias_relu(stacked, w_ref, b_ref)


def _conv_s2(h, w_ref, b_ref):
    """3-tap, stride-2, pad=1 conv + ReLU: out[t] = W·[x[2t-1], x[2t], x[2t+1]] + b.

    Even/odd time rows are de-interleaved with a pair-merging reshape
    (T, Cin) -> (T//2, 2*Cin) + aligned lane slices; no strided ref reads.
    w_ref: (3*Cin, Cout) bf16, row blocks ordered [x[2t-1] | x[2t] | x[2t+1]].
    """
    Bb, T, Cin = h.shape
    To = T // 2
    hp = h.reshape(Bb, To, 2 * Cin)                          # [x[2t] | x[2t+1]]
    ho = hp[:, :, Cin:]                                      # x[2t+1]
    z = jnp.zeros((Bb, 1, Cin), h.dtype)
    hom1 = jnp.concatenate([z, ho[:, :To - 1, :]], axis=1)   # x[2t-1] (zero at t=0)
    stacked = jnp.concatenate([hom1, hp], axis=-1)           # (Bb, To, 3*Cin)
    return _mm_bias_relu(stacked, w_ref, b_ref)


# --------------------------------- the kernel --------------------------------
def _featnet_kernel(x_ref,
                    w1_ref, b1_ref,        # BaseFeatureNet.conv1 (1x1)
                    w2_ref, b2_ref,        # BaseFeatureNet.conv2 (k=9, pad=4)
                    wc1_ref, bc1_ref,      # FeatNet.conv1 (k=3, s=1, pad=1)
                    wc2_ref, bc2_ref,      # FeatNet.conv2..conv6 (k=3, s=2, pad=1)
                    wc3_ref, bc3_ref,
                    wc4_ref, bc4_ref,
                    wc5_ref, bc5_ref,
                    wc6_ref, bc6_ref,
                    m1_ref, m2_ref, m3_ref, m4_ref, m5_ref, m6_ref):
    x = x_ref[...]                                           # (Bb, T0, Cin) f32
    Bb, T0, _ = x.shape
    CB = w1_ref.shape[1]

    # BaseFeatureNet: 1x1 conv + ReLU, then k=9 conv + ReLU.
    f = _mm_bias_relu(x, w1_ref, b1_ref)                     # (Bb, T0, CB)
    f = _conv_s1(f, w2_ref, b2_ref, k=9)                     # (Bb, T0, CB)

    # MaxPool1d(kernel_size=2, stride=2) via pair-merge reshape + lane slices.
    fp = f.reshape(Bb, T0 // 2, 2 * CB)
    base = jnp.maximum(fp[:, :, :CB], fp[:, :, CB:])         # (Bb, T0//2, CB)

    # FeatNet pyramid: mal1 (stride 1), mal2..mal6 (stride 2), ReLU after each.
    m1 = _conv_s1(base, wc1_ref, bc1_ref, k=3)
    m1_ref[...] = m1
    m2 = _conv_s2(m1, wc2_ref, bc2_ref)
    m2_ref[...] = m2
    m3 = _conv_s2(m2, wc3_ref, bc3_ref)
    m3_ref[...] = m3
    m4 = _conv_s2(m3, wc4_ref, bc4_ref)
    m4_ref[...] = m4
    m5 = _conv_s2(m4, wc5_ref, bc5_ref)
    m5_ref[...] = m5
    m6 = _conv_s2(m5, wc6_ref, bc6_ref)
    m6_ref[...] = m6


# --------------------------------- wrapper ------------------------------------
def _const_spec(a):
    n = a.ndim
    return pl.BlockSpec(a.shape, lambda b, n=n: (0,) * n)


def _vmem_limit_bytes():
    # ~48 MiB on v7x (64 MiB physical), ~96 MiB on v5e/v6e (128 MiB physical).
    try:
        cap = int(pltpu.get_tpu_info().vmem_capacity_bytes)
    except Exception:
        cap = 64 << 20
    return int(min(cap * 3 // 4, 96 << 20))


def _pick_bblk(B, T0, cb, cmax):
    """Largest divisor of B that (a) keeps >=2 grid steps when B>=2 (v7x: both
    TensorCores busy) and (b) keeps the per-step f32 working set under ~16 MiB."""
    per_b = 4 * T0 * (12 * cb + 4 * cmax)   # coarse per-batch-row working-set bound
    cap = 16 << 20
    best = 1
    for d in range(1, B + 1):
        if B % d == 0 and d * per_b <= cap and (B // d) >= min(2, B):
            best = d
    return best


def _fuse_weight(w):
    """PyTorch (Cout, Cin, k) -> fused (k*Cin, Cout) bf16, tap-major rows."""
    cout, cin, k = w.shape
    return jnp.transpose(w, (2, 1, 0)).reshape(k * cin, cout).astype(jnp.bfloat16)


def _featnet_nwc(x_nwc, params, *, bblk=None):
    """Channels-last entry point: x (B, T0, Cin) -> tuple of (B, T_i, C_i)."""
    (wb1, bb1), (wb2, bb2), pyr = params
    B, T0, Cin = x_nwc.shape
    assert T0 % 64 == 0, "T0 must be divisible by 64 (pool + 5 stride-2 convs)"

    CB = wb1.shape[0]                        # BASE_FEAT_DIM

    # Kernel-layout weights: fused (k*Cin, Cout) bf16, biases (1, Cout) f32.
    kw = [wb1[:, :, 0].T.astype(jnp.bfloat16), bb1[None, :].astype(jnp.float32),
          _fuse_weight(wb2), bb2[None, :].astype(jnp.float32)]
    for w, b in pyr:
        kw += [_fuse_weight(w), b[None, :].astype(jnp.float32)]

    T1 = T0 // 2
    t_lens = [T1, T1 // 2, T1 // 4, T1 // 8, T1 // 16, T1 // 32]
    c_outs = [w.shape[0] for w, _ in pyr]

    if bblk is None:
        bblk = _pick_bblk(B, T0, CB, max(c_outs))
    assert B % bblk == 0
    grid = (B // bblk,)

    out_shape = tuple(jax.ShapeDtypeStruct((B, t, c), jnp.float32)
                      for t, c in zip(t_lens, c_outs))
    out_specs = tuple(pl.BlockSpec((bblk, t, c), lambda b: (b, 0, 0))
                      for t, c in zip(t_lens, c_outs))
    in_specs = ([pl.BlockSpec((bblk, T0, Cin), lambda b: (b, 0, 0))]
                + [_const_spec(a) for a in kw])

    return pl.pallas_call(
        _featnet_kernel,
        out_shape=out_shape,
        grid=grid,
        in_specs=in_specs,
        out_specs=out_specs,
        compiler_params=pltpu.CompilerParams(
            dimension_semantics=("parallel",),        # shard batch blocks over TCs
            vmem_limit_bytes=_vmem_limit_bytes()),
    )(x_nwc, *kw)


featnet_nwc = jax.jit(_featnet_nwc, static_argnames=("bblk",))


@jax.jit
def featnet(x, params):
    """PyTorch-convention entry point: x (B, Cin, T0) NCW -> tuple of (B, C_i, T_i)."""
    x_nwc = jnp.transpose(x, (0, 2, 1))
    outs = _featnet_nwc(x_nwc, params)
    return tuple(jnp.transpose(o, (0, 2, 1)) for o in outs)


# ------------------------ pure-JAX reference (self-check) ---------------------
def _ref_conv1d_bf16(x, w, b, stride, padding):
    # Mirror the kernel's precision: bf16 operand rounding, f32 accumulation/bias.
    xb = x.astype(jnp.bfloat16).astype(jnp.float32)
    wb = w.astype(jnp.bfloat16).astype(jnp.float32)
    out = jax.lax.conv_general_dilated(
        xb, wb, window_strides=(stride,), padding=[(padding, padding)],
        dimension_numbers=("NCH", "OIH", "NCH"),
        precision=jax.lax.Precision.HIGHEST)
    return out + b[None, :, None]


def featnet_ref(x, params):
    (wb1, bb1), (wb2, bb2), pyr = params
    f = jax.nn.relu(_ref_conv1d_bf16(x, wb1, bb1, 1, 0))
    f = jax.nn.relu(_ref_conv1d_bf16(f, wb2, bb2, 1, 4))
    f = jax.lax.reduce_window(f, -jnp.inf, jax.lax.max,
                              (1, 1, 2), (1, 1, 2), "VALID")
    outs, h = [], f
    for (w, b), s in zip(pyr, [1, 2, 2, 2, 2, 2]):
        h = jax.nn.relu(_ref_conv1d_bf16(h, w, b, s, 1))
        outs.append(h)
    return tuple(outs)


# ------------------------ deterministic parameter init ------------------------
def init_params(key, in_dim, base_dim, con_dims):
    keys = iter(jax.random.split(key, 32))

    def w(shape, s=0.05):
        return s * jax.random.normal(next(keys), shape, jnp.float32)

    base1 = (w((base_dim, in_dim, 1)), w((base_dim,)))        # Conv1d k=1
    base2 = (w((base_dim, base_dim, 9)), w((base_dim,)))      # Conv1d k=9 pad=4
    dims = [base_dim] + list(con_dims)
    pyr = [(w((dims[i + 1], dims[i], 3)), w((dims[i + 1],))) for i in range(6)]
    return base1, base2, pyr


if __name__ == "__main__":
    B = 2
    IN_DIM = 128                     # cfg.MODEL.IN_FEAT_DIM   (small test size)
    BASE_DIM = 128                   # cfg.MODEL.BASE_FEAT_DIM
    CON_DIMS = [128, 128, 128, 128, 128, 128]   # CON1..CON6_FEAT_DIM
    T0 = 128                         # input temporal length

    key = jax.random.PRNGKey(0)
    kx, kp = jax.random.split(key)
    x = jax.random.normal(kx, (B, IN_DIM, T0), jnp.float32)   # PyTorch NCW input
    params = init_params(kp, IN_DIM, BASE_DIM, CON_DIMS)

    outs = featnet(x, params)
    outs = jax.block_until_ready(outs)

    refs = featnet_ref(x, params)
    t1 = T0 // 2
    exp_t = [t1, t1 // 2, t1 // 4, t1 // 8, t1 // 16, t1 // 32]
    for o, r, t, c in zip(outs, refs, exp_t, CON_DIMS):
        assert o.shape == (B, c, t), o.shape
        err = float(jnp.max(jnp.abs(o - r)))
        assert jnp.allclose(o, r, atol=2e-3, rtol=2e-3), err

    print("KERNEL_OK")
</pallas_src>

<mosaic_0001>
module attributes {stable_mosaic.version = 11 : i64} {
  func.func @_featnet_kernel(%arg0: i32, %arg1: memref<1x128x128xf32, #tpu.memory_space<vmem>>, %arg2: memref<128x128xbf16, #tpu.memory_space<vmem>>, %arg3: memref<1x128xf32, #tpu.memory_space<vmem>>, %arg4: memref<1152x128xbf16, #tpu.memory_space<vmem>>, %arg5: memref<1x128xf32, #tpu.memory_space<vmem>>, %arg6: memref<384x128xbf16, #tpu.memory_space<vmem>>, %arg7: memref<1x128xf32, #tpu.memory_space<vmem>>, %arg8: memref<384x128xbf16, #tpu.memory_space<vmem>>, %arg9: memref<1x128xf32, #tpu.memory_space<vmem>>, %arg10: memref<384x128xbf16, #tpu.memory_space<vmem>>, %arg11: memref<1x128xf32, #tpu.memory_space<vmem>>, %arg12: memref<384x128xbf16, #tpu.memory_space<vmem>>, %arg13: memref<1x128xf32, #tpu.memory_space<vmem>>, %arg14: memref<384x128xbf16, #tpu.memory_space<vmem>>, %arg15: memref<1x128xf32, #tpu.memory_space<vmem>>, %arg16: memref<384x128xbf16, #tpu.memory_space<vmem>>, %arg17: memref<1x128xf32, #tpu.memory_space<vmem>>, %arg18: memref<1x64x128xf32, #tpu.memory_space<vmem>>, %arg19: memref<1x32x128xf32, #tpu.memory_space<vmem>>, %arg20: memref<1x16x128xf32, #tpu.memory_space<vmem>>, %arg21: memref<1x8x128xf32, #tpu.memory_space<vmem>>, %arg22: memref<1x4x128xf32, #tpu.memory_space<vmem>>, %arg23: memref<1x2x128xf32, #tpu.memory_space<vmem>>) attributes {dimension_semantics = [#tpu.dimension_semantics<parallel>], iteration_bounds = array<i64: 2>, scalar_prefetch = 0 : i64, scratch_operands = 0 : i64, tpu.core_type = #tpu.core_type<tc>, window_params = [{transform_indices = @transform_0, window_bounds = array<i64: 1, 128, 128>}, {pipeline_mode = #tpu.pipeline_mode<synchronous>, transform_indices = @transform_1, window_bounds = array<i64: 128, 128>}, {pipeline_mode = #tpu.pipeline_mode<synchronous>, transform_indices = @transform_2, window_bounds = array<i64: 1, 128>}, {pipeline_mode = #tpu.pipeline_mode<synchronous>, transform_indices = @transform_3, window_bounds = array<i64: 1152, 128>}, {pipeline_mode = #tpu.pipeline_mode<synchronous>, transform_indices = @transform_4, window_bounds = array<i64: 1, 128>}, {pipeline_mode = #tpu.pipeline_mode<synchronous>, transform_indices = @transform_5, window_bounds = array<i64: 384, 128>}, {pipeline_mode = #tpu.pipeline_mode<synchronous>, transform_indices = @transform_6, window_bounds = array<i64: 1, 128>}, {pipeline_mode = #tpu.pipeline_mode<synchronous>, transform_indices = @transform_7, window_bounds = array<i64: 384, 128>}, {pipeline_mode = #tpu.pipeline_mode<synchronous>, transform_indices = @transform_8, window_bounds = array<i64: 1, 128>}, {pipeline_mode = #tpu.pipeline_mode<synchronous>, transform_indices = @transform_9, window_bounds = array<i64: 384, 128>}, {pipeline_mode = #tpu.pipeline_mode<synchronous>, transform_indices = @transform_10, window_bounds = array<i64: 1, 128>}, {pipeline_mode = #tpu.pipeline_mode<synchronous>, transform_indices = @transform_11, window_bounds = array<i64: 384, 128>}, {pipeline_mode = #tpu.pipeline_mode<synchronous>, transform_indices = @transform_12, window_bounds = array<i64: 1, 128>}, {pipeline_mode = #tpu.pipeline_mode<synchronous>, transform_indices = @transform_13, window_bounds = array<i64: 384, 128>}, {pipeline_mode = #tpu.pipeline_mode<synchronous>, transform_indices = @transform_14, window_bounds = array<i64: 1, 128>}, {pipeline_mode = #tpu.pipeline_mode<synchronous>, transform_indices = @transform_15, window_bounds = array<i64: 384, 128>}, {pipeline_mode = #tpu.pipeline_mode<synchronous>, transform_indices = @transform_16, window_bounds = array<i64: 1, 128>}, {transform_indices = @transform_17, window_bounds = array<i64: 1, 64, 128>}, {transform_indices = @transform_18, window_bounds = array<i64: 1, 32, 128>}, {transform_indices = @transform_19, window_bounds = array<i64: 1, 16, 128>}, {transform_indices = @transform_20, window_bounds = array<i64: 1, 8, 128>}, {transform_indices = @transform_21, window_bounds = array<i64: 1, 4, 128>}, {transform_indices = @transform_22, window_bounds = array<i64: 1, 2, 128>}]} {
    %c0 = arith.constant 0 : index
    %c0_0 = arith.constant 0 : index
    %c0_1 = arith.constant 0 : index
    %0 = vector.load %arg1[%c0, %c0_0, %c0_1] : memref<1x128x128xf32, #tpu.memory_space<vmem>>, vector<1x128x128xf32>
    %1 = vector.shape_cast %0 : vector<1x128x128xf32> to vector<128x128xf32>
    %2 = arith.truncf %1 : vector<128x128xf32> to vector<128x128xbf16>
    %c0_2 = arith.constant 0 : index
    %c0_3 = arith.constant 0 : index
    %3 = vector.load %arg2[%c0_2, %c0_3] : memref<128x128xbf16, #tpu.memory_space<vmem>>, vector<128x128xbf16>
    %cst = arith.constant dense<0.000000e+00> : vector<128x128xf32>
    %4 = tpu.matmul %2, %3, %cst {dimension_numbers = #tpu.dot_dimension_numbers<[1], [0], [0], [1], [0, 0, 1, 1], [], []>} : vector<128x128xbf16>, vector<128x128xbf16>, vector<128x128xf32> -> vector<128x128xf32>
    %c0_4 = arith.constant 0 : index
    %c0_5 = arith.constant 0 : index
    %5 = vector.load %arg3[%c0_4, %c0_5] : memref<1x128xf32, #tpu.memory_space<vmem>>, vector<1x128xf32>
    %6 = vector.broadcast %5 : vector<1x128xf32> to vector<128x128xf32>
    %7 = arith.addf %4, %6 : vector<128x128xf32>
    %cst_6 = arith.constant 0.000000e+00 : f32
    %8 = vector.broadcast %cst_6 : f32 to vector<128x128xf32>
    %9 = arith.maximumf %7, %8 : vector<128x128xf32>
    %10 = vector.shape_cast %9 : vector<128x128xf32> to vector<1x128x128xf32>
    %cst_7 = arith.constant 0.000000e+00 : f32
    %11 = vector.broadcast %cst_7 : f32 to vector<1x4x128xf32>
    %12 = tpu.concatenate %11, %10, %11 in 1 : vector<1x4x128xf32>, vector<1x128x128xf32>, vector<1x4x128xf32> -> vector<1x136x128xf32>
    %13 = vector.extract_strided_slice %12 {offsets = [0, 0, 0], sizes = [1, 128, 128], strides = [1, 1, 1]} : vector<1x136x128xf32> to vector<1x128x128xf32>
    %14 = vector.extract_strided_slice %12 {offsets = [0, 1, 0], sizes = [1, 128, 128], strides = [1, 1, 1]} : vector<1x136x128xf32> to vector<1x128x128xf32>
    %15 = vector.extract_strided_slice %12 {offsets = [0, 2, 0], sizes = [1, 128, 128], strides = [1, 1, 1]} : vector<1x136x128xf32> to vector<1x128x128xf32>
    %16 = vector.extract_strided_slice %12 {offsets = [0, 3, 0], sizes = [1, 128, 128], strides = [1, 1, 1]} : vector<1x136x128xf32> to vector<1x128x128xf32>
    %17 = vector.extract_strided_slice %12 {offsets = [0, 4, 0], sizes = [1, 128, 128], strides = [1, 1, 1]} : vector<1x136x128xf32> to vector<1x128x128xf32>
    %18 = vector.extract_strided_slice %12 {offsets = [0, 5, 0], sizes = [1, 128, 128], strides = [1, 1, 1]} : vector<1x136x128xf32> to vector<1x128x128xf32>
    %19 = vector.extract_strided_slice %12 {offsets = [0, 6, 0], sizes = [1, 128, 128], strides = [1, 1, 1]} : vector<1x136x128xf32> to vector<1x128x128xf32>
    %20 = vector.extract_strided_slice %12 {offsets = [0, 7, 0], sizes = [1, 128, 128], strides = [1, 1, 1]} : vector<1x136x128xf32> to vector<1x128x128xf32>
    %21 = vector.extract_strided_slice %12 {offsets = [0, 8, 0], sizes = [1, 128, 128], strides = [1, 1, 1]} : vector<1x136x128xf32> to vector<1x128x128xf32>
    %22 = tpu.concatenate %13, %14, %15, %16, %17, %18, %19, %20, %21 in 2 : vector<1x128x128xf32>, vector<1x128x128xf32>, vector<1x128x128xf32>, vector<1x128x128xf32>, vector<1x128x128xf32>, vector<1x128x128xf32>, vector<1x128x128xf32>, vector<1x128x128xf32>, vector<1x128x128xf32> -> vector<1x128x1152xf32>
    %23 = vector.shape_cast %22 : vector<1x128x1152xf32> to vector<128x1152xf32>
    %24 = arith.truncf %23 : vector<128x1152xf32> to vector<128x1152xbf16>
    %c0_8 = arith.constant 0 : index
    %c0_9 = arith.constant 0 : index
    %25 = vector.load %arg4[%c0_8, %c0_9] : memref<1152x128xbf16, #tpu.memory_space<vmem>>, vector<1152x128xbf16>
    %cst_10 = arith.constant dense<0.000000e+00> : vector<128x128xf32>
    %26 = tpu.matmul %24, %25, %cst_10 {dimension_numbers = #tpu.dot_dimension_numbers<[1], [0], [0], [1], [0, 0, 1, 1], [], []>} : vector<128x1152xbf16>, vector<1152x128xbf16>, vector<128x128xf32> -> vector<128x128xf32>
    %c0_11 = arith.constant 0 : index
    %c0_12 = arith.constant 0 : index
    %27 = vector.load %arg5[%c0_11, %c0_12] : memref<1x128xf32, #tpu.memory_space<vmem>>, vector<1x128xf32>
    %28 = vector.broadcast %27 : vector<1x128xf32> to vector<128x128xf32>
    %29 = arith.addf %26, %28 : vector<128x128xf32>
    %cst_13 = arith.constant 0.000000e+00 : f32
    %30 = vector.broadcast %cst_13 : f32 to vector<128x128xf32>
    %31 = arith.maximumf %29, %30 : vector<128x128xf32>
    %32 = vector.shape_cast %31 : vector<128x128xf32> to vector<1x128x128xf32>
    %33 = vector.shape_cast %32 : vector<1x128x128xf32> to vector<1x64x256xf32>
    %34 = vector.extract_strided_slice %33 {offsets = [0, 0, 0], sizes = [1, 64, 128], strides = [1, 1, 1]} : vector<1x64x256xf32> to vector<1x64x128xf32>
    %35 = vector.extract_strided_slice %33 {offsets = [0, 0, 128], sizes = [1, 64, 128], strides = [1, 1, 1]} : vector<1x64x256xf32> to vector<1x64x128xf32>
    %36 = arith.maximumf %34, %35 : vector<1x64x128xf32>
    %cst_14 = arith.constant 0.000000e+00 : f32
    %37 = vector.broadcast %cst_14 : f32 to vector<1x1x128xf32>
    %38 = tpu.concatenate %37, %36, %37 in 1 : vector<1x1x128xf32>, vector<1x64x128xf32>, vector<1x1x128xf32> -> vector<1x66x128xf32>
    %39 = vector.extract_strided_slice %38 {offsets = [0, 0, 0], sizes = [1, 64, 128], strides = [1, 1, 1]} : vector<1x66x128xf32> to vector<1x64x128xf32>
    %40 = vector.extract_strided_slice %38 {offsets = [0, 1, 0], sizes = [1, 64, 128], strides = [1, 1, 1]} : vector<1x66x128xf32> to vector<1x64x128xf32>
    %41 = vector.extract_strided_slice %38 {offsets = [0, 2, 0], sizes = [1, 64, 128], strides = [1, 1, 1]} : vector<1x66x128xf32> to vector<1x64x128xf32>
    %42 = tpu.concatenate %39, %40, %41 in 2 : vector<1x64x128xf32>, vector<1x64x128xf32>, vector<1x64x128xf32> -> vector<1x64x384xf32>
    %43 = vector.shape_cast %42 : vector<1x64x384xf32> to vector<64x384xf32>
    %44 = arith.truncf %43 : vector<64x384xf32> to vector<64x384xbf16>
    %c0_15 = arith.constant 0 : index
    %c0_16 = arith.constant 0 : index
    %45 = vector.load %arg6[%c0_15, %c0_16] : memref<384x128xbf16, #tpu.memory_space<vmem>>, vector<384x128xbf16>
    %cst_17 = arith.constant dense<0.000000e+00> : vector<64x128xf32>
    %46 = tpu.matmul %44, %45, %cst_17 {dimension_numbers = #tpu.dot_dimension_numbers<[1], [0], [0], [1], [0, 0, 1, 1], [], []>} : vector<64x384xbf16>, vector<384x128xbf16>, vector<64x128xf32> -> vector<64x128xf32>
    %c0_18 = arith.constant 0 : index
    %c0_19 = arith.constant 0 : index
    %47 = vector.load %arg7[%c0_18, %c0_19] : memref<1x128xf32, #tpu.memory_space<vmem>>, vector<1x128xf32>
    %48 = vector.broadcast %47 : vector<1x128xf32> to vector<64x128xf32>
    %49 = arith.addf %46, %48 : vector<64x128xf32>
    %cst_20 = arith.constant 0.000000e+00 : f32
    %50 = vector.broadcast %cst_20 : f32 to vector<64x128xf32>
    %51 = arith.maximumf %49, %50 : vector<64x128xf32>
    %52 = vector.shape_cast %51 : vector<64x128xf32> to vector<1x64x128xf32>
    %c0_21 = arith.constant 0 : index
    %c0_22 = arith.constant 0 : index
    %c0_23 = arith.constant 0 : index
    %53 = vector.load %arg18[%c0_21, %c0_22, %c0_23] : memref<1x64x128xf32, #tpu.memory_space<vmem>>, vector<1x64x128xf32>
    tpu.vector_store %arg18[%c0_21, %c0_22, %c0_23], %52 {strides = array<i32>} : memref<1x64x128xf32, #tpu.memory_space<vmem>>, vector<1x64x128xf32>,
    %54 = vector.shape_cast %52 : vector<1x64x128xf32> to vector<1x32x256xf32>
    %55 = vector.extract_strided_slice %54 {offsets = [0, 0, 128], sizes = [1, 32, 128], strides = [1, 1, 1]} : vector<1x32x256xf32> to vector<1x32x128xf32>
    %cst_24 = arith.constant 0.000000e+00 : f32
    %56 = vector.broadcast %cst_24 : f32 to vector<1x1x128xf32>
    %57 = vector.extract_strided_slice %55 {offsets = [0, 0, 0], sizes = [1, 31, 128], strides = [1, 1, 1]} : vector<1x32x128xf32> to vector<1x31x128xf32>
    %58 = tpu.concatenate %56, %57 in 1 : vector<1x1x128xf32>, vector<1x31x128xf32> -> vector<1x32x128xf32>
    %59 = tpu.concatenate %58, %54 in 2 : vector<1x32x128xf32>, vector<1x32x256xf32> -> vector<1x32x384xf32>
    %60 = vector.shape_cast %59 : vector<1x32x384xf32> to vector<32x384xf32>
    %61 = arith.truncf %60 : vector<32x384xf32> to vector<32x384xbf16>
    %c0_25 = arith.constant 0 : index
    %c0_26 = arith.constant 0 : index
    %62 = vector.load %arg8[%c0_25, %c0_26] : memref<384x128xbf16, #tpu.memory_space<vmem>>, vector<384x128xbf16>
    %cst_27 = arith.constant dense<0.000000e+00> : vector<32x128xf32>
    %63 = tpu.matmul %61, %62, %cst_27 {dimension_numbers = #tpu.dot_dimension_numbers<[1], [0], [0], [1], [0, 0, 1, 1], [], []>} : vector<32x384xbf16>, vector<384x128xbf16>, vector<32x128xf32> -> vector<32x128xf32>
    %c0_28 = arith.constant 0 : index
    %c0_29 = arith.constant 0 : index
    %64 = vector.load %arg9[%c0_28, %c0_29] : memref<1x128xf32, #tpu.memory_space<vmem>>, vector<1x128xf32>
    %65 = vector.broadcast %64 : vector<1x128xf32> to vector<32x128xf32>
    %66 = arith.addf %63, %65 : vector<32x128xf32>
    %cst_30 = arith.constant 0.000000e+00 : f32
    %67 = vector.broadcast %cst_30 : f32 to vector<32x128xf32>
    %68 = arith.maximumf %66, %67 : vector<32x128xf32>
    %69 = vector.shape_cast %68 : vector<32x128xf32> to vector<1x32x128xf32>
    %c0_31 = arith.constant 0 : index
    %c0_32 = arith.constant 0 : index
    %c0_33 = arith.constant 0 : index
    %70 = vector.load %arg19[%c0_31, %c0_32, %c0_33] : memref<1x32x128xf32, #tpu.memory_space<vmem>>, vector<1x32x128xf32>
    tpu.vector_store %arg19[%c0_31, %c0_32, %c0_33], %69 {strides = array<i32>} : memref<1x32x128xf32, #tpu.memory_space<vmem>>, vector<1x32x128xf32>,
    %71 = vector.shape_cast %69 : vector<1x32x128xf32> to vector<1x16x256xf32>
    %72 = vector.extract_strided_slice %71 {offsets = [0, 0, 128], sizes = [1, 16, 128], strides = [1, 1, 1]} : vector<1x16x256xf32> to vector<1x16x128xf32>
    %cst_34 = arith.constant 0.000000e+00 : f32
    %73 = vector.broadcast %cst_34 : f32 to vector<1x1x128xf32>
    %74 = vector.extract_strided_slice %72 {offsets = [0, 0, 0], sizes = [1, 15, 128], strides = [1, 1, 1]} : vector<1x16x128xf32> to vector<1x15x128xf32>
    %75 = tpu.concatenate %73, %74 in 1 : vector<1x1x128xf32>, vector<1x15x128xf32> -> vector<1x16x128xf32>
    %76 = tpu.concatenate %75, %71 in 2 : vector<1x16x128xf32>, vector<1x16x256xf32> -> vector<1x16x384xf32>
    %77 = vector.shape_cast %76 : vector<1x16x384xf32> to vector<16x384xf32>
    %78 = arith.truncf %77 : vector<16x384xf32> to vector<16x384xbf16>
    %c0_35 = arith.constant 0 : index
    %c0_36 = arith.constant 0 : index
    %79 = vector.load %arg10[%c0_35, %c0_36] : memref<384x128xbf16, #tpu.memory_space<vmem>>, vector<384x128xbf16>
    %cst_37 = arith.constant dense<0.000000e+00> : vector<16x128xf32>
    %80 = tpu.matmul %78, %79, %cst_37 {dimension_numbers = #tpu.dot_dimension_numbers<[1], [0], [0], [1], [0, 0, 1, 1], [], []>} : vector<16x384xbf16>, vector<384x128xbf16>, vector<16x128xf32> -> vector<16x128xf32>
    %c0_38 = arith.constant 0 : index
    %c0_39 = arith.constant 0 : index
    %81 = vector.load %arg11[%c0_38, %c0_39] : memref<1x128xf32, #tpu.memory_space<vmem>>, vector<1x128xf32>
    %82 = vector.broadcast %81 : vector<1x128xf32> to vector<16x128xf32>
    %83 = arith.addf %80, %82 : vector<16x128xf32>
    %cst_40 = arith.constant 0.000000e+00 : f32
    %84 = vector.broadcast %cst_40 : f32 to vector<16x128xf32>
    %85 = arith.maximumf %83, %84 : vector<16x128xf32>
    %86 = vector.shape_cast %85 : vector<16x128xf32> to vector<1x16x128xf32>
    %c0_41 = arith.constant 0 : index
    %c0_42 = arith.constant 0 : index
    %c0_43 = arith.constant 0 : index
    %87 = vector.load %arg20[%c0_41, %c0_42, %c0_43] : memref<1x16x128xf32, #tpu.memory_space<vmem>>, vector<1x16x128xf32>
    tpu.vector_store %arg20[%c0_41, %c0_42, %c0_43], %86 {strides = array<i32>} : memref<1x16x128xf32, #tpu.memory_space<vmem>>, vector<1x16x128xf32>,
    %88 = vector.shape_cast %86 : vector<1x16x128xf32> to vector<1x8x256xf32>
    %89 = vector.extract_strided_slice %88 {offsets = [0, 0, 128], sizes = [1, 8, 128], strides = [1, 1, 1]} : vector<1x8x256xf32> to vector<1x8x128xf32>
    %cst_44 = arith.constant 0.000000e+00 : f32
    %90 = vector.broadcast %cst_44 : f32 to vector<1x1x128xf32>
    %91 = vector.extract_strided_slice %89 {offsets = [0, 0, 0], sizes = [1, 7, 128], strides = [1, 1, 1]} : vector<1x8x128xf32> to vector<1x7x128xf32>
    %92 = tpu.concatenate %90, %91 in 1 : vector<1x1x128xf32>, vector<1x7x128xf32> -> vector<1x8x128xf32>
    %93 = tpu.concatenate %92, %88 in 2 : vector<1x8x128xf32>, vector<1x8x256xf32> -> vector<1x8x384xf32>
    %94 = vector.shape_cast %93 : vector<1x8x384xf32> to vector<8x384xf32>
    %95 = arith.truncf %94 : vector<8x384xf32> to vector<8x384xbf16>
    %c0_45 = arith.constant 0 : index
    %c0_46 = arith.constant 0 : index
    %96 = vector.load %arg12[%c0_45, %c0_46] : memref<384x128xbf16, #tpu.memory_space<vmem>>, vector<384x128xbf16>
    %cst_47 = arith.constant dense<0.000000e+00> : vector<8x128xf32>
    %97 = tpu.matmul %95, %96, %cst_47 {dimension_numbers = #tpu.dot_dimension_numbers<[1], [0], [0], [1], [0, 0, 1, 1], [], []>} : vector<8x384xbf16>, vector<384x128xbf16>, vector<8x128xf32> -> vector<8x128xf32>
    %c0_48 = arith.constant 0 : index
    %c0_49 = arith.constant 0 : index
    %98 = vector.load %arg13[%c0_48, %c0_49] : memref<1x128xf32, #tpu.memory_space<vmem>>, vector<1x128xf32>
    %99 = vector.broadcast %98 : vector<1x128xf32> to vector<8x128xf32>
    %100 = arith.addf %97, %99 : vector<8x128xf32>
    %cst_50 = arith.constant 0.000000e+00 : f32
    %101 = vector.broadcast %cst_50 : f32 to vector<8x128xf32>
    %102 = arith.maximumf %100, %101 : vector<8x128xf32>
    %103 = vector.shape_cast %102 : vector<8x128xf32> to vector<1x8x128xf32>
    %c0_51 = arith.constant 0 : index
    %c0_52 = arith.constant 0 : index
    %c0_53 = arith.constant 0 : index
    %104 = vector.load %arg21[%c0_51, %c0_52, %c0_53] : memref<1x8x128xf32, #tpu.memory_space<vmem>>, vector<1x8x128xf32>
    tpu.vector_store %arg21[%c0_51, %c0_52, %c0_53], %103 {strides = array<i32>} : memref<1x8x128xf32, #tpu.memory_space<vmem>>, vector<1x8x128xf32>,
    %105 = vector.shape_cast %103 : vector<1x8x128xf32> to vector<1x4x256xf32>
    %106 = vector.extract_strided_slice %105 {offsets = [0, 0, 128], sizes = [1, 4, 128], strides = [1, 1, 1]} : vector<1x4x256xf32> to vector<1x4x128xf32>
    %cst_54 = arith.constant 0.000000e+00 : f32
    %107 = vector.broadcast %cst_54 : f32 to vector<1x1x128xf32>
    %108 = vector.extract_strided_slice %106 {offsets = [0, 0, 0], sizes = [1, 3, 128], strides = [1, 1, 1]} : vector<1x4x128xf32> to vector<1x3x128xf32>
    %109 = tpu.concatenate %107, %108 in 1 : vector<1x1x128xf32>, vector<1x3x128xf32> -> vector<1x4x128xf32>
    %110 = tpu.concatenate %109, %105 in 2 : vector<1x4x128xf32>, vector<1x4x256xf32> -> vector<1x4x384xf32>
    %111 = vector.shape_cast %110 : vector<1x4x384xf32> to vector<4x384xf32>
    %112 = arith.truncf %111 : vector<4x384xf32> to vector<4x384xbf16>
    %c0_55 = arith.constant 0 : index
    %c0_56 = arith.constant 0 : index
    %113 = vector.load %arg14[%c0_55, %c0_56] : memref<384x128xbf16, #tpu.memory_space<vmem>>, vector<384x128xbf16>
    %cst_57 = arith.constant dense<0.000000e+00> : vector<4x128xf32>
    %114 = tpu.matmul %112, %113, %cst_57 {dimension_numbers = #tpu.dot_dimension_numbers<[1], [0], [0], [1], [0, 0, 1, 1], [], []>} : vector<4x384xbf16>, vector<384x128xbf16>, vector<4x128xf32> -> vector<4x128xf32>
    %c0_58 = arith.constant 0 : index
    %c0_59 = arith.constant 0 : index
    %115 = vector.load %arg15[%c0_58, %c0_59] : memref<1x128xf32, #tpu.memory_space<vmem>>, vector<1x128xf32>
    %116 = vector.broadcast %115 : vector<1x128xf32> to vector<4x128xf32>
    %117 = arith.addf %114, %116 : vector<4x128xf32>
    %cst_60 = arith.constant 0.000000e+00 : f32
    %118 = vector.broadcast %cst_60 : f32 to vector<4x128xf32>
    %119 = arith.maximumf %117, %118 : vector<4x128xf32>
    %120 = vector.shape_cast %119 : vector<4x128xf32> to vector<1x4x128xf32>
    %c0_61 = arith.constant 0 : index
    %c0_62 = arith.constant 0 : index
    %c0_63 = arith.constant 0 : index
    %121 = vector.load %arg22[%c0_61, %c0_62, %c0_63] : memref<1x4x128xf32, #tpu.memory_space<vmem>>, vector<1x4x128xf32>
    tpu.vector_store %arg22[%c0_61, %c0_62, %c0_63], %120 {strides = array<i32>} : memref<1x4x128xf32, #tpu.memory_space<vmem>>, vector<1x4x128xf32>,
    %122 = vector.shape_cast %120 : vector<1x4x128xf32> to vector<1x2x256xf32>
    %123 = vector.extract_strided_slice %122 {offsets = [0, 0, 128], sizes = [1, 2, 128], strides = [1, 1, 1]} : vector<1x2x256xf32> to vector<1x2x128xf32>
    %cst_64 = arith.constant 0.000000e+00 : f32
    %124 = vector.broadcast %cst_64 : f32 to vector<1x1x128xf32>
    %125 = vector.extract_strided_slice %123 {offsets = [0, 0, 0], sizes = [1, 1, 128], strides = [1, 1, 1]} : vector<1x2x128xf32> to vector<1x1x128xf32>
    %126 = tpu.concatenate %124, %125 in 1 : vector<1x1x128xf32>, vector<1x1x128xf32> -> vector<1x2x128xf32>
    %127 = tpu.concatenate %126, %122 in 2 : vector<1x2x128xf32>, vector<1x2x256xf32> -> vector<1x2x384xf32>
    %128 = vector.shape_cast %127 : vector<1x2x384xf32> to vector<2x384xf32>
    %129 = arith.truncf %128 : vector<2x384xf32> to vector<2x384xbf16>
    %c0_65 = arith.constant 0 : index
    %c0_66 = arith.constant 0 : index
    %130 = vector.load %arg16[%c0_65, %c0_66] : memref<384x128xbf16, #tpu.memory_space<vmem>>, vector<384x128xbf16>
    %cst_67 = arith.constant dense<0.000000e+00> : vector<2x128xf32>
    %131 = tpu.matmul %129, %130, %cst_67 {dimension_numbers = #tpu.dot_dimension_numbers<[1], [0], [0], [1], [0, 0, 1, 1], [], []>} : vector<2x384xbf16>, vector<384x128xbf16>, vector<2x128xf32> -> vector<2x128xf32>
    %c0_68 = arith.constant 0 : index
    %c0_69 = arith.constant 0 : index
    %132 = vector.load %arg17[%c0_68, %c0_69] : memref<1x128xf32, #tpu.memory_space<vmem>>, vector<1x128xf32>
    %133 = vector.broadcast %132 : vector<1x128xf32> to vector<2x128xf32>
    %134 = arith.addf %131, %133 : vector<2x128xf32>
    %cst_70 = arith.constant 0.000000e+00 : f32
    %135 = vector.broadcast %cst_70 : f32 to vector<2x128xf32>
    %136 = arith.maximumf %134, %135 : vector<2x128xf32>
    %137 = vector.shape_cast %136 : vector<2x128xf32> to vector<1x2x128xf32>
    %c0_71 = arith.constant 0 : index
    %c0_72 = arith.constant 0 : index
    %c0_73 = arith.constant 0 : index
    %138 = vector.load %arg23[%c0_71, %c0_72, %c0_73] : memref<1x2x128xf32, #tpu.memory_space<vmem>>, vector<1x2x128xf32>
    tpu.vector_store %arg23[%c0_71, %c0_72, %c0_73], %137 {strides = array<i32>} : memref<1x2x128xf32, #tpu.memory_space<vmem>>, vector<1x2x128xf32>,
    return
  }
  func.func @transform_0(%arg0: i32) -> (i32, i32, i32) {
    %c0_i32 = arith.constant 0 : i32
    %c0_i32_0 = arith.constant 0 : i32
    %c0_i32_1 = arith.constant 0 : i32
    return %arg0, %c0_i32, %c0_i32_0 : i32, i32, i32
  }
  func.func @transform_1(%arg0: i32) -> (i32, i32) {
    %c0_i32 = arith.constant 0 : i32
    %c0_i32_0 = arith.constant 0 : i32
    %c0_i32_1 = arith.constant 0 : i32
    return %c0_i32, %c0_i32_0 : i32, i32
  }
  func.func @transform_2(%arg0: i32) -> (i32, i32) {
    %c0_i32 = arith.constant 0 : i32
    %c0_i32_0 = arith.constant 0 : i32
    %c0_i32_1 = arith.constant 0 : i32
    return %c0_i32, %c0_i32_0 : i32, i32
  }
  func.func @transform_3(%arg0: i32) -> (i32, i32) {
    %c0_i32 = arith.constant 0 : i32
    %c0_i32_0 = arith.constant 0 : i32
    %c0_i32_1 = arith.constant 0 : i32
    return %c0_i32, %c0_i32_0 : i32, i32
  }
  func.func @transform_4(%arg0: i32) -> (i32, i32) {
    %c0_i32 = arith.constant 0 : i32
    %c0_i32_0 = arith.constant 0 : i32
    %c0_i32_1 = arith.constant 0 : i32
    return %c0_i32, %c0_i32_0 : i32, i32
  }
  func.func @transform_5(%arg0: i32) -> (i32, i32) {
    %c0_i32 = arith.constant 0 : i32
    %c0_i32_0 = arith.constant 0 : i32
    %c0_i32_1 = arith.constant 0 : i32
    return %c0_i32, %c0_i32_0 : i32, i32
  }
  func.func @transform_6(%arg0: i32) -> (i32, i32) {
    %c0_i32 = arith.constant 0 : i32
    %c0_i32_0 = arith.constant 0 : i32
    %c0_i32_1 = arith.constant 0 : i32
    return %c0_i32, %c0_i32_0 : i32, i32
  }
  func.func @transform_7(%arg0: i32) -> (i32, i32) {
    %c0_i32 = arith.constant 0 : i32
    %c0_i32_0 = arith.constant 0 : i32
    %c0_i32_1 = arith.constant 0 : i32
    return %c0_i32, %c0_i32_0 : i32, i32
  }
  func.func @transform_8(%arg0: i32) -> (i32, i32) {
    %c0_i32 = arith.constant 0 : i32
    %c0_i32_0 = arith.constant 0 : i32
    %c0_i32_1 = arith.constant 0 : i32
    return %c0_i32, %c0_i32_0 : i32, i32
  }
  func.func @transform_9(%arg0: i32) -> (i32, i32) {
    %c0_i32 = arith.constant 0 : i32
    %c0_i32_0 = arith.constant 0 : i32
    %c0_i32_1 = arith.constant 0 : i32
    return %c0_i32, %c0_i32_0 : i32, i32
  }
  func.func @transform_10(%arg0: i32) -> (i32, i32) {
    %c0_i32 = arith.constant 0 : i32
    %c0_i32_0 = arith.constant 0 : i32
    %c0_i32_1 = arith.constant 0 : i32
    return %c0_i32, %c0_i32_0 : i32, i32
  }
  func.func @transform_11(%arg0: i32) -> (i32, i32) {
    %c0_i32 = arith.constant 0 : i32
    %c0_i32_0 = arith.constant 0 : i32
    %c0_i32_1 = arith.constant 0 : i32
    return %c0_i32, %c0_i32_0 : i32, i32
  }
  func.func @transform_12(%arg0: i32) -> (i32, i32) {
    %c0_i32 = arith.constant 0 : i32
    %c0_i32_0 = arith.constant 0 : i32
    %c0_i32_1 = arith.constant 0 : i32
    return %c0_i32, %c0_i32_0 : i32, i32
  }
  func.func @transform_13(%arg0: i32) -> (i32, i32) {
    %c0_i32 = arith.constant 0 : i32
    %c0_i32_0 = arith.constant 0 : i32
    %c0_i32_1 = arith.constant 0 : i32
    return %c0_i32, %c0_i32_0 : i32, i32
  }
  func.func @transform_14(%arg0: i32) -> (i32, i32) {
    %c0_i32 = arith.constant 0 : i32
    %c0_i32_0 = arith.constant 0 : i32
    %c0_i32_1 = arith.constant 0 : i32
    return %c0_i32, %c0_i32_0 : i32, i32
  }
  func.func @transform_15(%arg0: i32) -> (i32, i32) {
    %c0_i32 = arith.constant 0 : i32
    %c0_i32_0 = arith.constant 0 : i32
    %c0_i32_1 = arith.constant 0 : i32
    return %c0_i32, %c0_i32_0 : i32, i32
  }
  func.func @transform_16(%arg0: i32) -> (i32, i32) {
    %c0_i32 = arith.constant 0 : i32
    %c0_i32_0 = arith.constant 0 : i32
    %c0_i32_1 = arith.constant 0 : i32
    return %c0_i32, %c0_i32_0 : i32, i32
  }
  func.func @transform_17(%arg0: i32) -> (i32, i32, i32) {
    %c0_i32 = arith.constant 0 : i32
    %c0_i32_0 = arith.constant 0 : i32
    %c0_i32_1 = arith.constant 0 : i32
    return %arg0, %c0_i32, %c0_i32_0 : i32, i32, i32
  }
  func.func @transform_18(%arg0: i32) -> (i32, i32, i32) {
    %c0_i32 = arith.constant 0 : i32
    %c0_i32_0 = arith.constant 0 : i32
    %c0_i32_1 = arith.constant 0 : i32
    return %arg0, %c0_i32, %c0_i32_0 : i32, i32, i32
  }
  func.func @transform_19(%arg0: i32) -> (i32, i32, i32) {
    %c0_i32 = arith.constant 0 : i32
    %c0_i32_0 = arith.constant 0 : i32
    %c0_i32_1 = arith.constant 0 : i32
    return %arg0, %c0_i32, %c0_i32_0 : i32, i32, i32
  }
  func.func @transform_20(%arg0: i32) -> (i32, i32, i32) {
    %c0_i32 = arith.constant 0 : i32
    %c0_i32_0 = arith.constant 0 : i32
    %c0_i32_1 = arith.constant 0 : i32
    return %arg0, %c0_i32, %c0_i32_0 : i32, i32, i32
  }
  func.func @transform_21(%arg0: i32) -> (i32, i32, i32) {
    %c0_i32 = arith.constant 0 : i32
    %c0_i32_0 = arith.constant 0 : i32
    %c0_i32_1 = arith.constant 0 : i32
    return %arg0, %c0_i32, %c0_i32_0 : i32, i32, i32
  }
  func.func @transform_22(%arg0: i32) -> (i32, i32, i32) {
    %c0_i32 = arith.constant 0 : i32
    %c0_i32_0 = arith.constant 0 : i32
    %c0_i32_1 = arith.constant 0 : i32
    return %arg0, %c0_i32, %c0_i32_0 : i32, i32, i32
  }
}

</mosaic_0001>

<bundles_post_ra>
// kernel: featnet.1
= control target key start
LH: loop header
LB: loop body
LE: loop exit
PB: predicated region body
PF: predicated region fallthrough
CT: control target
= control target key end

     0   :  { %s8230_s0 = inlined_call_operand.vmem [shape: f32[2,128,128], index: 0, kind: input, shape index: {}]   ;;  %s8231_s1 = inlined_call_operand.vmem [shape: bf16[128,128], index: 1, kind: input, shape index: {}]   ;;  %s8232_s2 = inlined_call_operand.vmem [shape: f32[1,128], index: 2, kind: input, shape index: {}]   ;;  %s8233_s3 = inlined_call_operand.vmem [shape: bf16[1152,128], index: 3, kind: input, shape index: {}]   ;;  %s8234_s4 = inlined_call_operand.vmem [shape: f32[1,128], index: 4, kind: input, shape index: {}]   ;;  %s8235_s5 = inlined_call_operand.vmem [shape: bf16[384,128], index: 5, kind: input, shape index: {}]   ;;  %s8236_s6 = inlined_call_operand.vmem [shape: f32[1,128], index: 6, kind: input, shape index: {}]   ;;  %s8237_s7 = inlined_call_operand.vmem [shape: bf16[384,128], index: 7, kind: input, shape index: {}]   ;;  %s8238_s8 = inlined_call_operand.vmem [shape: f32[1,128], index: 8, kind: input, shape index: {}]   ;;  %s8239_s9 = inlined_call_operand.vmem [shape: bf16[384,128], index: 9, kind: input, shape index: {}]   ;;  %s8240_s10 = inlined_call_operand.vmem [shape: f32[1,128], index: 10, kind: input, shape index: {}]   ;;  %s8241_s11 = inlined_call_operand.vmem [shape: bf16[384,128], index: 11, kind: input, shape index: {}]   ;;  %s8242_s12 = inlined_call_operand.vmem [shape: f32[1,128], index: 12, kind: input, shape index: {}]   ;;  %s8243_s13 = inlined_call_operand.vmem [shape: bf16[384,128], index: 13, kind: input, shape index: {}]   ;;  %s8244_s14 = inlined_call_operand.vmem [shape: f32[1,128], index: 14, kind: input, shape index: {}]   ;;  %s8245_s15 = inlined_call_operand.vmem [shape: bf16[384,128], index: 15, kind: input, shape index: {}]   ;;  %s8246_s16 = inlined_call_operand.vmem [shape: f32[1,128], index: 16, kind: input, shape index: {}]   ;;  %s8247_s17 = inlined_call_operand.hbm [shape: f32[2,64,128], index: 17, kind: output, shape index: {0}]   ;;  %s8248_s18 = inlined_call_operand.hbm [shape: f32[2,32,128], index: 18, kind: output, shape index: {1}]   ;;  %s8249_s19 = inlined_call_operand.hbm [shape: f32[2,16,128], index: 19, kind: output, shape index: {2}]   ;;  %s8250_s20 = inlined_call_operand.hbm [shape: f32[2,8,128], index: 20, kind: output, shape index: {3}]   ;;  %s8251_s21 = inlined_call_operand.hbm [shape: f32[2,4,128], index: 21, kind: output, shape index: {4}]   ;;  %s8252_s22 = inlined_call_operand.hbm [shape: f32[2,2,128], index: 22, kind: output, shape index: {5}]  }
   0x1   :  { %8311 = sst [smem:[#allocation56_spill]] %s8230_s0 }
   0x2   :  { %8312 = sst [smem:[#allocation57_spill]] %s8231_s1 }
   0x3   :  { %8313 = sst [smem:[#allocation58_spill]] %s8232_s2 }
   0x4   :  { %8314 = sst [smem:[#allocation59_spill]] %s8233_s3 }
   0x5   :  { %8315 = sst [smem:[#allocation60_spill]] %s8234_s4 }
   0x6   :  { %8316 = sst [smem:[#allocation61_spill]] %s8235_s5 }
   0x7   :  { %8317 = sst [smem:[#allocation62_spill]] %s8236_s6 }
   0x8   :  { %8318 = sst [smem:[#allocation63_spill]] %s8237_s7 }
   0x9   :  { %8319 = sst [smem:[#allocation64_spill]] %s8238_s8 }
   0xa   :  { %8320 = sst [smem:[#allocation65_spill]] %s8239_s9 }
   0xb   :  { %8321 = sst [smem:[#allocation66_spill]] %s8240_s10 }
   0xc   :  { %8322 = sst [smem:[#allocation67_spill]] %s8241_s11 }
   0xd   :  { %8323 = sst [smem:[#allocation68_spill]] %s8242_s12 }
   0xe   :  { %8324 = sst [smem:[#allocation69_spill]] %s8243_s13 }
   0xf   :  { %8325 = sst [smem:[#allocation70_spill]] %s8244_s14 }
  0x10   :  { %8326 = sst [smem:[#allocation71_spill]] %s8245_s15 }
  0x11   :  { %8327 = sst [smem:[#allocation72_spill]] %s8247_s17 }
  0x12   :  { %8328 = sst [smem:[#allocation73_spill]] %s8252_s22 }
  0x13   :  { %28 = vsyncpa [#allocation3], 0 }
  0x14   :  { %30 = vsyncpa [#allocation3 + $0x1], 0 }
  0x15   :  { %31 = vsyncpa [#allocation5], 0 }
  0x16   :  { %33 = vsyncpa [#allocation5 + $0x1], 0 }
  0x17   :  { %34 = vsyncpa [#allocation8], 0 }
  0x18   :  { %36 = vsyncpa [#allocation8 + $0x1], 0 }
  0x19   :  { %37 = vsyncpa [#allocation11], 0 }
  0x1a   :  { %39 = vsyncpa [#allocation11 + $0x1], 0  ;;  %s6347_s3 = smov 0   ;;  %s6349_s28 = smov 0  }
  0x1b   :  { %s6351_s29 = smov 0   ;;  %s6353_s30 = smov 0  }
  0x1c LB: > { %8329 = sst [smem:[#allocation16_spill]] %s6214_s3  ;;  %s6368_s4 = sadd.s32 4294967295, %s6226_s30   ;;  %s6226_s30 = sphi %s6353_s30, %s8482_s30   ;;  %s6222_s29 = sphi %s6351_s29, %s8484_s29   ;;  %s6218_s28 = sphi %s6349_s28, %s8486_s28   ;;  %s6214_s3 = sphi %s6347_s3, %s8485_s3  }
  0x1d   : > { %8330 = sst [smem:[#allocation17_spill]] %s6222_s29  ;;  %s8256_s0 = sadd.s32 4294967294, %s6226_s30  }
  0x1e   : > { %8331 = sst [smem:[#allocation18_spill]] %s6226_s30  ;;  %s6372_s23 = sadd.s32 1, %s6226_s30  }
  0x1f   : > { %8332 = sst [smem:[#allocation19_spill]] %s6372_s23  ;;  %s414_s1 = sadd.s32 1, %s6222_s29 }
  0x20   : > { %s411_s5 = ssub.s32 %s6226_s30, %s6372_s23  ;;  %p424_p0 = scmp.ne.s32.totalorder %s6222_s29, %s6218_s28 }
  0x21   : > { %p412_p1 = scmp.eq.s32.totalorder %s411_s5, 0  ;;  %p425_p2 = scmp.eq.s32.totalorder %s6368_s4, 1 }
  0x22   : > { %p430_p3 = scmp.ne.s32.totalorder %s6218_s28, %s6214_s3  ;;  %p431_p4 = scmp.eq.s32.totalorder %s8256_s0, 1 }
  0x23   : > { %s6385_s24 = scalar_select %p412_p1, %s6222_s29, %s414_s1  }
  0x24   : > { %p6387_p5 = por %p425_p2, %p424_p0  ;;  %p6391_p6 = por %p431_p4, %p430_p3 }
  0x25   : > { %8333 = sst [smem:[#allocation20_spill]] %s6385_s24  ;;  %p4752_p7 = scmp.ge.s32.totalorder %s6226_s30, 1 }
  0x26   : > { %s8335_s25 = scalar_select %p6391_p6, 1, 0 }
  0x27   : > { %p635_p8 = scmp.lt.s32.totalorder %s6226_s30, 3 }
  0x28   : > { %8336 = sst [smem:[#allocation21_spill]] %s8335_s25 }
  0x29   : > { %p636_p9 = pnand %p4752_p7, %p635_p8 }
  0x2b   : > { %639 = sbr.rel (%p636_p9) target bundleno = 1787 (0x6fb), region = 88 }
  0x30   : > { %s8337_s27 = sld [smem:[#allocation57_spill]]  ;;  %p722_p10 = scmp.lt.s32.totalorder %s6368_s4, 1  ;;  %vm900_vm0 = vcmask 1043456   ;;  %vm1252_vm2 = vcmask 1040384   ;;  %vm6228_vm3 = vmmov 1   ;;  %vm1152_vm5 = vcmask 1042432  }
  0x31   : > { %s8338_s30 = sld [smem:[#allocation56_spill]]  ;;  %vm5081_vm1 = vmneg %vm900_vm0  ;;  %vm1202_vm6 = vcmask 1041408   ;;  %vm953_vm7 = vcmask 1046528   ;;  %vm1003_vm8 = vcmask 1045504   ;;  %vm1053_vm9 = vcmask 1044480   ;;  %s7657_s0 = sand.u32 1, %s6218_s28  }
  0x32   : > { %s723_s25 = scalar_select %p722_p10, %s6368_s4, 1  ;;  %vm5082_vm4 = vmpackc.low %vm6228_vm3, %vm5081_vm1 }
  0x33   : > { %s8339_s2 = sld [smem:[#allocation59_spill]]  ;;  %vm5085_vm10 = vmpackc.low %vm900_vm0, %vm6228_vm3  ;;  %s4753_s29 = sshll.u32 %s7657_s0, 6 }
  0x34   : > { %s5708_s3 = sshll.u32 %s723_s25, 7  ;;  %s8446_s1 = sld [smem:[#allocation61_spill]]  ;;  %vm7492_vm11 = vmneg %vm1252_vm2 }
  0x35   : > { %vm7500_vm12 = vmpackc.low %vm6228_vm3, %vm7492_vm11  ;;  %s8462_s7 = sld [smem:[#allocation63_spill]]  ;;  %s4416_s25 = sand.u32 1, %s6368_s4  }
  0x36   : > { %v5716_v0 = vld [vmem:[%s8337_s27 + $0x38] sm:$0xff]  ;;  %v5715_v1 = vld [vmem:[%s8337_s27 + $0x30] sm:$0xff]  ;;  %v5714_v2 = vld [vmem:[%s8337_s27 + $0x28] sm:$0xff]  ;;  %s8464_s9 = sld [smem:[#allocation65_spill]] }
  0x37   : > { %819 = vmatpush.bf16.msra.mxu0 %v5716_v0  ;;  %v5713_v3 = vld [vmem:[%s8337_s27 + $0x20] sm:$0xff]  ;;  %v5712_v4 = vld [vmem:[%s8337_s27 + $0x18] sm:$0xff]  ;;  %v5711_v5 = vld [vmem:[%s8337_s27 + $0x10] sm:$0xff]  ;;  %s6423_s22 = scalar_lea.vmem %s8338_s30, %s5708_s3  ;;  %s8386_s3 = sld [smem:[#allocation60_spill]] }
  0x38   : > { %v5710_v6 = vld [vmem:[%s8337_s27 + $0x8] sm:$0xff]  ;;  %v5709_v7 = vld [vmem:[%s8337_s27] sm:$0xff]  ;;  %v729_v11 = vld [vmem:[%s6423_s22 + $0x10] sm:$0xff]  ;;  %s7671_s30 = scalar_lea.vmem [#allocation2], %s4753_s29  ;;  %s8465_s8 = sld [smem:[#allocation64_spill]] }
  0x39   : > { %v727_v8 = vld [vmem:[%s6423_s22] sm:$0xff]  ;;  %v728_v9 = vld [vmem:[%s6423_s22 + $0x8] sm:$0xff]  ;;  %v730_v12 = vld [vmem:[%s6423_s22 + $0x18] sm:$0xff]  ;;  %s8466_s11 = sld [smem:[#allocation67_spill]]  ;;  %s4755_s29 = sshll.u32 %s7657_s0, 4 }
  0x3a   : > { %v743_v10 = vpack.c.bf16 %v728_v9, %v727_v8  ;;  %v744_v13 = vpack.c.bf16 %v730_v12, %v729_v11  ;;  %v731_v14 = vld [vmem:[%s6423_s22 + $0x20] sm:$0xff]  ;;  %v732_v15 = vld [vmem:[%s6423_s22 + $0x28] sm:$0xff]  ;;  %v733_v17 = vld [vmem:[%s6423_s22 + $0x30] sm:$0xff]  ;;  %s8467_s10 = sld [smem:[#allocation66_spill]]  ;;  %s7914_s24 = scalar_lea.vmem [#allocation6], %s4755_s29 }
  0x3b   : > { %820 = vmatpush.bf16.msra.mxu0 %v5715_v1  ;;  %v745_v16 = vpack.c.bf16 %v732_v15, %v731_v14  ;;  %v734_v18 = vld [vmem:[%s6423_s22 + $0x38] sm:$0xff]  ;;  %v735_v20 = vld [vmem:[%s6423_s22 + $0x40] sm:$0xff]  ;;  %v736_v21 = vld [vmem:[%s6423_s22 + $0x48] sm:$0xff]  ;;  %s8470_s13 = sld [smem:[#allocation69_spill]]  ;;  %s4483_s26 = sshll.u32 %s7914_s24, 4  ;;  %s8094_s26 = int_to_ptr.vmem [resolvable:$true] %s4483_s26 }
  0x3c   : > { %v746_v19 = vpack.c.bf16 %v734_v18, %v733_v17  ;;  %v747_v22 = vpack.c.bf16 %v736_v21, %v735_v20  ;;  %v737_v23 = vld [vmem:[%s6423_s22 + $0x50] sm:$0xff]  ;;  %v738_v24 = vld [vmem:[%s6423_s22 + $0x58] sm:$0xff]  ;;  %v5722_v31 = vld [vmem:[%s8339_s2 + $0x28] sm:$0xff]  ;;  %s8471_s12 = sld [smem:[#allocation68_spill]] }
  0x3d   : > { %v748_v25 = vpack.c.bf16 %v738_v24, %v737_v23  ;;  %v5724_v26 = vld [vmem:[%s8339_s2 + $0x38] sm:$0xff]  ;;  %v5723_v27 = vld [vmem:[%s8339_s2 + $0x30] sm:$0xff]  ;;  %v5721_v32 = vld [vmem:[%s8339_s2 + $0x20] sm:$0xff]  ;;  %s8472_s15 = sld [smem:[#allocation71_spill]] }
  0x3e   : > { %1954 = vmatpush.bf16.msra.mxu1 %v5724_v26  ;;  %v5732_v28 = vld [vmem:[%s8339_s2 + $0x78] sm:$0xff]  ;;  %v739_v33 = vld [vmem:[%s6423_s22 + $0x60] sm:$0xff]  ;;  %v740_v34 = vld [vmem:[%s6423_s22 + $0x68] sm:$0xff]  ;;  %s8473_s14 = sld [smem:[#allocation70_spill]] }
  0x3f   : > { %821 = vmatpush.bf16.msra.mxu0 %v5714_v2  ;;  %v5740_v29 = vld [vmem:[%s8339_s2 + $0xb8] sm:$0xff]  ;;  %2003 = vmatpush.bf16.msra.mxu2 %v5732_v28  ;;  %v749_v35 = vpack.c.bf16 %v740_v34, %v739_v33  ;;  %v5731_v36 = vld [vmem:[%s8339_s2 + $0x70] sm:$0xff]  ;;  %v5730_v40 = vld [vmem:[%s8339_s2 + $0x68] sm:$0xff] }
  0x40   : > { %v5748_v30 = vld [vmem:[%s8339_s2 + $0xf8] sm:$0xff]  ;;  %2052 = vmatpush.bf16.msra.mxu3 %v5740_v29  ;;  %v5739_v37 = vld [vmem:[%s8339_s2 + $0xb0] sm:$0xff]  ;;  %v5738_v41 = vld [vmem:[%s8339_s2 + $0xa8] sm:$0xff] }
  0x41   : > { %v5747_v38 = vld [vmem:[%s8339_s2 + $0xf0] sm:$0xff]  ;;  %v5720_v39 = vld [vmem:[%s8339_s2 + $0x18] sm:$0xff]  ;;  %v5746_v42 = vld [vmem:[%s8339_s2 + $0xe8] sm:$0xff] }
  0x42   : > { %1955 = vmatpush.bf16.msra.mxu1 %v5723_v27  ;;  %v5719_v43 = vld [vmem:[%s8339_s2 + $0x10] sm:$0xff]  ;;  %v5729_v44 = vld [vmem:[%s8339_s2 + $0x60] sm:$0xff]  ;;  %v5718_v47 = vld [vmem:[%s8339_s2 + $0x8] sm:$0xff] }
  0x43   : > { %822 = vmatpush.bf16.msra.mxu0 %v5713_v3  ;;  %2004 = vmatpush.bf16.msra.mxu2 %v5731_v36  ;;  %v5737_v45 = vld [vmem:[%s8339_s2 + $0xa0] sm:$0xff]  ;;  %v741_v48 = vld [vmem:[%s6423_s22 + $0x70] sm:$0xff]  ;;  %v742_v49 = vld [vmem:[%s6423_s22 + $0x78] sm:$0xff]  ;;  %s8340_s22 = sld [smem:[#allocation58_spill]] }
  0x44   : > { %2053 = vmatpush.bf16.msra.mxu3 %v5739_v37  ;;  %v5745_v46 = vld [vmem:[%s8339_s2 + $0xe0] sm:$0xff]  ;;  %v5728_v50 = vld [vmem:[%s8339_s2 + $0x58] sm:$0xff]  ;;  %v750_v54 = vpack.c.bf16 %v742_v49, %v741_v48  ;;  %v5727_v55 = vld [vmem:[%s8339_s2 + $0x50] sm:$0xff] }
  0x45   : > { %v5736_v51 = vld [vmem:[%s8339_s2 + $0x98] sm:$0xff]  ;;  %v5717_v53 = vld [vmem:[%s8339_s2] sm:$0xff]  ;;  %v5735_v56 = vld [vmem:[%s8339_s2 + $0x90] sm:$0xff] }
  0x46   : > { %1956 = vmatpush.bf16.msra.mxu1 %v5722_v31  ;;  %v5744_v52 = vld [vmem:[%s8339_s2 + $0xd8] sm:$0xff]  ;;  %v5743_v57 = vld [vmem:[%s8339_s2 + $0xd0] sm:$0xff]  ;;  %v5726_v58 = vld [vmem:[%s8339_s2 + $0x48] sm:$0xff] }
  0x47   : > { %823 = vmatpush.bf16.msra.mxu0 %v5712_v4  ;;  %2005 = vmatpush.bf16.msra.mxu2 %v5730_v40  ;;  %v5734_v59 = vld [vmem:[%s8339_s2 + $0x88] sm:$0xff]  ;;  %v5756_v61 = vld [vmem:[%s8339_s2 + $0x138] sm:$0xff]  ;;  %v5725_v62 = vld [vmem:[%s8339_s2 + $0x40] sm:$0xff] }
  0x48   : > { %2054 = vmatpush.bf16.msra.mxu3 %v5738_v41  ;;  %v5742_v60 = vld [vmem:[%s8339_s2 + $0xc8] sm:$0xff]  ;;  %v5733_v63 = vld [vmem:[%s8339_s2 + $0x80] sm:$0xff]  ;;  %vm7923_vm13 = vmpackc.low %vm7492_vm11, %vm7492_vm11 }
  0x49   : > { %v5741_v0 = vld [vmem:[%s8339_s2 + $0xc0] sm:$0xff]  ;;  %v5754_v40 = vld [vmem:[%s8339_s2 + $0x128] sm:$0xff] }
  0x4a   : > { %1957 = vmatpush.bf16.msra.mxu1 %v5721_v32  ;;  %v6546_v1 = vld [vmem:[%s8340_s22] ss:$0 sm:$0xff] }
  0x4b   : > { %824 = vmatpush.bf16.msra.mxu0 %v5711_v5  ;;  %2006 = vmatpush.bf16.msra.mxu2 %v5729_v44  ;;  %v5755_v5 = vld [vmem:[%s8339_s2 + $0x130] sm:$0xff] }
  0x4c   : > { %2055 = vmatpush.bf16.msra.mxu3 %v5737_v45 }
  0x4e   : > { %1958 = vmatpush.bf16.msra.mxu1 %v5720_v39 }
  0x4f   : > { %825 = vmatpush.bf16.msra.mxu0 %v5710_v6  ;;  %2007 = vmatpush.bf16.msra.mxu2 %v5728_v50 }
  0x50   : > { %2056 = vmatpush.bf16.msra.mxu3 %v5736_v51 }
  0x52   : > { %1959 = vmatpush.bf16.msra.mxu1 %v5719_v43 }
  0x53   : > { %826 = vmatpush.bf16.msra.mxu0 %v5709_v7  ;;  %2008 = vmatpush.bf16.msra.mxu2 %v5727_v55 }
  0x54   : > { %2057 = vmatpush.bf16.msra.mxu3 %v5735_v56 }
  0x56   : > { %827 = vmatmul.bf16.vlgmr.msra.gmra.mxu0 %v743_v10  ;;  %1960 = vmatpush.bf16.msra.mxu1 %v5718_v47 }
  0x57   : > { %2101 = vmatpush.bf16.msrb.mxu0 %v5748_v30  ;;  %2009 = vmatpush.bf16.msra.mxu2 %v5726_v58 }
  0x58   : > { %2058 = vmatpush.bf16.msra.mxu3 %v5734_v59 }
  0x5a   : > { %1961 = vmatpush.bf16.msra.mxu1 %v5717_v53 }
  0x5b   : > { %2102 = vmatpush.bf16.msrb.mxu0 %v5747_v38  ;;  %2010 = vmatpush.bf16.msra.mxu2 %v5725_v62 }
  0x5c   : > { %2059 = vmatpush.bf16.msra.mxu3 %v5733_v63 }
  0x5e   : > { %2150 = vmatpush.bf16.msrb.mxu1 %v5756_v61 }
  0x5f   : > { %2103 = vmatpush.bf16.msrb.mxu0 %v5746_v42 }
  0x62   : > { %2151 = vmatpush.bf16.msrb.mxu1 %v5755_v5 }
  0x63   : > { %2104 = vmatpush.bf16.msrb.mxu0 %v5745_v46 }
  0x66   : > { %832 = vmatmul.bf16.gmra.mxu0 %v744_v13  ;;  %2152 = vmatpush.bf16.msrb.mxu1 %v5754_v40 }
  0x67   : > { %2105 = vmatpush.bf16.msrb.mxu0 %v5744_v52 }
  0x6b   : > { %2106 = vmatpush.bf16.msrb.mxu0 %v5743_v57 }
  0x6f   : > { %2107 = vmatpush.bf16.msrb.mxu0 %v5742_v60 }
  0x73   : > { %2108 = vmatpush.bf16.msrb.mxu0 %v5741_v0 }
  0x76   : > { %837 = vmatmul.bf16.gmra.mxu0 %v745_v16 }
  0x86   : > { %842 = vmatmul.bf16.gmra.mxu0 %v746_v19 }
  0x96   : > { %847 = vmatmul.bf16.gmra.mxu0 %v747_v22 }
  0xa6   : > { %852 = vmatmul.bf16.gmra.mxu0 %v748_v25 }
  0xb6   : > { %857 = vmatmul.bf16.gmra.mxu0 %v749_v35 }
  0xc6   : > { %862 = vmatmul.bf16.gmra.mxu0 %v750_v54 }
  0xd3   : > { %v828_v2 = vpop.f32.mrf.mxu0 }
  0xd4   : > { %v829_v3 = vadd.f32 %v6546_v1, %v828_v2 }
  0xd6   : > { %v868_v4 = vmax.f32 %v829_v3, 0.0 }
  0xd8   : > { %v901_v6 = vrot.slane %v868_v4, 4 }
  0xda   : > { %v949_v10 = vsel %vm900_vm0, 0.0, %v901_v6 }
  0xdb   : > { %v830_v7 = vpop.f32.mrf.mxu0  ;;  %v1103_v13 = vrot.slane %v949_v10, 4  ;;  %v1153_v16 = vrot.slane %v949_v10, 5  ;;  %v1203_v17 = vrot.slane %v949_v10, 6  ;;  %v1253_v18 = vrot.slane %v949_v10, 7 }
  0xdc   : > { %v831_v8 = vadd.f32 %v6546_v1, %v830_v7  ;;  %v954_v33 = vrot.slane %v949_v10, 1  ;;  %v1004_v34 = vrot.slane %v949_v10, 2  ;;  %v1054_v35 = vrot.slane %v949_v10, 3 }
  0xde   : > { %v869_v9 = vmax.f32 %v831_v8, 0.0 }
  0xe0   : > { %v902_v11 = vrot.slane %v869_v9, 4 }
  0xe2   : > { %v6556_v12 = vsel %vm900_vm0, %v901_v6, %v902_v11 }
  0xe3   : > { %8341 = vst [vmem:[#allocation22_spill] sm:$0xff] %v6556_v12  ;;  %v833_v14 = vpop.f32.mrf.mxu0  ;;  %v5083_v15 = vpack.c.bf16 %v6556_v12, %v901_v6  ;;  %v1104_v20 = vrot.slane %v6556_v12, 4  ;;  %v1154_v21 = vrot.slane %v6556_v12, 5  ;;  %v1204_v22 = vrot.slane %v6556_v12, 6 }
  0xe4   : > { %v834_v19 = vadd.f32 %v6546_v1, %v833_v14  ;;  %v955_v23 = vrot.slane %v6556_v12, 1  ;;  %v1005_v24 = vrot.slane %v6556_v12, 2  ;;  %v1055_v25 = vrot.slane %v6556_v12, 3 }
  0xe5   : > { %5084 = vmatmul.msk.bf16.vlgmr.msra.gmra.mxu1 %vm5082_vm4, %v5083_v15  ;;  %v1254_v26 = vrot.slane %v6556_v12, 7  ;;  %v6569_v28 = vsel %vm900_vm0, %v1103_v13, %v1104_v20  ;;  %v6572_v29 = vsel %vm1152_vm5, %v1153_v16, %v1154_v21  ;;  %v6575_v30 = vsel %vm1202_vm6, %v1203_v17, %v1204_v22 }
  0xe6   : > { %v870_v27 = vmax.f32 %v834_v19, 0.0  ;;  %v956_v37 = vsel %vm953_vm7, %v954_v33, %v955_v23  ;;  %v1006_v38 = vsel %vm1003_vm8, %v1004_v34, %v1005_v24  ;;  %v1056_v39 = vsel %vm1053_vm9, %v1054_v35, %v1055_v25 }
  0xe7   : > { %v6578_v31 = vsel %vm1252_vm2, %v1253_v18, %v1254_v26 }
  0xe8   : > { %v904_v32 = vrot.slane %v870_v27, 4 }
  0xea   : > { %v6581_v36 = vsel %vm900_vm0, %v902_v11, %v904_v32 }
  0xeb   : > { %8342 = vst [vmem:[#allocation23_spill] sm:$0xff] %v6581_v36  ;;  %v835_v41 = vpop.f32.mrf.mxu0  ;;  %v957_v42 = vrot.slane %v6581_v36, 1  ;;  %v1007_v43 = vrot.slane %v6581_v36, 2  ;;  %v1057_v44 = vrot.slane %v6581_v36, 3  ;;  %v1106_v45 = vrot.slane %v6581_v36, 4 }
  0xec   : > { %v836_v46 = vadd.f32 %v6546_v1, %v835_v41  ;;  %v1156_v47 = vrot.slane %v6581_v36, 5  ;;  %v1206_v48 = vrot.slane %v6581_v36, 6  ;;  %v1256_v49 = vrot.slane %v6581_v36, 7 }
  0xed   : > { %v958_v50 = vsel %vm953_vm7, %v955_v23, %v957_v42  ;;  %v1008_v51 = vsel %vm1003_vm8, %v1005_v24, %v1007_v43  ;;  %v1058_v52 = vsel %vm1053_vm9, %v1055_v25, %v1057_v44  ;;  %v6601_v53 = vsel %vm900_vm0, %v1104_v20, %v1106_v45 }
  0xee   : > { %v871_v54 = vmax.f32 %v836_v46, 0.0  ;;  %v1303_v55 = vpack.c.bf16 %v958_v50, %v956_v37  ;;  %v1304_v56 = vpack.c.bf16 %v1008_v51, %v1006_v38  ;;  %v1305_v57 = vpack.c.bf16 %v1058_v52, %v1056_v39 }
  0xef   : > { %v6606_v59 = vsel %vm1152_vm5, %v1154_v21, %v1156_v47  ;;  %v6609_v60 = vsel %vm1202_vm6, %v1204_v22, %v1206_v48  ;;  %v6612_v61 = vsel %vm1252_vm2, %v1254_v26, %v1256_v49  ;;  %v5753_v26 = vld [vmem:[%s8339_s2 + $0x120] sm:$0xff] }
  0xf0   : > { %v906_v62 = vrot.slane %v871_v54, 4  ;;  %2011 = vmatmul.bf16.vlgmr.msra.gmra.mxu2 %v1303_v55  ;;  %2060 = vmatmul.bf16.vlgmr.msra.gmra.mxu3 %v1304_v56 }
  0xf1   : > { %2109 = vmatmul.bf16.vlgmr.msrb.gmra.mxu0 %v1305_v57  ;;  %2153 = vmatpush.bf16.msrb.mxu1 %v5753_v26 }
  0xf2   : > { %v6623_v4 = vsel %vm900_vm0, %v904_v32, %v906_v62 }
  0xf3   : > { %8343 = vst [vmem:[#allocation24_spill] sm:$0xff] %v6623_v4  ;;  %v838_v5 = vpop.f32.mrf.mxu0  ;;  %v1311_v6 = vpack.c.bf16 %v6623_v4, %v6581_v36  ;;  %v1108_v8 = vrot.slane %v6623_v4, 4  ;;  %v1158_v9 = vrot.slane %v6623_v4, 5  ;;  %v1208_v10 = vrot.slane %v6623_v4, 6 }
  0xf4   : > { %v839_v7 = vadd.f32 %v6546_v1, %v838_v5  ;;  %v959_v11 = vrot.slane %v6623_v4, 1  ;;  %v1009_v13 = vrot.slane %v6623_v4, 2  ;;  %v1059_v14 = vrot.slane %v6623_v4, 3 }
  0xf5   : > { %1967 = vmatmul.bf16.gmra.mxu1 %v1311_v6  ;;  %v1258_v15 = vrot.slane %v6623_v4, 7  ;;  %v6636_v17 = vsel %vm900_vm0, %v1106_v45, %v1108_v8  ;;  %v6639_v18 = vsel %vm1152_vm5, %v1156_v47, %v1158_v9  ;;  %v6642_v19 = vsel %vm1202_vm6, %v1206_v48, %v1208_v10 }
  0xf6   : > { %v872_v16 = vmax.f32 %v839_v7, 0.0  ;;  %v960_v23 = vsel %vm953_vm7, %v957_v42, %v959_v11  ;;  %v1010_v24 = vsel %vm1003_vm8, %v1007_v43, %v1009_v13  ;;  %v1060_v25 = vsel %vm1053_vm9, %v1057_v44, %v1059_v14 }
  0xf7   : > { %v6645_v20 = vsel %vm1252_vm2, %v1256_v49, %v1258_v15 }
  0xf8   : > { %v908_v21 = vrot.slane %v872_v16, 4 }
  0xfa   : > { %v6648_v22 = vsel %vm900_vm0, %v906_v62, %v908_v21 }
  0xfb   : > { %8344 = vst [vmem:[#allocation25_spill] sm:$0xff] %v6648_v22  ;;  %v840_v27 = vpop.f32.mrf.mxu0  ;;  %v961_v32 = vrot.slane %v6648_v22, 1  ;;  %v1011_v33 = vrot.slane %v6648_v22, 2  ;;  %v1061_v34 = vrot.slane %v6648_v22, 3  ;;  %v1110_v35 = vrot.slane %v6648_v22, 4 }
  0xfc   : > { %v841_v37 = vadd.f32 %v6546_v1, %v840_v27  ;;  %v1160_v38 = vrot.slane %v6648_v22, 5  ;;  %v1210_v39 = vrot.slane %v6648_v22, 6  ;;  %v1260_v40 = vrot.slane %v6648_v22, 7 }
  0xfd   : > { %v962_v41 = vsel %vm953_vm7, %v959_v11, %v961_v32  ;;  %v1012_v42 = vsel %vm1003_vm8, %v1009_v13, %v1011_v33  ;;  %v1062_v43 = vsel %vm1053_vm9, %v1059_v14, %v1061_v34  ;;  %v6668_v44 = vsel %vm900_vm0, %v1108_v8, %v1110_v35 }
  0xfe   : > { %v873_v45 = vmax.f32 %v841_v37, 0.0  ;;  %v1312_v46 = vpack.c.bf16 %v962_v41, %v960_v23  ;;  %v1313_v47 = vpack.c.bf16 %v1012_v42, %v1010_v24  ;;  %v1314_v48 = vpack.c.bf16 %v1062_v43, %v1060_v25 }
  0xff   : > { %v6673_v50 = vsel %vm1152_vm5, %v1158_v9, %v1160_v38  ;;  %v6676_v51 = vsel %vm1202_vm6, %v1208_v10, %v1210_v39  ;;  %v6679_v52 = vsel %vm1252_vm2, %v1258_v15, %v1260_v40 }
 0x100   : > { %v910_v54 = vrot.slane %v873_v45, 4  ;;  %2016 = vmatmul.bf16.gmra.mxu2 %v1312_v46  ;;  %2065 = vmatmul.bf16.gmra.mxu3 %v1313_v47 }
 0x101   : > { %2114 = vmatmul.bf16.gmra.mxu0 %v1314_v48 }
 0x102   : > { %v6690_v5 = vsel %vm900_vm0, %v908_v21, %v910_v54 }
 0x103   : > { %8345 = vst [vmem:[#allocation26_spill] sm:$0xff] %v6690_v5  ;;  %v843_v6 = vpop.f32.mrf.mxu0  ;;  %v1320_v7 = vpack.c.bf16 %v6690_v5, %v6648_v22  ;;  %v1112_v9 = vrot.slane %v6690_v5, 4  ;;  %v1162_v10 = vrot.slane %v6690_v5, 5  ;;  %v1212_v11 = vrot.slane %v6690_v5, 6 }
 0x104   : > { %v844_v8 = vadd.f32 %v6546_v1, %v843_v6  ;;  %v963_v13 = vrot.slane %v6690_v5, 1  ;;  %v1013_v14 = vrot.slane %v6690_v5, 2  ;;  %v1063_v15 = vrot.slane %v6690_v5, 3 }
 0x105   : > { %1972 = vmatmul.bf16.gmra.mxu1 %v1320_v7  ;;  %v1262_v16 = vrot.slane %v6690_v5, 7  ;;  %v6703_v23 = vsel %vm900_vm0, %v1110_v35, %v1112_v9  ;;  %v6706_v24 = vsel %vm1152_vm5, %v1160_v38, %v1162_v10  ;;  %v6709_v25 = vsel %vm1202_vm6, %v1210_v39, %v1212_v11  ;;  %v5752_v38 = vld [vmem:[%s8339_s2 + $0x118] sm:$0xff] }
 0x106   : > { %v874_v21 = vmax.f32 %v844_v8, 0.0  ;;  %v964_v41 = vsel %vm953_vm7, %v961_v32, %v963_v13  ;;  %v1014_v42 = vsel %vm1003_vm8, %v1011_v33, %v1013_v14  ;;  %v1064_v35 = vsel %vm1053_vm9, %v1061_v34, %v1063_v15  ;;  %2154 = vmatpush.bf16.msrb.mxu1 %v5752_v38 }
 0x107   : > { %v6712_v26 = vsel %vm1252_vm2, %v1260_v40, %v1262_v16 }
 0x108   : > { %v912_v27 = vrot.slane %v874_v21, 4 }
 0x10a   : > { %v6715_v37 = vsel %vm900_vm0, %v910_v54, %v912_v27 }
 0x10b   : > { %8346 = vst [vmem:[#allocation27_spill] sm:$0xff] %v6715_v37  ;;  %v845_v43 = vpop.f32.mrf.mxu0  ;;  %v965_v39 = vrot.slane %v6715_v37, 1  ;;  %v1015_v40 = vrot.slane %v6715_v37, 2  ;;  %v1065_v45 = vrot.slane %v6715_v37, 3  ;;  %v1114_v46 = vrot.slane %v6715_v37, 4 }
 0x10c   : > { %v846_v47 = vadd.f32 %v6546_v1, %v845_v43  ;;  %v1164_v32 = vrot.slane %v6715_v37, 5  ;;  %v1214_v33 = vrot.slane %v6715_v37, 6  ;;  %v1264_v34 = vrot.slane %v6715_v37, 7 }
 0x10d   : > { %v966_v48 = vsel %vm953_vm7, %v963_v13, %v965_v39  ;;  %v1016_v54 = vsel %vm1003_vm8, %v1013_v14, %v1015_v40  ;;  %v1066_v6 = vsel %vm1053_vm9, %v1063_v15, %v1065_v45  ;;  %v6735_v7 = vsel %vm900_vm0, %v1112_v9, %v1114_v46 }
 0x10e   : > { %v875_v8 = vmax.f32 %v846_v47, 0.0  ;;  %v1321_v21 = vpack.c.bf16 %v966_v48, %v964_v41  ;;  %v1322_v62 = vpack.c.bf16 %v1016_v54, %v1014_v42  ;;  %v1323_v43 = vpack.c.bf16 %v1066_v6, %v1064_v35 }
 0x10f   : > { %v6740_v3 = vsel %vm1152_vm5, %v1162_v10, %v1164_v32  ;;  %v6743_v57 = vsel %vm1202_vm6, %v1212_v11, %v1214_v33  ;;  %v6746_v13 = vsel %vm1252_vm2, %v1262_v16, %v1264_v34 }
 0x110   : > { %v914_v14 = vrot.slane %v875_v8, 4  ;;  %2021 = vmatmul.bf16.gmra.mxu2 %v1321_v21  ;;  %2070 = vmatmul.bf16.gmra.mxu3 %v1322_v62 }
 0x111   : > { %2119 = vmatmul.bf16.gmra.mxu0 %v1323_v43 }
 0x112   : > { %v6757_v11 = vsel %vm900_vm0, %v912_v27, %v914_v14 }
 0x113   : > { %8347 = vst [vmem:[#allocation28_spill] sm:$0xff] %v6757_v11  ;;  %v848_v16 = vpop.f32.mrf.mxu0  ;;  %v1329_v62 = vpack.c.bf16 %v6757_v11, %v6715_v37  ;;  %v1116_v35 = vrot.slane %v6757_v11, 4  ;;  %v1166_v47 = vrot.slane %v6757_v11, 5  ;;  %v1216_v48 = vrot.slane %v6757_v11, 6 }
 0x114   : > { %v849_v42 = vadd.f32 %v6546_v1, %v848_v16  ;;  %v967_v54 = vrot.slane %v6757_v11, 1  ;;  %v1017_v6 = vrot.slane %v6757_v11, 2  ;;  %v1067_v27 = vrot.slane %v6757_v11, 3 }
 0x115   : > { %1977 = vmatmul.bf16.gmra.mxu1 %v1329_v62  ;;  %v1266_v8 = vrot.slane %v6757_v11, 7  ;;  %v6770_v43 = vsel %vm900_vm0, %v1114_v46, %v1116_v35  ;;  %v6773_v16 = vsel %vm1152_vm5, %v1164_v32, %v1166_v47  ;;  %v6776_v10 = vsel %vm1202_vm6, %v1214_v33, %v1216_v48  ;;  %v5751_v32 = vld [vmem:[%s8339_s2 + $0x110] sm:$0xff] }
 0x116   : > { %v876_v21 = vmax.f32 %v849_v42, 0.0  ;;  %8348 = vst [vmem:[#allocation29_spill] sm:$0xff] %v6773_v16  ;;  %v968_v9 = vsel %vm953_vm7, %v965_v39, %v967_v54  ;;  %v1018_v42 = vsel %vm1003_vm8, %v1015_v40, %v1017_v6  ;;  %v1068_v46 = vsel %vm1053_vm9, %v1065_v45, %v1067_v27  ;;  %2155 = vmatpush.bf16.msrb.mxu1 %v5751_v32 }
 0x117   : > { %8349 = vst [vmem:[#allocation30_spill] sm:$0xff] %v6776_v10  ;;  %v6779_v62 = vsel %vm1252_vm2, %v1264_v34, %v1266_v8 }
 0x118   : > { %8350 = vst [vmem:[#allocation31_spill] sm:$0xff] %v6779_v62  ;;  %v916_v41 = vrot.slane %v876_v21, 4 }
 0x11a   : > { %v6782_v15 = vsel %vm900_vm0, %v914_v14, %v916_v41 }
 0x11b   : > { %8351 = vst [vmem:[#allocation32_spill] sm:$0xff] %v6782_v15  ;;  %v850_v38 = vpop.f32.mrf.mxu0  ;;  %v969_v33 = vrot.slane %v6782_v15, 1  ;;  %v1019_v34 = vrot.slane %v6782_v15, 2  ;;  %v1069_v21 = vrot.slane %v6782_v15, 3  ;;  %v1118_v14 = vrot.slane %v6782_v15, 4 }
 0x11c   : > { %v851_v56 = vadd.f32 %v6546_v1, %v850_v38  ;;  %v1168_v39 = vrot.slane %v6782_v15, 5  ;;  %v1218_v40 = vrot.slane %v6782_v15, 6  ;;  %v1268_v45 = vrot.slane %v6782_v15, 7 }
 0x11d   : > { %v970_v55 = vsel %vm953_vm7, %v967_v54, %v969_v33  ;;  %v1020_v49 = vsel %vm1003_vm8, %v1017_v6, %v1019_v34  ;;  %v1070_v2 = vsel %vm1053_vm9, %v1067_v27, %v1069_v21  ;;  %v6802_v0 = vsel %vm900_vm0, %v1116_v35, %v1118_v14 }
 0x11e   : > { %v877_v63 = vmax.f32 %v851_v56, 0.0  ;;  %v1330_v58 = vpack.c.bf16 %v970_v55, %v968_v9  ;;  %v1331_v5 = vpack.c.bf16 %v1020_v49, %v1018_v42  ;;  %v1332_v38 = vpack.c.bf16 %v1070_v2, %v1068_v46 }
 0x11f   : > { %v6807_v37 = vsel %vm1152_vm5, %v1166_v47, %v1168_v39  ;;  %v6810_v4 = vsel %vm1202_vm6, %v1216_v48, %v1218_v40  ;;  %v6813_v54 = vsel %vm1252_vm2, %v1266_v8, %v1268_v45 }
 0x120   : > { %8352 = vst [vmem:[#allocation33_spill] sm:$0xff] %v6810_v4  ;;  %v918_v6 = vrot.slane %v877_v63, 4  ;;  %2026 = vmatmul.bf16.gmra.mxu2 %v1330_v58  ;;  %2075 = vmatmul.bf16.gmra.mxu3 %v1331_v5 }
 0x121   : > { %8353 = vst [vmem:[#allocation34_spill] sm:$0xff] %v6813_v54  ;;  %2124 = vmatmul.bf16.gmra.mxu0 %v1332_v38 }
 0x122   : > { %v6824_v9 = vsel %vm900_vm0, %v916_v41, %v918_v6 }
 0x123   : > { %8354 = vst [vmem:[#allocation35_spill] sm:$0xff] %v6824_v9  ;;  %v853_v35 = vpop.f32.mrf.mxu0  ;;  %v1338_v58 = vpack.c.bf16 %v6824_v9, %v6782_v15  ;;  %v1120_v5 = vrot.slane %v6824_v9, 4  ;;  %v1170_v47 = vrot.slane %v6824_v9, 5  ;;  %v1220_v48 = vrot.slane %v6824_v9, 6 }
 0x124   : > { %v854_v63 = vadd.f32 %v6546_v1, %v853_v35  ;;  %v971_v27 = vrot.slane %v6824_v9, 1  ;;  %v1021_v8 = vrot.slane %v6824_v9, 2  ;;  %v1071_v41 = vrot.slane %v6824_v9, 3 }
 0x125   : > { %1982 = vmatmul.bf16.gmra.mxu1 %v1338_v58  ;;  %v1270_v42 = vrot.slane %v6824_v9, 7  ;;  %v6837_v38 = vsel %vm900_vm0, %v1118_v14, %v1120_v5  ;;  %v6840_v35 = vsel %vm1152_vm5, %v1168_v39, %v1170_v47  ;;  %v6843_v56 = vsel %vm1202_vm6, %v1218_v40, %v1220_v48  ;;  %v5750_v39 = vld [vmem:[%s8339_s2 + $0x108] sm:$0xff] }
 0x126   : > { %v878_v46 = vmax.f32 %v854_v63, 0.0  ;;  %8355 = vst [vmem:[#allocation36_spill] sm:$0xff] %v6837_v38  ;;  %v972_v55 = vsel %vm953_vm7, %v969_v33, %v971_v27  ;;  %v1022_v63 = vsel %vm1003_vm8, %v1019_v34, %v1021_v8  ;;  %v1072_v14 = vsel %vm1053_vm9, %v1069_v21, %v1071_v41  ;;  %2156 = vmatpush.bf16.msrb.mxu1 %v5750_v39 }
 0x127   : > { %8356 = vst [vmem:[#allocation37_spill] sm:$0xff] %v6840_v35  ;;  %v6846_v58 = vsel %vm1252_vm2, %v1268_v45, %v1270_v42 }
 0x128   : > { %8357 = vst [vmem:[#allocation38_spill] sm:$0xff] %v6843_v56  ;;  %v920_v49 = vrot.slane %v878_v46, 4 }
 0x129   : > { %8358 = vst [vmem:[#allocation39_spill] sm:$0xff] %v6846_v58 }
 0x12a   : > { %v6849_v2 = vsel %vm900_vm0, %v918_v6, %v920_v49 }
 0x12b   : > { %8359 = vst [vmem:[#allocation40_spill] sm:$0xff] %v6849_v2  ;;  %v855_v32 = vpop.f32.mrf.mxu0  ;;  %v8276_v40 = vrot.slane %v6849_v2, 1  ;;  %v8278_v45 = vrot.slane %v6849_v2, 2  ;;  %v8277_v46 = vrot.slane %v6849_v2, 3  ;;  %v1122_v6 = vrot.slane %v6849_v2, 4 }
 0x12c   : > { %v856_v11 = vadd.f32 %v6546_v1, %v855_v32  ;;  %v1172_v33 = vrot.slane %v6849_v2, 5  ;;  %v1222_v34 = vrot.slane %v6849_v2, 6  ;;  %v1272_v21 = vrot.slane %v6849_v2, 7 }
 0x12d   : > { %v974_v15 = vsel %vm953_vm7, %v971_v27, %v8276_v40  ;;  %v1024_v22 = vsel %vm1003_vm8, %v1021_v8, %v8278_v45  ;;  %v1074_v12 = vsel %vm1053_vm9, %v1071_v41, %v8277_v46  ;;  %v6875_v32 = vsel %vm900_vm0, %v1120_v5, %v1122_v6 }
 0x12e   : > { %8360 = vst [vmem:[#allocation41_spill] sm:$0xff] %v6875_v32  ;;  %v879_v39 = vmax.f32 %v856_v11, 0.0  ;;  %v1339_v36 = vpack.c.bf16 %v974_v15, %v972_v55  ;;  %v1340_v62 = vpack.c.bf16 %v1024_v22, %v1022_v63  ;;  %v1341_v54 = vpack.c.bf16 %v1074_v12, %v1072_v14  ;;  %v5764_v22 = vld [vmem:[%s8339_s2 + $0x178] sm:$0xff]  ;;  %v5763_v63 = vld [vmem:[%s8339_s2 + $0x170] sm:$0xff]  ;;  %v5762_v11 = vld [vmem:[%s8339_s2 + $0x168] sm:$0xff] }
 0x12f   : > { %v6880_v27 = vsel %vm1152_vm5, %v1170_v47, %v1172_v33  ;;  %v6883_v40 = vsel %vm1202_vm6, %v1220_v48, %v1222_v34  ;;  %v6886_v8 = vsel %vm1252_vm2, %v1270_v42, %v1272_v21  ;;  %v5772_v12 = vld [vmem:[%s8339_s2 + $0x1b8] sm:$0xff]  ;;  %2199 = vmatpush.bf16.msrb.mxu2 %v5764_v22  ;;  %v8368_v9 = vrot.slane %v6849_v2, 1 }
 0x130   : > { %8361 = vst [vmem:[#allocation42_spill] sm:$0xff] %v6880_v27  ;;  %v922_v41 = vrot.slane %v879_v39, 4  ;;  %2031 = vmatmul.bf16.gmra.mxu2 %v1339_v36  ;;  %2080 = vmatmul.bf16.gmra.mxu3 %v1340_v62  ;;  %v5780_v15 = vld [vmem:[%s8339_s2 + $0x1f8] sm:$0xff]  ;;  %v5749_v62 = vld [vmem:[%s8339_s2 + $0x100] sm:$0xff] }
 0x131   : > { %8362 = vst [vmem:[#allocation43_spill] sm:$0xff] %v6883_v40  ;;  %2129 = vmatmul.bf16.gmra.mxu0 %v1341_v54  ;;  %2248 = vmatpush.bf16.msrb.mxu3 %v5772_v12  ;;  %v5771_v54 = vld [vmem:[%s8339_s2 + $0x1b0] sm:$0xff] }
 0x132   : > { %8363 = vst [vmem:[#allocation44_spill] sm:$0xff] %v6886_v8  ;;  %v6906_v5 = vsel %vm900_vm0, %v920_v49, %v922_v41  ;;  %2297 = vmatpush.bf16.msra.mxu0 %v5780_v15  ;;  %v5779_v49 = vld [vmem:[%s8339_s2 + $0x1f0] sm:$0xff]  ;;  %2157 = vmatpush.bf16.msrb.mxu1 %v5749_v62 }
 0x133   : > { %8364 = vst [vmem:[#allocation45_spill] sm:$0xff] %v6906_v5  ;;  %v858_v47 = vpop.f32.mrf.mxu0  ;;  %v1347_v48 = vpack.c.bf16 %v6906_v5, %v6849_v2  ;;  %v1124_v14 = vrot.slane %v6906_v5, 4  ;;  %v1174_v39 = vrot.slane %v6906_v5, 5  ;;  %v1224_v22 = vrot.slane %v6906_v5, 6  ;;  %2200 = vmatpush.bf16.msrb.mxu2 %v5763_v63 }
 0x134   : > { %v859_v42 = vadd.f32 %v6546_v1, %v858_v47  ;;  %v975_v12 = vrot.slane %v6906_v5, 1  ;;  %v1025_v15 = vrot.slane %v6906_v5, 2  ;;  %v1075_v47 = vrot.slane %v6906_v5, 3 }
 0x135   : > { %1987 = vmatmul.bf16.gmra.mxu1 %v1347_v48  ;;  %v1274_v36 = vrot.slane %v6906_v5, 7  ;;  %2249 = vmatpush.bf16.msrb.mxu3 %v5771_v54  ;;  %v5770_v48 = vld [vmem:[%s8339_s2 + $0x1a8] sm:$0xff]  ;;  %v6937_v10 = vsel %vm900_vm0, %v1122_v6, %v1124_v14  ;;  %v6940_v46 = vsel %vm1152_vm5, %v1172_v33, %v1174_v39  ;;  %v6943_v45 = vsel %vm1202_vm6, %v1222_v34, %v1224_v22 }
 0x136   : > { %v880_v55 = vmax.f32 %v859_v42, 0.0  ;;  %8365 = vst [vmem:[#allocation46_spill] sm:$0xff] %v6940_v46  ;;  %2298 = vmatpush.bf16.msra.mxu0 %v5779_v49  ;;  %v5778_v42 = vld [vmem:[%s8339_s2 + $0x1e8] sm:$0xff]  ;;  %v976_v6 = vsel %vm953_vm7, %v8368_v9, %v975_v12  ;;  %v8370_v34 = vrot.slane %v6849_v2, 2  ;;  %v8371_v49 = vrot.slane %v6849_v2, 3  ;;  %v5769_v9 = vld [vmem:[%s8339_s2 + $0x1a0] sm:$0xff] }
 0x137   : > { %8366 = vst [vmem:[#allocation47_spill] sm:$0xff] %v6943_v45  ;;  %v6949_v63 = vsel %vm1252_vm2, %v1272_v21, %v1274_v36  ;;  %2201 = vmatpush.bf16.msrb.mxu2 %v5762_v11  ;;  %v5761_v21 = vld [vmem:[%s8339_s2 + $0x160] sm:$0xff] }
 0x138   : > { %8367 = vst [vmem:[#allocation48_spill] sm:$0xff] %v6949_v63  ;;  %v924_v54 = vrot.slane %v880_v55, 4  ;;  %v1026_v62 = vsel %vm1003_vm8, %v8370_v34, %v1025_v15  ;;  %v1076_v58 = vsel %vm1053_vm9, %v8371_v49, %v1075_v47  ;;  %v5777_v11 = vld [vmem:[%s8339_s2 + $0x1e0] sm:$0xff] }
 0x139   : > { %2250 = vmatpush.bf16.msrb.mxu3 %v5770_v48 }
 0x13a   : > { %v6955_v33 = vsel %vm900_vm0, %v922_v41, %v924_v54  ;;  %2299 = vmatpush.bf16.msra.mxu0 %v5778_v42 }
 0x13b   : > { %8369 = vst [vmem:[#allocation49_spill] sm:$0xff] %v6955_v33  ;;  %v860_v41 = vpop.f32.mrf.mxu0  ;;  %v8291_v55 = vrot.slane %v6955_v33, 1  ;;  %v1126_v48 = vrot.slane %v6955_v33, 4  ;;  %v1176_v2 = vrot.slane %v6955_v33, 5  ;;  %v1226_v56 = vrot.slane %v6955_v33, 6  ;;  %2202 = vmatpush.bf16.msrb.mxu2 %v5761_v21 }
 0x13c   : > { %v861_v49 = vadd.f32 %v6546_v1, %v860_v41  ;;  %v1276_v40 = vrot.slane %v6955_v33, 7  ;;  %v8372_v42 = vrot.slane %v6955_v33, 2  ;;  %v8373_v35 = vrot.slane %v6955_v33, 3 }
 0x13d   : > { %v978_v8 = vsel %vm953_vm7, %v975_v12, %v8291_v55  ;;  %v6990_v41 = vsel %vm900_vm0, %v1124_v14, %v1126_v48  ;;  %2251 = vmatpush.bf16.msrb.mxu3 %v5769_v9  ;;  %v6995_v55 = vsel %vm1152_vm5, %v1174_v39, %v1176_v2  ;;  %v5760_v39 = vld [vmem:[%s8339_s2 + $0x158] sm:$0xff] }
 0x13e   : > { %v1028_v34 = vsel %vm1003_vm8, %v1025_v15, %v8372_v42  ;;  %v1078_v27 = vsel %vm1053_vm9, %v1075_v47, %v8373_v35  ;;  %v881_v38 = vmax.f32 %v861_v49, 0.0  ;;  %v1348_v32 = vpack.c.bf16 %v978_v8, %v976_v6  ;;  %2300 = vmatpush.bf16.msra.mxu0 %v5777_v11  ;;  %v5759_v11 = vld [vmem:[%s8339_s2 + $0x150] sm:$0xff]  ;;  %v5758_v8 = vld [vmem:[%s8339_s2 + $0x148] sm:$0xff] }
 0x13f   : > { %v1349_v4 = vpack.c.bf16 %v1028_v34, %v1026_v62  ;;  %v1350_v16 = vpack.c.bf16 %v1078_v27, %v1076_v58  ;;  %v6998_v15 = vsel %vm1202_vm6, %v1224_v22, %v1226_v56  ;;  %v7001_v35 = vsel %vm1252_vm2, %v1274_v36, %v1276_v40  ;;  %2203 = vmatpush.bf16.msrb.mxu2 %v5760_v39  ;;  %v5767_v49 = vld [vmem:[%s8339_s2 + $0x190] sm:$0xff] }
 0x140   : > { %8374 = vst [vmem:[#allocation50_spill] sm:$0xff] %v6998_v15  ;;  %v926_v14 = vrot.slane %v881_v38, 4  ;;  %2036 = vmatmul.bf16.gmra.mxu2 %v1348_v32  ;;  %v5768_v38 = vld [vmem:[%s8339_s2 + $0x198] sm:$0xff]  ;;  %v5775_v42 = vld [vmem:[%s8339_s2 + $0x1d0] sm:$0xff]  ;;  %v8379_v58 = vrot.slane %v6955_v33, 2 }
 0x141   : > { %8375 = vst [vmem:[#allocation51_spill] sm:$0xff] %v7001_v35  ;;  %2085 = vmatmul.bf16.gmra.mxu3 %v1349_v4  ;;  %2134 = vmatmul.bf16.gmra.mxu0 %v1350_v16  ;;  %v5776_v4 = vld [vmem:[%s8339_s2 + $0x1d8] sm:$0xff] }
 0x142   : > { %v7021_v36 = vsel %vm900_vm0, %v924_v54, %v926_v14  ;;  %2252 = vmatpush.bf16.msrb.mxu3 %v5768_v38  ;;  %2301 = vmatpush.bf16.msra.mxu0 %v5776_v4  ;;  %v5788_v4 = vld [vmem:[%s8339_s2 + $0x238] sm:$0xff] }
 0x143   : > { %8376 = vst [vmem:[#allocation52_spill] sm:$0xff] %v7021_v36  ;;  %v863_v22 = vpop.f32.mrf.mxu0  ;;  %v1356_v16 = vpack.c.bf16 %v7021_v36, %v6955_v33  ;;  %v979_v47 = vrot.slane %v7021_v36, 1  ;;  %v1128_v62 = vrot.slane %v7021_v36, 4  ;;  %v1178_v21 = vrot.slane %v7021_v36, 5  ;;  %2204 = vmatpush.bf16.msrb.mxu2 %v5759_v11  ;;  %2346 = vmatpush.bf16.msra.mxu1 %v5788_v4 }
 0x144   : > { %v864_v6 = vadd.f32 %v6546_v1, %v863_v22  ;;  %v1228_v9 = vrot.slane %v7021_v36, 6  ;;  %v1029_v54 = vrot.slane %v7021_v36, 2  ;;  %v1079_v34 = vrot.slane %v7021_v36, 3 }
 0x145   : > { %1992 = vmatmul.bf16.gmra.mxu1 %v1356_v16  ;;  %v1278_v39 = vrot.slane %v7021_v36, 7  ;;  %v7046_v22 = vsel %vm900_vm0, %v1126_v48, %v1128_v62  ;;  %v7049_v16 = vsel %vm1152_vm5, %v1176_v2, %v1178_v21  ;;  %v5774_v2 = vld [vmem:[%s8339_s2 + $0x1c8] sm:$0xff]  ;;  %v8378_v11 = vrot.slane %v6955_v33, 1 }
 0x146   : > { %v882_v38 = vmax.f32 %v864_v6, 0.0  ;;  %v7052_v32 = vsel %vm1202_vm6, %v1226_v56, %v1228_v9  ;;  %2253 = vmatpush.bf16.msrb.mxu3 %v5767_v49  ;;  %v5766_v6 = vld [vmem:[%s8339_s2 + $0x188] sm:$0xff]  ;;  %2302 = vmatpush.bf16.msra.mxu0 %v5775_v42  ;;  %v1030_v12 = vsel %vm1003_vm8, %v8379_v58, %v1029_v54 }
 0x147   : > { %v7061_v27 = vsel %vm1252_vm2, %v1276_v40, %v1278_v39  ;;  %v980_v49 = vsel %vm953_vm7, %v8378_v11, %v979_v47  ;;  %v8380_v40 = vrot.slane %v6955_v33, 3  ;;  %2205 = vmatpush.bf16.msrb.mxu2 %v5758_v8 }
 0x148   : > { %8377 = vst [vmem:[#allocation53_spill] sm:$0xff] %v7061_v27  ;;  %v928_v48 = vrot.slane %v882_v38, 4 }
 0x149   : > { %v1080_v42 = vsel %vm1053_vm9, %v8380_v40, %v1079_v34 }
 0x14a   : > { %v7067_v56 = vsel %vm900_vm0, %v926_v14, %v928_v48  ;;  %2254 = vmatpush.bf16.msrb.mxu3 %v5766_v6  ;;  %2303 = vmatpush.bf16.msra.mxu0 %v5774_v2  ;;  %v5765_v6 = vld [vmem:[%s8339_s2 + $0x180] sm:$0xff] }
 0x14b   : > { %v865_v38 = vpop.f32.mrf.mxu0  ;;  %v981_v4 = vrot.slane %v7067_v56, 1  ;;  %v8300_v5 = vrot.slane %v7067_v56, 2  ;;  %v8299_v14 = vrot.slane %v7067_v56, 3  ;;  %v1130_v63 = vrot.slane %v7067_v56, 4 }
 0x14c   : > { %v866_v11 = vadd.f32 %v6546_v1, %v865_v38  ;;  %v1180_v58 = vrot.slane %v7067_v56, 5  ;;  %v1230_v33 = vrot.slane %v7067_v56, 6  ;;  %v1280_v40 = vrot.slane %v7067_v56, 7  ;;  %v5757_v1 = vld [vmem:[%s8339_s2 + $0x140] sm:$0xff] }
 0x14d   : > { %v982_v35 = vsel %vm953_vm7, %v979_v47, %v981_v4  ;;  %v1032_v45 = vsel %vm1003_vm8, %v1029_v54, %v8300_v5  ;;  %v1082_v8 = vsel %vm1053_vm9, %v1079_v34, %v8299_v14  ;;  %v7100_v2 = vsel %vm900_vm0, %v1128_v62, %v1130_v63  ;;  %v5773_v54 = vld [vmem:[%s8339_s2 + $0x1c0] sm:$0xff]  ;;  %2206 = vmatpush.bf16.msrb.mxu2 %v5757_v1 }
 0x14e   : > { %v883_v47 = vmax.f32 %v866_v11, 0.0  ;;  %v1357_v38 = vpack.c.bf16 %v982_v35, %v980_v49  ;;  %v1358_v15 = vpack.c.bf16 %v1032_v45, %v1030_v12  ;;  %v1359_v46 = vpack.c.bf16 %v1082_v8, %v1080_v42  ;;  %2255 = vmatpush.bf16.msrb.mxu3 %v5765_v6  ;;  %2304 = vmatpush.bf16.msra.mxu0 %v5773_v54 }
 0x14f   : > { %v7108_v14 = vsel %vm1152_vm5, %v1178_v21, %v1180_v58  ;;  %v7111_v5 = vsel %vm1202_vm6, %v1228_v9, %v1230_v33  ;;  %v7120_v35 = vsel %vm1252_vm2, %v1278_v39, %v1280_v40 }
 0x150   : > { %v7113_v62 = vrot.slane %v883_v47, 4  ;;  %2041 = vmatmul.bf16.gmra.mxu2 %v1357_v38  ;;  %v5787_v38 = vld [vmem:[%s8339_s2 + $0x230] sm:$0xff] }
 0x151   : > { %2090 = vmatmul.bf16.gmra.mxu3 %v1358_v15  ;;  %2139 = vmatmul.bf16.gmra.mxu0 %v1359_v46 }
 0x152   : > { %8381 = vst [vmem:[#allocation54_spill] sm:$0xff] %v7113_v62  ;;  %v7128_v49 = vsel %vm900_vm0, %v928_v48, %v7113_v62  ;;  %v950_v15 = vsel %vm900_vm0, %v7113_v62, 0.0  ;;  %2347 = vmatpush.bf16.msra.mxu1 %v5787_v38 }
 0x153   : > { %8382 = vst [vmem:[#allocation55_spill] sm:$0xff] %v7128_v49  ;;  %v1365_v46 = vpack.c.bf16 %v7128_v49, %v7067_v56  ;;  %v983_v39 = vrot.slane %v7128_v49, 1  ;;  %v985_v11 = vrot.slane %v950_v15, 1  ;;  %v1132_v8 = vrot.slane %v7128_v49, 4 }
 0x154   : > { %v1134_v1 = vrot.slane %v950_v15, 4  ;;  %v1033_v48 = vrot.slane %v7128_v49, 2  ;;  %v1035_v6 = vrot.slane %v950_v15, 2  ;;  %v1083_v47 = vrot.slane %v7128_v49, 3 }
 0x155   : > { %1997 = vmatmul.bf16.gmra.mxu1 %v1365_v46  ;;  %v984_v54 = vsel %vm953_vm7, %v981_v4, %v983_v39  ;;  %v1085_v42 = vrot.slane %v950_v15, 3  ;;  %v7145_v9 = vsel %vm900_vm0, %v1130_v63, %v1132_v8  ;;  %v986_v21 = vsel %vm953_vm7, %v983_v39, %v985_v11 }
 0x156   : > { %v7148_v46 = vsel %vm900_vm0, %v1132_v8, %v1134_v1  ;;  %v1182_v45 = vrot.slane %v7128_v49, 5  ;;  %v1184_v34 = vrot.slane %v950_v15, 5  ;;  %v1232_v62 = vrot.slane %v7128_v49, 6 }
 0x157   : > { %v1234_v36 = vrot.slane %v950_v15, 6  ;;  %v1282_v4 = vrot.slane %v7128_v49, 7  ;;  %v1284_v27 = vrot.slane %v950_v15, 7  ;;  %v8383_v63 = vrot.slane %v7067_v56, 2 }
 0x158   : > { %v1036_v1 = vsel %vm1003_vm8, %v1033_v48, %v1035_v6  ;;  %v7161_v39 = vsel %vm1152_vm5, %v1180_v58, %v1182_v45  ;;  %v7164_v11 = vsel %vm1152_vm5, %v1182_v45, %v1184_v34  ;;  %v7169_v12 = vsel %vm1202_vm6, %v1230_v33, %v1232_v62 }
 0x159   : > { %v1034_v8 = vsel %vm1003_vm8, %v8383_v63, %v1033_v48  ;;  %v1370_v38 = vpack.c.bf16 %v7164_v11, %v7161_v39  ;;  %v7172_v15 = vsel %vm1202_vm6, %v1232_v62, %v1234_v36  ;;  %v7175_v49 = vsel %vm1252_vm2, %v1280_v40, %v1282_v4  ;;  %v8435_v39 = vld [vmem:[#allocation22_spill] sm:$0xff] }
 0x15a   : > { %v8384_v48 = vrot.slane %v7067_v56, 3  ;;  %v1086_v6 = vsel %vm1053_vm9, %v1083_v47, %v1085_v42  ;;  %v1371_v34 = vpack.c.bf16 %v7172_v15, %v7169_v12  ;;  %v7184_v45 = vsel %vm1252_vm2, %v1282_v4, %v1284_v27  ;;  %v5786_v42 = vld [vmem:[%s8339_s2 + $0x228] sm:$0xff] }
 0x15b   : > { %v1372_v33 = vpack.c.bf16 %v7184_v45, %v7175_v49  ;;  %v1366_v36 = vpack.c.bf16 %v986_v21, %v984_v54  ;;  %v1367_v62 = vpack.c.bf16 %v1036_v1, %v1034_v8  ;;  %2348 = vmatpush.bf16.msra.mxu1 %v5786_v42  ;;  %v7197_v21 = vld [vmem:[%s8386_s3] ss:$0 sm:$0xff]  ;;  %v8387_v54 = vpack.c.bf16 %v6606_v59, %v6572_v29  ;;  %s8463_s3 = sld [smem:[#allocation62_spill]] }
 0x15c   : > { %v1084_v58 = vsel %vm1053_vm9, %v8384_v48, %v1083_v47  ;;  %v8385_v48 = vpack.c.bf16 %v6601_v53, %v6569_v28  ;;  %v8388_v28 = vpack.c.bf16 %v6609_v60, %v6575_v30  ;;  %v8389_v53 = vpack.c.bf16 %v6612_v61, %v6578_v31  ;;  %v5785_v30 = vld [vmem:[%s8339_s2 + $0x220] sm:$0xff] }
 0x15d   : > { %v1368_v63 = vpack.c.bf16 %v1086_v6, %v1084_v58 }
 0x15f   : > { %2349 = vmatpush.bf16.msra.mxu1 %v5785_v30 }
 0x160   : > { %2046 = vmatmul.bf16.gmra.mxu2 %v1366_v36  ;;  %v8390_v36 = vpack.c.bf16 %v6668_v44, %v6636_v17  ;;  %v8391_v17 = vpack.c.bf16 %v6673_v50, %v6639_v18  ;;  %v8392_v44 = vpack.c.bf16 %v6676_v51, %v6642_v19  ;;  %v8394_v18 = vpack.c.bf16 %v6735_v7, %v6703_v23  ;;  %v5784_v19 = vld [vmem:[%s8339_s2 + $0x218] sm:$0xff] }
 0x161   : > { %2095 = vmatmul.bf16.gmra.mxu3 %v1367_v62  ;;  %2144 = vmatmul.bf16.gmra.mxu0 %v1368_v63  ;;  %v8395_v23 = vpack.c.bf16 %v6740_v3, %v6706_v24  ;;  %v8396_v7 = vpack.c.bf16 %v6743_v57, %v6709_v25  ;;  %v8398_v3 = vpack.c.bf16 %v6802_v0, %v6770_v43  ;;  %v5783_v57 = vld [vmem:[%s8339_s2 + $0x210] sm:$0xff]  ;;  %v8399_v0 = vld [vmem:[#allocation29_spill] sm:$0xff] }
 0x162   : > { %v1963_v40 = vpop.f32.mrf.mxu1  ;;  %v8400_v43 = vpack.c.bf16 %v6807_v37, %v8399_v0 }
 0x163   : > { %v1964_v4 = vadd.f32 %v7197_v21, %v1963_v40  ;;  %2350 = vmatpush.bf16.msra.mxu1 %v5784_v19 }
 0x165   : > { %2158 = vmatmul.bf16.vlgmr.msrb.gmra.mxu1 %v8385_v48 }
 0x167   : > { %2351 = vmatpush.bf16.msra.mxu1 %v5783_v57  ;;  %v8410_v57 = vld [vmem:[#allocation42_spill] sm:$0xff] }
 0x16a   : > { %v1965_v27 = vpop.f32.mrf.mxu1 }
 0x16b   : > { %v1966_v31 = vadd.f32 %v7197_v21, %v1965_v27 }
 0x16e   : > { %v2110_v47 = vpop.f32.mrf.mxu0 }
 0x170   : > { %2207 = vmatmul.bf16.vlgmr.msrb.gmra.mxu2 %v8387_v54 }
 0x171   : > { %2256 = vmatmul.bf16.vlgmr.msrb.gmra.mxu3 %v8388_v28  ;;  %2305 = vmatmul.bf16.vlgmr.msra.gmra.mxu0 %v8389_v53 }
 0x172   : > { %v1968_v8 = vpop.f32.mrf.mxu1 }
 0x173   : > { %v2012_v1 = vpop.f32.mrf.mxu2  ;;  %v2061_v58 = vpop.f32.mrf.mxu3  ;;  %v1969_v27 = vadd.f32 %v7197_v21, %v1968_v8 }
 0x174   : > { %v2013_v6 = vadd.f32 %v2012_v1, %v1964_v4 }
 0x175   : > { %2163 = vmatmul.bf16.gmra.mxu1 %v8390_v36 }
 0x176   : > { %v2062_v29 = vadd.f32 %v2061_v58, %v2013_v6  ;;  %v2112_v59 = vpop.f32.mrf.mxu0 }
 0x178   : > { %v7215_v60 = vadd.f32 %v2110_v47, %v2062_v29  ;;  %v8393_v47 = vpack.c.bf16 %v6679_v52, %v6645_v20 }
 0x17a   : > { %v1970_v61 = vpop.f32.mrf.mxu1 }
 0x17b   : > { %v2014_v62 = vpop.f32.mrf.mxu2  ;;  %v2063_v63 = vpop.f32.mrf.mxu3  ;;  %v1971_v20 = vadd.f32 %v7197_v21, %v1970_v61 }
 0x17c   : > { %v2015_v40 = vadd.f32 %v2014_v62, %v1966_v31  ;;  %v8397_v31 = vpack.c.bf16 %v6746_v13, %v6712_v26 }
 0x17e   : > { %v2064_v48 = vadd.f32 %v2063_v63, %v2015_v40  ;;  %v2115_v42 = vpop.f32.mrf.mxu0 }
 0x180   : > { %2212 = vmatmul.bf16.gmra.mxu2 %v8391_v17  ;;  %v7224_v54 = vadd.f32 %v2112_v59, %v2064_v48 }
 0x181   : > { %2261 = vmatmul.bf16.gmra.mxu3 %v8392_v44  ;;  %2310 = vmatmul.bf16.gmra.mxu0 %v8393_v47 }
 0x182   : > { %v1973_v28 = vpop.f32.mrf.mxu1 }
 0x183   : > { %v2017_v53 = vpop.f32.mrf.mxu2  ;;  %v2066_v4 = vpop.f32.mrf.mxu3  ;;  %v1974_v61 = vadd.f32 %v7197_v21, %v1973_v28 }
 0x184   : > { %v2018_v1 = vadd.f32 %v2017_v53, %v1969_v27  ;;  %v8401_v53 = vld [vmem:[#allocation33_spill] sm:$0xff] }
 0x185   : > { %2168 = vmatmul.bf16.gmra.mxu1 %v8394_v18 }
 0x186   : > { %v2067_v50 = vadd.f32 %v2066_v4, %v2018_v1  ;;  %v2117_v58 = vpop.f32.mrf.mxu0  ;;  %v8402_v4 = vld [vmem:[#allocation30_spill] sm:$0xff] }
 0x187   : > { %v8403_v1 = vpack.c.bf16 %v8401_v53, %v8402_v4 }
 0x188   : > { %v7236_v51 = vadd.f32 %v2115_v42, %v2067_v50  ;;  %v8404_v50 = vld [vmem:[#allocation34_spill] sm:$0xff] }
 0x18a   : > { %v1975_v52 = vpop.f32.mrf.mxu1 }
 0x18b   : > { %v2019_v8 = vpop.f32.mrf.mxu2  ;;  %v2068_v6 = vpop.f32.mrf.mxu3  ;;  %v1976_v26 = vadd.f32 %v7197_v21, %v1975_v52 }
 0x18c   : > { %v2020_v36 = vadd.f32 %v2019_v8, %v1971_v20 }
 0x18e   : > { %v2069_v29 = vadd.f32 %v2068_v6, %v2020_v36  ;;  %v2120_v59 = vpop.f32.mrf.mxu0 }
 0x190   : > { %2217 = vmatmul.bf16.gmra.mxu2 %v8395_v23  ;;  %v7245_v30 = vadd.f32 %v2117_v58, %v2069_v29  ;;  %v8405_v58 = vld [vmem:[#allocation31_spill] sm:$0xff]  ;;  %v8407_v29 = vld [vmem:[#allocation41_spill] sm:$0xff] }
 0x191   : > { %2266 = vmatmul.bf16.gmra.mxu3 %v8396_v7  ;;  %2315 = vmatmul.bf16.gmra.mxu0 %v8397_v31  ;;  %v8406_v19 = vpack.c.bf16 %v8404_v50, %v8405_v58  ;;  %v5782_v31 = vld [vmem:[%s8339_s2 + $0x208] sm:$0xff] }
 0x192   : > { %v1978_v62 = vpop.f32.mrf.mxu1  ;;  %2352 = vmatpush.bf16.msra.mxu1 %v5782_v31 }
 0x193   : > { %v2022_v63 = vpop.f32.mrf.mxu2  ;;  %v2071_v40 = vpop.f32.mrf.mxu3  ;;  %v1979_v20 = vadd.f32 %v7197_v21, %v1978_v62 }
 0x194   : > { %v2023_v48 = vadd.f32 %v2022_v63, %v1974_v61 }
 0x195   : > { %2173 = vmatmul.bf16.gmra.mxu1 %v8398_v3 }
 0x196   : > { %v2072_v24 = vadd.f32 %v2071_v40, %v2023_v48  ;;  %v2122_v42 = vpop.f32.mrf.mxu0 }
 0x198   : > { %v7257_v25 = vadd.f32 %v2120_v59, %v2072_v24  ;;  %v8408_v59 = vld [vmem:[#allocation36_spill] sm:$0xff] }
 0x199   : > { %v8409_v37 = vpack.c.bf16 %v8407_v29, %v8408_v59 }
 0x19a   : > { %v1980_v13 = vpop.f32.mrf.mxu1 }
 0x19b   : > { %v2024_v17 = vpop.f32.mrf.mxu2  ;;  %v2073_v44 = vpop.f32.mrf.mxu3  ;;  %v1981_v63 = vadd.f32 %v7197_v21, %v1980_v13 }
 0x19c   : > { %v2025_v47 = vadd.f32 %v2024_v17, %v1976_v26  ;;  %v8411_v26 = vld [vmem:[#allocation37_spill] sm:$0xff] }
 0x19d   : > { %v8412_v17 = vpack.c.bf16 %v8410_v57, %v8411_v26 }
 0x19e   : > { %v2074_v27 = vadd.f32 %v2073_v44, %v2025_v47  ;;  %v2125_v28 = vpop.f32.mrf.mxu0  ;;  %v8413_v44 = vld [vmem:[#allocation43_spill] sm:$0xff]  ;;  %v8414_v47 = vld [vmem:[#allocation38_spill] sm:$0xff] }
 0x1a0   : > { %2222 = vmatmul.bf16.gmra.mxu2 %v8400_v43  ;;  %v7266_v18 = vadd.f32 %v2122_v42, %v2074_v27  ;;  %v8415_v27 = vpack.c.bf16 %v8413_v44, %v8414_v47  ;;  %v8417_v43 = vld [vmem:[#allocation39_spill] sm:$0xff] }
 0x1a1   : > { %2271 = vmatmul.bf16.gmra.mxu3 %v8403_v1  ;;  %2320 = vmatmul.bf16.gmra.mxu0 %v8406_v19  ;;  %v8419_v19 = vpack.c.bf16 %v6990_v41, %v6937_v10  ;;  %v8420_v10 = vld [vmem:[#allocation46_spill] sm:$0xff] }
 0x1a2   : > { %v1983_v52 = vpop.f32.mrf.mxu1  ;;  %v8421_v41 = vpack.c.bf16 %v6995_v55, %v8420_v10 }
 0x1a3   : > { %v2027_v8 = vpop.f32.mrf.mxu2  ;;  %v2076_v6 = vpop.f32.mrf.mxu3  ;;  %v1984_v53 = vadd.f32 %v7197_v21, %v1983_v52 }
 0x1a4   : > { %v2028_v36 = vadd.f32 %v2027_v8, %v1979_v20 }
 0x1a5   : > { %2178 = vmatmul.bf16.gmra.mxu1 %v8409_v37 }
 0x1a6   : > { %v2077_v23 = vadd.f32 %v2076_v6, %v2028_v36  ;;  %v2127_v7 = vpop.f32.mrf.mxu0  ;;  %v5781_v6 = vld [vmem:[%s8339_s2 + $0x200] sm:$0xff]  ;;  %s5934_s2 = sshll.u32 %s6368_s4, 5 }
 0x1a7   : > { %2353 = vmatpush.bf16.msra.mxu1 %v5781_v6  ;;  %v8433_v6 = vpack.c.bf16 %v7148_v46, %v7145_v9 }
 0x1a8   : > { %v7278_v61 = vadd.f32 %v2125_v28, %v2077_v23  ;;  %v8416_v28 = vld [vmem:[#allocation44_spill] sm:$0xff]  ;;  %v8422_v23 = vld [vmem:[#allocation50_spill] sm:$0xff] }
 0x1a9   : > { %v8418_v13 = vpack.c.bf16 %v8416_v28, %v8417_v43 }
 0x1aa   : > { %v7281_v62 = vpop.f32.mrf.mxu1 }
 0x1ab   : > { %v2029_v40 = vpop.f32.mrf.mxu2  ;;  %v2078_v48 = vpop.f32.mrf.mxu3 }
 0x1ac   : > { %v2030_v3 = vadd.f32 %v2029_v40, %v1981_v63  ;;  %v8425_v63 = vld [vmem:[#allocation51_spill] sm:$0xff]  ;;  %v8426_v40 = vld [vmem:[#allocation48_spill] sm:$0xff] }
 0x1ae   : > { %v2079_v24 = vadd.f32 %v2078_v48, %v2030_v3  ;;  %v2130_v42 = vpop.f32.mrf.mxu0  ;;  %v8427_v48 = vpack.c.bf16 %v8425_v63, %v8426_v40  ;;  %v8438_v63 = vld [vmem:[#allocation24_spill] sm:$0xff] }
 0x1b0   : > { %2227 = vmatmul.bf16.gmra.mxu2 %v8412_v17  ;;  %v7289_v0 = vadd.f32 %v2127_v7, %v2079_v24  ;;  %v8423_v7 = vld [vmem:[#allocation47_spill] sm:$0xff]  ;;  %v8428_v17 = vpack.c.bf16 %v7100_v2, %v7046_v22  ;;  %v8431_v22 = vld [vmem:[#allocation53_spill] sm:$0xff] }
 0x1b1   : > { %2276 = vmatmul.bf16.gmra.mxu3 %v8415_v27  ;;  %2325 = vmatmul.bf16.gmra.mxu0 %v8418_v13  ;;  %v8424_v31 = vpack.c.bf16 %v8422_v23, %v8423_v7  ;;  %v8429_v13 = vpack.c.bf16 %v7108_v14, %v7049_v16  ;;  %v8432_v2 = vpack.c.bf16 %v7120_v35, %v8431_v22  ;;  %v8444_v22 = vld [vmem:[#allocation28_spill] sm:$0xff] }
 0x1b2   : > { %v1988_v4 = vpop.f32.mrf.mxu1 }
 0x1b3   : > { %v2032_v1 = vpop.f32.mrf.mxu2  ;;  %v2081_v50 = vpop.f32.mrf.mxu3  ;;  %v1989_v3 = vadd.f32 %v7197_v21, %v1988_v4 }
 0x1b4   : > { %v2033_v58 = vadd.f32 %v2032_v1, %v1984_v53  ;;  %v8430_v53 = vpack.c.bf16 %v7111_v5, %v7052_v32 }
 0x1b5   : > { %2183 = vmatmul.bf16.gmra.mxu1 %v8419_v19 }
 0x1b6   : > { %v2082_v20 = vadd.f32 %v2081_v50, %v2033_v58  ;;  %v7298_v8 = vpop.f32.mrf.mxu0 }
 0x1b8   : > { %v7303_v36 = vadd.f32 %v2130_v42, %v2082_v20 }
 0x1ba   : > { %v7305_v29 = vpop.f32.mrf.mxu1 }
 0x1bb   : > { %v7307_v52 = vpop.f32.mrf.mxu2  ;;  %v7309_v59 = vpop.f32.mrf.mxu3 }
 0x1be   : > { %v2135_v37 = vpop.f32.mrf.mxu0 }
 0x1c0   : > { %2232 = vmatmul.bf16.gmra.mxu2 %v8421_v41 }
 0x1c1   : > { %2281 = vmatmul.bf16.gmra.mxu3 %v8424_v31  ;;  %2330 = vmatmul.bf16.gmra.mxu0 %v8427_v48  ;;  %v8434_v31 = vld [vmem:[#allocation23_spill] sm:$0xff] }
 0x1c2   : > { %v1993_v24 = vpop.f32.mrf.mxu1  ;;  %v8436_v11 = vpack.c.bf16 %v8434_v31, %v8435_v39 }
 0x1c3   : > { %v2037_v42 = vpop.f32.mrf.mxu2  ;;  %v1994_v4 = vadd.f32 %v7197_v21, %v1993_v24 }
 0x1c4   : > { %v2086_v57 = vpop.f32.mrf.mxu3  ;;  %v2038_v26 = vadd.f32 %v2037_v42, %v1989_v3 }
 0x1c5   : > { %2188 = vmatmul.bf16.gmra.mxu1 %v8428_v17 }
 0x1c6   : > { %v2087_v55 = vadd.f32 %v2086_v57, %v2038_v26  ;;  %v7324_v44 = vpop.f32.mrf.mxu0  ;;  %v8440_v57 = vld [vmem:[#allocation27_spill] sm:$0xff]  ;;  %v8441_v26 = vld [vmem:[#allocation26_spill] sm:$0xff] }
 0x1c8   : > { %v2136_v47 = vadd.f32 %v2135_v37, %v2087_v55 }
 0x1ca   : > { %v7326_v27 = vpop.f32.mrf.mxu1 }
 0x1cb   : > { %v7328_v28 = vpop.f32.mrf.mxu2 }
 0x1cc   : > { %v7330_v43 = vpop.f32.mrf.mxu3 }
 0x1ce   : > { %v2140_v1 = vpop.f32.mrf.mxu0 }
 0x1d0   : > { %2237 = vmatmul.bf16.gmra.mxu2 %v8429_v13 }
 0x1d1   : > { %2286 = vmatmul.bf16.gmra.mxu3 %v8430_v53  ;;  %2335 = vmatmul.bf16.gmra.mxu0 %v8432_v2  ;;  %v8443_v53 = vld [vmem:[#allocation32_spill] sm:$0xff] }
 0x1d2   : > { %v1998_v50 = vpop.f32.mrf.mxu1 }
 0x1d3   : > { %v2042_v58 = vpop.f32.mrf.mxu2  ;;  %v1999_v9 = vadd.f32 %v7197_v21, %v1998_v50  ;;  %v8447_v50 = vld [vmem:[#allocation40_spill] sm:$0xff] }
 0x1d4   : > { %v2091_v19 = vpop.f32.mrf.mxu3  ;;  %v2043_v20 = vadd.f32 %v2042_v58, %v1994_v4  ;;  %v8448_v58 = vld [vmem:[#allocation35_spill] sm:$0xff] }
 0x1d5   : > { %2193 = vmatmul.bf16.gmra.mxu1 %v8433_v6 }
 0x1d6   : > { %v2092_v16 = vadd.f32 %v2091_v19, %v2043_v20  ;;  %v7349_v35 = vpop.f32.mrf.mxu0 }
 0x1d8   : > { %v2141_v14 = vadd.f32 %v2140_v1, %v2092_v16 }
 0x1da   : > { %v2000_v37 = vpop.f32.mrf.mxu1 }
 0x1db   : > { %v7345_v5 = vpop.f32.mrf.mxu2 }
 0x1dc   : > { %v7347_v32 = vpop.f32.mrf.mxu3 }
 0x1de   : > { %v2145_v12 = vpop.f32.mrf.mxu0 }
 0x1e0   : > { %2242 = vmatmul.bf16.gmra.mxu2 %v1370_v38 }
 0x1e1   : > { %2291 = vmatmul.bf16.gmra.mxu3 %v1371_v34  ;;  %2340 = vmatmul.bf16.gmra.mxu0 %v1372_v33 }
 0x1e2   : > { %v2159_v46 = vpop.f32.mrf.mxu1 }
 0x1e3   : > { %v7362_v10 = vadd.f32 %v2159_v46, %v7215_v60  ;;  %v2047_v41 = vpop.f32.mrf.mxu2  ;;  %v8437_v60 = vld [vmem:[#allocation25_spill] sm:$0xff] }
 0x1e4   : > { %v2048_v23 = vadd.f32 %v2047_v41, %v1999_v9  ;;  %v2096_v7 = vpop.f32.mrf.mxu3  ;;  %v8439_v40 = vpack.c.bf16 %v8437_v60, %v8438_v63  ;;  %v8450_v9 = vld [vmem:[#allocation49_spill] sm:$0xff] }
 0x1e5   : > { %2354 = vmatmul.bf16.vlgmr.msra.gmra.mxu1 %v8436_v11  ;;  %v8451_v46 = vld [vmem:[#allocation45_spill] sm:$0xff] }
 0x1e6   : > { %v2097_v38 = vadd.f32 %v2096_v7, %v2048_v23  ;;  %v8452_v41 = vpack.c.bf16 %v8450_v9, %v8451_v46  ;;  %v2147_v23 = vpop.f32.mrf.mxu0 }
 0x1e8   : > { %v2146_v15 = vadd.f32 %v2145_v12, %v2097_v38 }
 0x1ea   : > { %v2161_v34 = vpop.f32.mrf.mxu1 }
 0x1eb   : > { %v7368_v49 = vadd.f32 %v2161_v34, %v7224_v54  ;;  %v8442_v54 = vpack.c.bf16 %v8440_v57, %v8441_v26  ;;  %v2049_v20 = vpop.f32.mrf.mxu2  ;;  %v8453_v34 = vld [vmem:[#allocation52_spill] sm:$0xff]  ;;  %v2001_v57 = vadd.f32 %v7197_v21, %v2000_v37 }
 0x1ed   : > { %v2050_v26 = vadd.f32 %v2049_v20, %v2001_v57 }
 0x1ee   : > { %v2306_v11 = vpop.f32.mrf.mxu0 }
 0x1f2   : > { %v2164_v45 = vpop.f32.mrf.mxu1 }
 0x1f3   : > { %v7371_v33 = vadd.f32 %v2164_v45, %v7236_v51  ;;  %v2208_v7 = vpop.f32.mrf.mxu2  ;;  %v8454_v45 = vpack.c.bf16 %v7067_v56, %v8453_v34 }
 0x1f5   : > { %2359 = vmatmul.bf16.gmra.mxu1 %v8439_v40 }
 0x1f6   : > { %v2308_v40 = vpop.f32.mrf.mxu0 }
 0x1fa   : > { %v2166_v48 = vpop.f32.mrf.mxu1 }
 0x1fb   : > { %v7377_v3 = vadd.f32 %v2166_v48, %v7245_v30  ;;  %v8445_v30 = vpack.c.bf16 %v8443_v53, %v8444_v22  ;;  %v2210_v38 = vpop.f32.mrf.mxu2  ;;  %v8455_v53 = vld [vmem:[#allocation54_spill] sm:$0xff]  ;;  %v8456_v22 = vld [vmem:[#allocation55_spill] sm:$0xff] }
 0x1fc   : > { %v2211_v9 = vadd.f32 %v2210_v38, %v7368_v49 }
 0x202   : > { %v2169_v24 = vpop.f32.mrf.mxu1 }
 0x203   : > { %v7380_v42 = vadd.f32 %v2169_v24, %v7257_v25  ;;  %v2213_v48 = vpop.f32.mrf.mxu2  ;;  %v5794_v24 = vld [vmem:[%s8446_s1 + $0x28] sm:$0xff] }
 0x205   : > { %2364 = vmatmul.bf16.gmra.mxu1 %v8442_v54 }
 0x20a   : > { %v2171_v17 = vpop.f32.mrf.mxu1 }
 0x20b   : > { %v7386_v51 = vadd.f32 %v2171_v17, %v7266_v18  ;;  %v5796_v18 = vld [vmem:[%s8446_s1 + $0x38] sm:$0xff] }
 0x20c   : > { %2872 = vmatpush.bf16.msra.mxu2 %v5796_v18 }
 0x212   : > { %v2174_v55 = vpop.f32.mrf.mxu1 }
 0x213   : > { %v7389_v13 = vadd.f32 %v2174_v55, %v7278_v61  ;;  %v8449_v61 = vpack.c.bf16 %v8447_v50, %v8448_v58  ;;  %v2311_v55 = vpop.f32.mrf.mxu0 }
 0x215   : > { %2369 = vmatmul.bf16.gmra.mxu1 %v8445_v30  ;;  %v8457_v30 = vpack.c.bf16 %v8455_v53, %v8456_v22  ;;  %v5791_v53 = vld [vmem:[%s8446_s1 + $0x10] sm:$0xff] }
 0x21a   : > { %v2176_v2 = vpop.f32.mrf.mxu1 }
 0x21b   : > { %v7395_v25 = vadd.f32 %v2176_v2, %v7289_v0  ;;  %v5795_v0 = vld [vmem:[%s8446_s1 + $0x30] sm:$0xff]  ;;  %v2215_v2 = vpop.f32.mrf.mxu2  ;;  %v2313_v20 = vpop.f32.mrf.mxu0 }
 0x21c   : > { %2873 = vmatpush.bf16.msra.mxu2 %v5795_v0 }
 0x220   : > { %2874 = vmatpush.bf16.msra.mxu2 %v5794_v24  ;;  %v2214_v24 = vadd.f32 %v2213_v48, %v7371_v33 }
 0x222   : > { %v2179_v4 = vpop.f32.mrf.mxu1 }
 0x223   : > { %v7398_v1 = vadd.f32 %v2179_v4, %v7303_v36  ;;  %v2098_v36 = vpop.f32.mrf.mxu3  ;;  %v2209_v4 = vadd.f32 %v2208_v7, %v7362_v10  ;;  %v2316_v57 = vpop.f32.mrf.mxu0 }
 0x224   : > { %v2099_v17 = vadd.f32 %v2098_v36, %v2050_v26  ;;  %v2218_v36 = vpop.f32.mrf.mxu2 }
 0x225   : > { %2374 = vmatmul.bf16.gmra.mxu1 %v8449_v61 }
 0x226   : > { %v2148_v18 = vadd.f32 %v2147_v23, %v2099_v17 }
 0x22a   : > { %v7406_v19 = vpop.f32.mrf.mxu1 }
 0x22b   : > { %v2257_v39 = vpop.f32.mrf.mxu3 }
 0x22c   : > { %v2258_v61 = vadd.f32 %v2257_v39, %v2209_v4  ;;  %v2220_v49 = vpop.f32.mrf.mxu2  ;;  %v5790_v4 = vld [vmem:[%s8446_s1 + $0x8] sm:$0xff] }
 0x22e   : > { %v2307_v46 = vadd.f32 %v2306_v11, %v2258_v61 }
 0x232   : > { %v2184_v6 = vpop.f32.mrf.mxu1 }
 0x233   : > { %v7408_v16 = vadd.f32 %v2184_v6, %v2136_v47  ;;  %v2259_v60 = vpop.f32.mrf.mxu3  ;;  %v6229_v6 = vmov 1966171168  }
 0x234   : > { %v2412_v0 = vunpack.c.l.s4 %v6229_v6  ;;  %v2260_v7 = vadd.f32 %v2259_v60, %v2211_v9  ;;  %v5804_v60 = vld [vmem:[%s8446_s1 + $0x78] sm:$0xff]  ;;  %v5802_v9 = vld [vmem:[%s8446_s1 + $0x68] sm:$0xff] }
 0x235   : > { %2379 = vmatmul.bf16.gmra.mxu1 %v8452_v41  ;;  %2901 = vmatpush.bf16.msra.mxu3 %v5804_v60 }
 0x236   : > { %v7443_v23 = vunpack.c.0.s8 %v2412_v0 }
 0x23a   : > { %v7416_v31 = vpop.f32.mrf.mxu1 }
 0x23b   : > { %v2262_v54 = vpop.f32.mrf.mxu3 }
 0x23c   : > { %v2263_v22 = vadd.f32 %v2262_v54, %v2214_v24 }
 0x23e   : > { %v2312_v61 = vadd.f32 %v2311_v55, %v2263_v22 }
 0x242   : > { %v2189_v12 = vpop.f32.mrf.mxu1 }
 0x243   : > { %v7418_v47 = vadd.f32 %v2189_v12, %v2141_v14  ;;  %v2264_v58 = vpop.f32.mrf.mxu3 }
 0x245   : > { %2384 = vmatmul.bf16.gmra.mxu1 %v8454_v45  ;;  %v5792_v45 = vld [vmem:[%s8446_s1 + $0x18] sm:$0xff] }
 0x24a   : > { %v7423_v63 = vpop.f32.mrf.mxu1 }
 0x24b   : > { %v2267_v34 = vpop.f32.mrf.mxu3 }
 0x252   : > { %v2194_v14 = vpop.f32.mrf.mxu1 }
 0x253   : > { %v7431_v56 = vadd.f32 %v2194_v14, %v2146_v15  ;;  %v5793_v15 = vld [vmem:[%s8446_s1 + $0x20] sm:$0xff]  ;;  %v2309_v14 = vadd.f32 %v2308_v40, %v2260_v7  ;;  %v5803_v40 = vld [vmem:[%s8446_s1 + $0x70] sm:$0xff]  ;;  %v2269_v48 = vpop.f32.mrf.mxu3  ;;  %v2219_v7 = vadd.f32 %v2218_v36, %v7380_v42 }
 0x254   : > { %2875 = vmatpush.bf16.msra.mxu2 %v5793_v15  ;;  %2902 = vmatpush.bf16.msra.mxu3 %v5803_v40  ;;  %v2318_v15 = vpop.f32.mrf.mxu0  ;;  %v5799_v42 = vld [vmem:[%s8446_s1 + $0x50] sm:$0xff] }
 0x255   : > { %5087 = vmatmul.msk.bf16.gmra.mxu1 %vm5085_vm10, %v8457_v30 }
 0x258   : > { %2876 = vmatpush.bf16.msra.mxu2 %v5792_v45  ;;  %2903 = vmatpush.bf16.msra.mxu3 %v5802_v9 }
 0x25a   : > { %v2196_v37 = vpop.f32.mrf.mxu1 }
 0x25b   : > { %v7437_v50 = vadd.f32 %v2196_v37, %v2148_v18  ;;  %v2216_v18 = vadd.f32 %v2215_v2, %v7377_v3  ;;  %v5801_v2 = vld [vmem:[%s8446_s1 + $0x60] sm:$0xff]  ;;  %v2272_v45 = vpop.f32.mrf.mxu3 }
 0x25c   : > { %2877 = vmatpush.bf16.msra.mxu2 %v5791_v53  ;;  %2904 = vmatpush.bf16.msra.mxu3 %v5801_v2 }
 0x260   : > { %2878 = vmatpush.bf16.msra.mxu2 %v5790_v4 }
 0x262   : > { %v2355_v41 = vpop.f32.mrf.mxu1 }
 0x263   : > { %v2356_v10 = vadd.f32 %v2355_v41, %v2307_v46  ;;  %v2223_v46 = vpop.f32.mrf.mxu2  ;;  %v5789_v41 = vld [vmem:[%s8446_s1] sm:$0xff]  ;;  %v2274_v4 = vpop.f32.mrf.mxu3 }
 0x264   : > { %2879 = vmatpush.bf16.msra.mxu2 %v5789_v41 }
 0x265   : > { %v2395_v12 = vmax.f32 %v2356_v10, 0.0  ;;  %v2265_v10 = vadd.f32 %v2264_v58, %v2216_v18  ;;  %v5800_v58 = vld [vmem:[%s8446_s1 + $0x58] sm:$0xff] }
 0x266   : > { %2905 = vmatpush.bf16.msra.mxu3 %v5800_v58 }
 0x267   : > { %v2414_v39 = vperm.slane %v2395_v12, %v7443_v23 }
 0x269   : > { %v2491_v26 = vrot.slane %v2414_v39, 4 }
 0x26a   : > { %v2357_v11 = vpop.f32.mrf.mxu1  ;;  %2906 = vmatpush.bf16.msra.mxu3 %v5799_v42 }
 0x26b   : > { %v2523_v38 = vmax.f32 %v2414_v39, %v2491_v26  ;;  %v2358_v17 = vadd.f32 %v2357_v11, %v2309_v14  ;;  %v2314_v39 = vadd.f32 %v2313_v20, %v2265_v10  ;;  %v2268_v11 = vadd.f32 %v2267_v34, %v2219_v7  ;;  %v2225_v60 = vpop.f32.mrf.mxu2  ;;  %v5798_v34 = vld [vmem:[%s8446_s1 + $0x48] sm:$0xff] }
 0x26c   : > { %v2221_v20 = vadd.f32 %v2220_v49, %v7386_v51  ;;  %v5797_v51 = vld [vmem:[%s8446_s1 + $0x40] sm:$0xff]  ;;  %v2224_v49 = vadd.f32 %v2223_v46, %v7389_v13  ;;  %v2277_v13 = vpop.f32.mrf.mxu3 }
 0x26d   : > { %2555 = vst [vmem:[#allocation1] ss:$2 sm:$0xff] %v2523_v38  ;;  %v2396_v30 = vmax.f32 %v2358_v17, 0.0  ;;  %v2321_v38 = vpop.f32.mrf.mxu0  ;;  %v2317_v22 = vadd.f32 %v2316_v57, %v2268_v11  ;;  %v2226_v11 = vadd.f32 %v2225_v60, %v7395_v25 }
 0x26e   : > { %v2270_v18 = vadd.f32 %v2269_v48, %v2221_v20  ;;  %2907 = vmatpush.bf16.msra.mxu3 %v5798_v34  ;;  %v2273_v7 = vadd.f32 %v2272_v45, %v2224_v49 }
 0x26f   : > { %v2418_v33 = vperm.slane %v2396_v30, %v7443_v23 }
 0x270   : > { %v2319_v9 = vadd.f32 %v2318_v15, %v2270_v18  ;;  %v2322_v42 = vadd.f32 %v2321_v38, %v2273_v7  ;;  %v2275_v18 = vadd.f32 %v2274_v4, %v2226_v11  ;;  %v5876_v15 = vld [vmem:[%s8466_s11 + $0x78] sm:$0xff] }
 0x271   : > { %v2492_v37 = vrot.slane %v2418_v33, 4 }
 0x272   : > { %v2360_v54 = vpop.f32.mrf.mxu1  ;;  %2908 = vmatpush.bf16.msra.mxu3 %v5797_v51 }
 0x273   : > { %v2524_v6 = vmax.f32 %v2418_v33, %v2492_v37  ;;  %v2361_v0 = vadd.f32 %v2360_v54, %v2312_v61  ;;  %v2228_v57 = vpop.f32.mrf.mxu2 }
 0x274   : > { %v2279_v60 = vpop.f32.mrf.mxu3 }
 0x275   : > { %2557 = vst [vmem:[#allocation1 + $0x1] ss:$2 sm:$0xff] %v2524_v6  ;;  %v2397_v3 = vmax.f32 %v2361_v0, 0.0  ;;  %v2323_v54 = vpop.f32.mrf.mxu0 }
 0x276   : > { %v2324_v51 = vadd.f32 %v2323_v54, %v2275_v18 }
 0x277   : > { %v2422_v55 = vperm.slane %v2397_v3, %v7443_v23 }
 0x279   : > { %v2493_v12 = vrot.slane %v2422_v55, 4 }
 0x27a   : > { %v2362_v24 = vpop.f32.mrf.mxu1 }
 0x27b   : > { %v2525_v26 = vmax.f32 %v2422_v55, %v2493_v12  ;;  %v2363_v14 = vadd.f32 %v2362_v24, %v2314_v39  ;;  %v2230_v20 = vpop.f32.mrf.mxu2  ;;  %v5892_v55 = vld [vmem:[%s8470_s13 + $0x38] sm:$0xff] }
 0x27c   : > { %v2570_v61 = vld.sshfl [vmem:[#allocation1] sm:$0xff pattern:$0x75316420] }
 0x27d   : > { %2559 = vst [vmem:[#allocation1 + $0x10] ss:$2 sm:$0xff] %v2525_v26  ;;  %v2398_v17 = vmax.f32 %v2363_v14, 0.0  ;;  %v2586_v41 = vrot.slane %v2570_v61, 7  ;;  %v2229_v61 = vadd.f32 %v2228_v57, %v7398_v1 }
 0x27f   : > { %v2426_v53 = vperm.slane %v2398_v17, %v7443_v23  ;;  %v2610_v24 = vsel %vm1252_vm2, 0.0, %v2586_v41  ;;  %v2326_v17 = vpop.f32.mrf.mxu0  ;;  %v2278_v4 = vadd.f32 %v2277_v13, %v2229_v61  ;;  %v1991_v13 = vadd.f32 %v7197_v21, %v7305_v29 }
 0x280   : > { %v2639_v58 = vrot.slane %v2610_v24, 2  ;;  %v2614_v54 = vrot.slane %v2610_v24, 1 }
 0x281   : > { %v2494_v36 = vrot.slane %v2426_v53, 4 }
 0x282   : > { %v2365_v30 = vpop.f32.mrf.mxu1 }
 0x283   : > { %v2526_v33 = vmax.f32 %v2426_v53, %v2494_v36  ;;  %v2366_v40 = vadd.f32 %v2365_v30, %v2317_v22  ;;  %v1986_v30 = vadd.f32 %v7197_v21, %v7281_v62 }
 0x285   : > { %2561 = vst [vmem:[#allocation1 + $0x11] ss:$2 sm:$0xff] %v2526_v33  ;;  %v2399_v37 = vmax.f32 %v2366_v40, 0.0  ;;  %v2035_v34 = vadd.f32 %v7307_v52, %v1986_v30 }
 0x287   : > { %v2430_v6 = vperm.slane %v2399_v37, %v7443_v23  ;;  %v2084_v37 = vadd.f32 %v7309_v59, %v2035_v34 }
 0x289   : > { %v2495_v0 = vrot.slane %v2430_v6, 4  ;;  %v2133_v52 = vadd.f32 %v7298_v8, %v2084_v37  ;;  %v2327_v8 = vadd.f32 %v2326_v17, %v2278_v4 }
 0x28a   : > { %v2367_v10 = vpop.f32.mrf.mxu1 }
 0x28b   : > { %v2527_v48 = vmax.f32 %v2430_v6, %v2495_v0  ;;  %v2368_v3 = vadd.f32 %v2367_v10, %v2319_v9  ;;  %v2328_v0 = vpop.f32.mrf.mxu0  ;;  %v2182_v7 = vadd.f32 %v7406_v19, %v2133_v52 }
 0x28c   : > { %v2571_v2 = vld.sshfl [vmem:[#allocation1 + $0x10] sm:$0xff pattern:$0x75316420] }
 0x28d   : > { %2563 = vst [vmem:[#allocation1 + $0x20] ss:$2 sm:$0xff] %v2527_v48  ;;  %v2400_v12 = vmax.f32 %v2368_v3, 0.0  ;;  %v2587_v39 = vrot.slane %v2571_v2, 7 }
 0x28f   : > { %v2434_v46 = vperm.slane %v2400_v12, %v7443_v23  ;;  %v2588_v26 = vsel %vm1252_vm2, %v2586_v41, %v2587_v39 }
 0x290   : > { %v5186_v14 = vpack.c.bf16 %v2588_v26, %v2586_v41  ;;  %v2640_v45 = vrot.slane %v2588_v26, 2  ;;  %v2233_v41 = vpop.f32.mrf.mxu2  ;;  %v2615_v2 = vrot.slane %v2588_v26, 1 }
 0x291   : > { %v2496_v53 = vrot.slane %v2434_v46, 4 }
 0x292   : > { %v2370_v36 = vpop.f32.mrf.mxu1  ;;  %5187 = vmatmul.msk.bf16.vlgmr.msra.gmra.mxu2 %vm7500_vm12, %v5186_v14  ;;  %v7510_v22 = vsel %vm1003_vm8, %v2639_v58, %v2640_v45  ;;  %v2282_v58 = vpop.f32.mrf.mxu3  ;;  %v2616_v19 = vsel %vm953_vm7, %v2614_v54, %v2615_v2 }
 0x293   : > { %v2528_v33 = vmax.f32 %v2434_v46, %v2496_v53  ;;  %v2371_v40 = vadd.f32 %v2370_v36, %v2322_v42  ;;  %v2231_v46 = vadd.f32 %v2230_v20, %v2182_v7  ;;  %v2040_v20 = vadd.f32 %v7328_v28, %v1991_v13  ;;  %v2331_v36 = vpop.f32.mrf.mxu0  ;;  %v5811_v13 = vld [vmem:[%s8446_s1 + $0xb0] sm:$0xff] }
 0x295   : > { %2565 = vst [vmem:[#allocation1 + $0x21] ss:$2 sm:$0xff] %v2528_v33  ;;  %v2401_v25 = vmax.f32 %v2371_v40, 0.0  ;;  %v2280_v29 = vadd.f32 %v2279_v60, %v2231_v46  ;;  %v2089_v34 = vadd.f32 %v7330_v43, %v2040_v20 }
 0x297   : > { %v2438_v38 = vperm.slane %v2401_v25, %v7443_v23  ;;  %v2329_v25 = vadd.f32 %v2328_v0, %v2280_v29  ;;  %v2138_v28 = vadd.f32 %v7324_v44, %v2089_v34 }
 0x298   : > { %v2235_v33 = vpop.f32.mrf.mxu2 }
 0x299   : > { %v2497_v6 = vrot.slane %v2438_v38, 4  ;;  %v2187_v43 = vadd.f32 %v7416_v31, %v2138_v28  ;;  %v1996_v31 = vadd.f32 %v7197_v21, %v7326_v27 }
 0x29a   : > { %v2372_v49 = vpop.f32.mrf.mxu1 }
 0x29b   : > { %v2529_v9 = vmax.f32 %v2438_v38, %v2497_v6  ;;  %v2373_v62 = vadd.f32 %v2372_v49, %v2324_v51  ;;  %v2284_v6 = vpop.f32.mrf.mxu3  ;;  %v2236_v4 = vadd.f32 %v2235_v33, %v2187_v43 }
 0x29c   : > { %v2572_v10 = vld.sshfl [vmem:[#allocation1 + $0x20] sm:$0xff pattern:$0x75316420] }
 0x29d   : > { %2567 = vst [vmem:[#allocation1 + $0x30] ss:$2 sm:$0xff] %v2529_v9  ;;  %v2402_v48 = vmax.f32 %v2373_v62, 0.0  ;;  %v2589_v3 = vrot.slane %v2572_v10, 7  ;;  %v5812_v62 = vld [vmem:[%s8446_s1 + $0xb8] sm:$0xff] }
 0x29e   : > { %2930 = vmatpush.bf16.msrb.mxu2 %v5812_v62 }
 0x29f   : > { %v2442_v59 = vperm.slane %v2402_v48, %v7443_v23  ;;  %v7522_v1 = vsel %vm1252_vm2, %v2587_v39, %v2589_v3 }
 0x2a0   : > { %v2617_v57 = vrot.slane %v7522_v1, 1  ;;  %v2642_v12 = vrot.slane %v7522_v1, 2  ;;  %v2238_v10 = vpop.f32.mrf.mxu2 }
 0x2a1   : > { %v2498_v14 = vrot.slane %v2442_v59, 4  ;;  %v2239_v21 = vadd.f32 %v2238_v10, %v7418_v47  ;;  %v5808_v10 = vld [vmem:[%s8446_s1 + $0x98] sm:$0xff] }
 0x2a2   : > { %v2375_v26 = vpop.f32.mrf.mxu1  ;;  %v2618_v39 = vsel %vm953_vm7, %v2615_v2, %v2617_v57  ;;  %v7533_v24 = vsel %vm1003_vm8, %v2640_v45, %v2642_v12  ;;  %v2234_v45 = vadd.f32 %v2233_v41, %v7408_v16  ;;  %v2333_v16 = vpop.f32.mrf.mxu0  ;;  %2931 = vmatpush.bf16.msrb.mxu2 %v5811_v13 }
 0x2a3   : > { %v2530_v11 = vmax.f32 %v2442_v59, %v2498_v14  ;;  %v2376_v53 = vadd.f32 %v2375_v26, %v2327_v8  ;;  %v2665_v42 = vpack.c.bf16 %v2618_v39, %v2616_v19  ;;  %v2666_v17 = vpack.c.bf16 %v7533_v24, %v7510_v22  ;;  %v5836_v22 = vld [vmem:[%s8462_s7 + $0xb8] sm:$0xff] }
 0x2a4   : > { %v2283_v60 = vadd.f32 %v2282_v58, %v2234_v45  ;;  %v2285_v14 = vadd.f32 %v2284_v6, %v2236_v4  ;;  %v2287_v58 = vpop.f32.mrf.mxu3  ;;  %3317 = vmatpush.bf16.msrb.mxu0 %v5836_v22 }
 0x2a5   : > { %2569 = vst [vmem:[#allocation1 + $0x31] ss:$2 sm:$0xff] %v2530_v11  ;;  %v2403_v30 = vmax.f32 %v2376_v53, 0.0  ;;  %2909 = vmatmul.bf16.vlgmr.msra.gmra.mxu3 %v2665_v42 }
 0x2a6   : > { %v2332_v2 = vadd.f32 %v2331_v36, %v2283_v60  ;;  %v2334_v39 = vadd.f32 %v2333_v16, %v2285_v14  ;;  %v2288_v36 = vadd.f32 %v2287_v58, %v2239_v21 }
 0x2a7   : > { %v2446_v40 = vperm.slane %v2403_v30, %v7443_v23 }
 0x2a8   : > { %v2240_v11 = vpop.f32.mrf.mxu2 }
 0x2a9   : > { %v2499_v18 = vrot.slane %v2446_v40, 4 }
 0x2aa   : > { %v2377_v38 = vpop.f32.mrf.mxu1  ;;  %v2336_v19 = vpop.f32.mrf.mxu0 }
 0x2ab   : > { %v2531_v37 = vmax.f32 %v2446_v40, %v2499_v18  ;;  %v2378_v61 = vadd.f32 %v2377_v38, %v2329_v25 }
 0x2ac   : > { %v2573_v51 = vld.sshfl [vmem:[#allocation1 + $0x30] sm:$0xff pattern:$0x75316420]  ;;  %v2289_v18 = vpop.f32.mrf.mxu3 }
 0x2ad   : > { %2574 = vst [vmem:[#allocation1] ss:$2 sm:$0xff] %v2531_v37  ;;  %v2404_v49 = vmax.f32 %v2378_v61, 0.0  ;;  %v2591_v9 = vrot.slane %v2573_v51, 7  ;;  %v2337_v61 = vadd.f32 %v2336_v19, %v2288_v36 }
 0x2af   : > { %v2450_v0 = vperm.slane %v2404_v49, %v7443_v23  ;;  %v2592_v41 = vsel %vm1252_vm2, %v2589_v3, %v2591_v9  ;;  %v2045_v3 = vadd.f32 %v7345_v5, %v1996_v31 }
 0x2b0   : > { %v2644_v52 = vrot.slane %v2592_v41, 2  ;;  %v2667_v44 = vpack.c.bf16 %v2592_v41, %v7522_v1  ;;  %v2619_v40 = vrot.slane %v2592_v41, 1  ;;  %v2243_v16 = vpop.f32.mrf.mxu2 }
 0x2b1   : > { %v2500_v48 = vrot.slane %v2450_v0, 4 }
 0x2b2   : > { %v2380_v7 = vpop.f32.mrf.mxu1  ;;  %2885 = vmatmul.bf16.gmra.mxu2 %v2667_v44  ;;  %v7550_v59 = vsel %vm1003_vm8, %v2642_v12, %v2644_v52  ;;  %v2094_v12 = vadd.f32 %v7347_v32, %v2045_v3  ;;  %v5810_v32 = vld [vmem:[%s8446_s1 + $0xa8] sm:$0xff]  ;;  %v2620_v51 = vsel %vm953_vm7, %v2617_v57, %v2619_v40  ;;  %v2338_v43 = vpop.f32.mrf.mxu0  ;;  %v5809_v57 = vld [vmem:[%s8446_s1 + $0xa0] sm:$0xff] }
 0x2b3   : > { %v2532_v54 = vmax.f32 %v2450_v0, %v2500_v48  ;;  %v2381_v46 = vadd.f32 %v2380_v7, %v2332_v2  ;;  %2932 = vmatpush.bf16.msrb.mxu2 %v5810_v32 }
 0x2b4   : > { %v2143_v29 = vadd.f32 %v7349_v35, %v2094_v12  ;;  %v2292_v48 = vpop.f32.mrf.mxu3 }
 0x2b5   : > { %2575 = vst [vmem:[#allocation1 + $0x1] ss:$2 sm:$0xff] %v2532_v54  ;;  %v2405_v8 = vmax.f32 %v2381_v46, 0.0  ;;  %v5807_v54 = vld [vmem:[%s8446_s1 + $0x90] sm:$0xff] }
 0x2b6   : > { %v2192_v47 = vadd.f32 %v7423_v63, %v2143_v29 }
 0x2b7   : > { %v2454_v26 = vperm.slane %v2405_v8, %v7443_v23  ;;  %2933 = vmatpush.bf16.msrb.mxu2 %v5809_v57 }
 0x2b8   : > { %v2241_v38 = vadd.f32 %v2240_v11, %v2192_v47  ;;  %v2245_v58 = vpop.f32.mrf.mxu2 }
 0x2b9   : > { %v2501_v27 = vrot.slane %v2454_v26, 4  ;;  %v2246_v21 = vadd.f32 %v2245_v58, %v7437_v50  ;;  %v5805_v50 = vld [vmem:[%s8446_s1 + $0x80] sm:$0xff] }
 0x2ba   : > { %v2382_v5 = vpop.f32.mrf.mxu1  ;;  %v2290_v0 = vadd.f32 %v2289_v18, %v2241_v38  ;;  %v2341_v13 = vpop.f32.mrf.mxu0 }
 0x2bb   : > { %v2533_v53 = vmax.f32 %v2454_v26, %v2501_v27  ;;  %v2383_v42 = vadd.f32 %v2382_v5, %v2334_v39  ;;  %2934 = vmatpush.bf16.msrb.mxu2 %v5808_v10  ;;  %v5806_v5 = vld [vmem:[%s8446_s1 + $0x88] sm:$0xff]  ;;  %s4754_s1 = sshll.u32 %s7657_s0, 5 }
 0x2bc   : > { %v2582_v20 = vld.sshfl [vmem:[#allocation1] sm:$0xff pattern:$0x75316420]  ;;  %v2339_v4 = vadd.f32 %v2338_v43, %v2290_v0  ;;  %v2294_v29 = vpop.f32.mrf.mxu3 }
 0x2bd   : > { %2576 = vst [vmem:[#allocation1 + $0x10] ss:$2 sm:$0xff] %v2533_v53  ;;  %v2406_v30 = vmax.f32 %v2383_v42, 0.0  ;;  %v2593_v33 = vrot.slane %v2582_v20, 7  ;;  %v2295_v36 = vadd.f32 %v2294_v29, %v2246_v21  ;;  %v5833_v29 = vld [vmem:[%s8462_s7 + $0xa0] sm:$0xff] }
 0x2bf   : > { %v2458_v34 = vperm.slane %v2406_v30, %v7443_v23  ;;  %v7568_v45 = vsel %vm1252_vm2, %v2591_v9, %v2593_v33  ;;  %2935 = vmatpush.bf16.msrb.mxu2 %v5807_v54 }
 0x2c0   : > { %v2621_v35 = vrot.slane %v7568_v45, 1  ;;  %v2646_v25 = vrot.slane %v7568_v45, 2 }
 0x2c1   : > { %v2502_v37 = vrot.slane %v2458_v34, 4 }
 0x2c2   : > { %v2385_v6 = vpop.f32.mrf.mxu1  ;;  %v2622_v63 = vsel %vm953_vm7, %v2619_v40, %v2621_v35  ;;  %v7579_v28 = vsel %vm1003_vm8, %v2644_v52, %v2646_v25  ;;  %v2244_v52 = vadd.f32 %v2243_v16, %v7431_v56  ;;  %v2343_v32 = vpop.f32.mrf.mxu0 }
 0x2c3   : > { %v2534_v60 = vmax.f32 %v2458_v34, %v2502_v37  ;;  %v2386_v49 = vadd.f32 %v2385_v6, %v2337_v61  ;;  %v2668_v9 = vpack.c.bf16 %v2622_v63, %v2620_v51  ;;  %v2669_v62 = vpack.c.bf16 %v7579_v28, %v7550_v59  ;;  %2936 = vmatpush.bf16.msrb.mxu2 %v5806_v5  ;;  %v5820_v28 = vld [vmem:[%s8462_s7 + $0x38] sm:$0xff] }
 0x2c4   : > { %v2293_v3 = vadd.f32 %v2292_v48, %v2244_v52  ;;  %v2344_v47 = vadd.f32 %v2343_v32, %v2295_v36  ;;  %3279 = vmatpush.bf16.msrb.mxu3 %v5820_v28 }
 0x2c5   : > { %2577 = vst [vmem:[#allocation1 + $0x11] ss:$2 sm:$0xff] %v2534_v60  ;;  %v2407_v1 = vmax.f32 %v2386_v49, 0.0  ;;  %2914 = vmatmul.bf16.gmra.mxu3 %v2668_v9 }
 0x2c6   : > { %v2342_v39 = vadd.f32 %v2341_v13, %v2293_v3 }
 0x2c7   : > { %v2462_v41 = vperm.slane %v2407_v1, %v7443_v23  ;;  %2937 = vmatpush.bf16.msrb.mxu2 %v5805_v50  ;;  %v5816_v50 = vld [vmem:[%s8462_s7 + $0x18] sm:$0xff] }
 0x2c9   : > { %v2503_v44 = vrot.slane %v2462_v41, 4 }
 0x2ca   : > { %v2387_v2 = vpop.f32.mrf.mxu1 }
 0x2cb   : > { %v2535_v7 = vmax.f32 %v2462_v41, %v2503_v44  ;;  %v2388_v31 = vadd.f32 %v2387_v2, %v2339_v4 }
 0x2cc   : > { %v2583_v46 = vld.sshfl [vmem:[#allocation1 + $0x10] sm:$0xff pattern:$0x75316420] }
 0x2cd   : > { %2578 = vst [vmem:[#allocation1 + $0x20] ss:$2 sm:$0xff] %v2535_v7  ;;  %v2408_v14 = vmax.f32 %v2388_v31, 0.0  ;;  %v2595_v8 = vrot.slane %v2583_v46, 7 }
 0x2cf   : > { %v2466_v56 = vperm.slane %v2408_v14, %v7443_v23  ;;  %v2596_v26 = vsel %vm1252_vm2, %v2593_v33, %v2595_v8 }
 0x2d0   : > { %v2648_v12 = vrot.slane %v2596_v26, 2  ;;  %v2670_v19 = vpack.c.bf16 %v2596_v26, %v7568_v45  ;;  %v2623_v6 = vrot.slane %v2596_v26, 1  ;;  %v5834_v26 = vld [vmem:[%s8462_s7 + $0xa8] sm:$0xff] }
 0x2d1   : > { %v2504_v27 = vrot.slane %v2466_v56, 4 }
 0x2d2   : > { %v2390_v11 = vpop.f32.mrf.mxu1  ;;  %2890 = vmatmul.bf16.gmra.mxu2 %v2670_v19  ;;  %v2649_v53 = vsel %vm1003_vm8, %v2646_v25, %v2648_v12  ;;  %v2624_v43 = vsel %vm953_vm7, %v2621_v35, %v2623_v6 }
 0x2d3   : > { %v2536_v42 = vmax.f32 %v2466_v56, %v2504_v27  ;;  %v2391_v20 = vadd.f32 %v2390_v11, %v2342_v39  ;;  %v5819_v56 = vld [vmem:[%s8462_s7 + $0x30] sm:$0xff]  ;;  %v7651_v39 = vld [vmem:[%s8463_s3] ss:$0 sm:$0xff]  ;;  %v5818_v11 = vld [vmem:[%s8462_s7 + $0x28] sm:$0xff]  ;;  %s7810_s3 = scalar_lea.vmem [#allocation4], %s4754_s1  ;;  %s4756_s1 = sshll.u32 %s7657_s0, 3 }
 0x2d4   : > { %3280 = vmatpush.bf16.msrb.mxu3 %v5819_v56  ;;  %s8035_s22 = scalar_lea.vmem [#allocation7], %s4756_s1  ;;  %s4757_s1 = sshll.u32 %s7657_s0, 2 }
 0x2d5   : > { %2579 = vst [vmem:[#allocation1 + $0x21] ss:$2 sm:$0xff] %v2536_v42  ;;  %v2409_v30 = vmax.f32 %v2391_v20, 0.0  ;;  %v5817_v42 = vld [vmem:[%s8462_s7 + $0x20] sm:$0xff]  ;;  %s714_s23 = scalar_lea.vmem [#allocation9], %s4757_s1  ;;  %s4466_s29 = sshll.u32 %s7810_s3, 4  ;;  %s8092_s29 = int_to_ptr.vmem [resolvable:$true] %s4466_s29 }
 0x2d6   : > { %s5703_s1 = sshll.u32 %s6368_s4, 3 }
 0x2d7   : > { %v2470_v33 = vperm.slane %v2409_v30, %v7443_v23 }
 0x2d8   : > { %3281 = vmatpush.bf16.msrb.mxu3 %v5818_v11 }
 0x2d9   : > { %v2505_v40 = vrot.slane %v2470_v33, 4 }
 0x2da   : > { %v2392_v34 = vpop.f32.mrf.mxu1 }
 0x2db   : > { %v2537_v18 = vmax.f32 %v2470_v33, %v2505_v40  ;;  %v2393_v25 = vadd.f32 %v2392_v34, %v2344_v47  ;;  %v5815_v34 = vld [vmem:[%s8462_s7 + $0x10] sm:$0xff] }
 0x2dc   : > { %v2584_v38 = vld.sshfl [vmem:[#allocation1 + $0x20] sm:$0xff pattern:$0x75316420]  ;;  %3282 = vmatpush.bf16.msrb.mxu3 %v5817_v42 }
 0x2dd   : > { %2580 = vst [vmem:[#allocation1 + $0x30] ss:$2 sm:$0xff] %v2537_v18  ;;  %v2410_v37 = vmax.f32 %v2393_v25, 0.0  ;;  %v2597_v61 = vrot.slane %v2584_v38, 7  ;;  %v5832_v25 = vld [vmem:[%s8462_s7 + $0x98] sm:$0xff] }
 0x2df   : > { %v2474_v51 = vperm.slane %v2410_v37, %v7443_v23  ;;  %v2598_v63 = vsel %vm1252_vm2, %v2595_v8, %v2597_v61 }
 0x2e0   : > { %v2625_v60 = vrot.slane %v2598_v63, 1  ;;  %v2650_v49 = vrot.slane %v2598_v63, 2  ;;  %3283 = vmatpush.bf16.msrb.mxu3 %v5816_v50 }
 0x2e1   : > { %v2506_v9 = vrot.slane %v2474_v51, 4 }
 0x2e2   : > { %v2626_v16 = vsel %vm953_vm7, %v2623_v6, %v2625_v60  ;;  %v2651_v0 = vsel %vm1003_vm8, %v2648_v12, %v2650_v49  ;;  %v5831_v6 = vld [vmem:[%s8462_s7 + $0x90] sm:$0xff] }
 0x2e3   : > { %v2538_v1 = vmax.f32 %v2474_v51, %v2506_v9  ;;  %v2671_v57 = vpack.c.bf16 %v2626_v16, %v2624_v43  ;;  %v2672_v41 = vpack.c.bf16 %v2651_v0, %v2649_v53  ;;  %v5813_v9 = vld [vmem:[%s8462_s7] sm:$0xff]  ;;  %v5830_v16 = vld [vmem:[%s8462_s7 + $0x88] sm:$0xff] }
 0x2e4   : > { %3284 = vmatpush.bf16.msrb.mxu3 %v5815_v34 }
 0x2e5   : > { %2581 = vst [vmem:[#allocation1 + $0x31] ss:$2 sm:$0xff] %v2538_v1  ;;  %2919 = vmatmul.bf16.gmra.mxu3 %v2671_v57  ;;  %v5829_v57 = vld [vmem:[%s8462_s7 + $0x80] sm:$0xff] }
 0x2ec   : > { %v2585_v10 = vld.sshfl [vmem:[#allocation1 + $0x30] sm:$0xff pattern:$0x75316420] }
 0x2ed   : > { %v2599_v52 = vrot.slane %v2585_v10, 7 }
 0x2ef   : > { %v2600_v44 = vsel %vm1252_vm2, %v2597_v61, %v2599_v52  ;;  %v2611_v4 = vsel %vm1252_vm2, %v2599_v52, 0.0  ;;  %v5814_v61 = vld [vmem:[%s8462_s7 + $0x8] sm:$0xff] }
 0x2f0   : > { %v2627_v48 = vrot.slane %v2600_v44, 1  ;;  %v2673_v2 = vpack.c.bf16 %v2600_v44, %v2598_v63  ;;  %v2629_v45 = vrot.slane %v2611_v4, 1  ;;  %v2652_v54 = vrot.slane %v2600_v44, 2  ;;  %3285 = vmatpush.bf16.msrb.mxu3 %v5814_v61  ;;  %v5822_v61 = vld [vmem:[%s8462_s7 + $0x48] sm:$0xff] }
 0x2f1   : > { %v2654_v46 = vrot.slane %v2611_v4, 2 }
 0x2f2   : > { %2895 = vmatmul.bf16.gmra.mxu2 %v2673_v2  ;;  %v2628_v35 = vsel %vm953_vm7, %v2625_v60, %v2627_v48  ;;  %v2630_v7 = vsel %vm953_vm7, %v2627_v48, %v2629_v45  ;;  %v2653_v3 = vsel %vm1003_vm8, %v2650_v49, %v2652_v54 }
 0x2f3   : > { %v2674_v31 = vpack.c.bf16 %v2630_v7, %v2628_v35  ;;  %v2655_v14 = vsel %vm1003_vm8, %v2652_v54, %v2654_v46 }
 0x2f4   : > { %v2675_v8 = vpack.c.bf16 %v2655_v14, %v2653_v3  ;;  %3286 = vmatpush.bf16.msrb.mxu3 %v5813_v9  ;;  %v5828_v14 = vld [vmem:[%s8462_s7 + $0x78] sm:$0xff] }
 0x2f5   : > { %2924 = vmatmul.bf16.gmra.mxu3 %v2674_v31 }
 0x2f8   : > { %3298 = vmatpush.bf16.msra.mxu3 %v5828_v14  ;;  %v5851_v14 = vld [vmem:[%s8464_s9 + $0x70] sm:$0xff] }
 0x302   : > { %2938 = vmatmul.bf16.vlgmr.msrb.gmra.mxu2 %v2666_v17  ;;  %v5835_v17 = vld [vmem:[%s8462_s7 + $0xb0] sm:$0xff] }
 0x303   : > { %3318 = vmatpush.bf16.msrb.mxu0 %v5835_v17  ;;  %v5826_v17 = vld [vmem:[%s8462_s7 + $0x68] sm:$0xff] }
 0x307   : > { %3319 = vmatpush.bf16.msrb.mxu0 %v5834_v26 }
 0x30b   : > { %3320 = vmatpush.bf16.msrb.mxu0 %v5833_v29 }
 0x30f   : > { %3321 = vmatpush.bf16.msrb.mxu0 %v5832_v25 }
 0x312   : > { %2943 = vmatmul.bf16.gmra.mxu2 %v2669_v62 }
 0x313   : > { %3322 = vmatpush.bf16.msrb.mxu0 %v5831_v6 }
 0x315   : > { %v2881_v13 = vpop.f32.mrf.mxu2 }
 0x316   : > { %v2882_v53 = vadd.f32 %v7651_v39, %v2881_v13  ;;  %v5827_v13 = vld [vmem:[%s8462_s7 + $0x70] sm:$0xff] }
 0x317   : > { %3323 = vmatpush.bf16.msrb.mxu0 %v5830_v16  ;;  %3299 = vmatpush.bf16.msra.mxu3 %v5827_v13 }
 0x31b   : > { %3324 = vmatpush.bf16.msrb.mxu0 %v5829_v57  ;;  %3300 = vmatpush.bf16.msra.mxu3 %v5826_v17  ;;  %v5844_v57 = vld [vmem:[%s8464_s9 + $0x38] sm:$0xff] }
 0x31c   : > { %3593 = vmatpush.bf16.msrb.mxu1 %v5844_v57 }
 0x31d   : > { %v2883_v58 = vpop.f32.mrf.mxu2 }
 0x31e   : > { %v2884_v40 = vadd.f32 %v7651_v39, %v2883_v58 }
 0x322   : > { %2948 = vmatmul.bf16.gmra.mxu2 %v2672_v41 }
 0x328   : > { %v2910_v21 = vpop.f32.mrf.mxu3 }
 0x329   : > { %v2911_v20 = vadd.f32 %v2910_v21, %v2882_v53 }
 0x330   : > { %v2912_v5 = vpop.f32.mrf.mxu3 }
 0x331   : > { %v2913_v18 = vadd.f32 %v2912_v5, %v2884_v40  ;;  %v5825_v5 = vld [vmem:[%s8462_s7 + $0x60] sm:$0xff] }
 0x332   : > { %2953 = vmatmul.bf16.gmra.mxu2 %v2675_v8  ;;  %3301 = vmatpush.bf16.msra.mxu3 %v5825_v5 }
 0x335   : > { %v2886_v24 = vpop.f32.mrf.mxu2 }
 0x336   : > { %v2887_v63 = vadd.f32 %v7651_v39, %v2886_v24 }
 0x33d   : > { %v2888_v59 = vpop.f32.mrf.mxu2 }
 0x33e   : > { %v2889_v10 = vadd.f32 %v7651_v39, %v2888_v59 }
 0x348   : > { %v2915_v32 = vpop.f32.mrf.mxu3 }
 0x349   : > { %v2916_v43 = vadd.f32 %v2915_v32, %v2887_v63 }
 0x350   : > { %v2917_v49 = vpop.f32.mrf.mxu3 }
 0x351   : > { %v2918_v48 = vadd.f32 %v2917_v49, %v2889_v10 }
 0x355   : > { %v7634_v62 = vpop.f32.mrf.mxu2 }
 0x356   : > { %v2892_v7 = vadd.f32 %v7651_v39, %v7634_v62 }
 0x35d   : > { %v7642_v12 = vpop.f32.mrf.mxu2 }
 0x35e   : > { %v2894_v22 = vadd.f32 %v7651_v39, %v7642_v12 }
 0x368   : > { %v2920_v44 = vpop.f32.mrf.mxu3 }
 0x369   : > { %v2921_v54 = vadd.f32 %v2920_v44, %v2892_v7 }
 0x370   : > { %v2922_v46 = vpop.f32.mrf.mxu3 }
 0x371   : > { %v2923_v59 = vadd.f32 %v2922_v46, %v2894_v22  ;;  %v5852_v46 = vld [vmem:[%s8464_s9 + $0x78] sm:$0xff]  ;;  %v5839_v22 = vld [vmem:[%s8464_s9 + $0x10] sm:$0xff] }
 0x372   : > { %3607 = vmatpush.bf16.msra.mxu2 %v5852_v46 }
 0x375   : > { %v7644_v19 = vpop.f32.mrf.mxu2 }
 0x376   : > { %v2897_v53 = vadd.f32 %v7651_v39, %v7644_v19  ;;  %3608 = vmatpush.bf16.msra.mxu2 %v5851_v14 }
 0x378   : > { %v2925_v11 = vpop.f32.mrf.mxu3 }
 0x37d   : > { %v7646_v27 = vpop.f32.mrf.mxu2 }
 0x37e   : > { %v2899_v34 = vadd.f32 %v7651_v39, %v7646_v27  ;;  %v5821_v27 = vld [vmem:[%s8462_s7 + $0x40] sm:$0xff] }
 0x380   : > { %v2927_v25 = vpop.f32.mrf.mxu3 }
 0x381   : > { %v2928_v6 = vadd.f32 %v2927_v25, %v2899_v34 }
 0x385   : > { %v2939_v36 = vpop.f32.mrf.mxu2 }
 0x386   : > { %v2940_v30 = vadd.f32 %v2939_v36, %v2911_v20  ;;  %v5824_v36 = vld [vmem:[%s8462_s7 + $0x58] sm:$0xff] }
 0x387   : > { %3302 = vmatpush.bf16.msra.mxu3 %v5824_v36 }
 0x388   : > { %v2959_v33 = vmax.f32 %v2940_v30, 0.0  ;;  %v2926_v30 = vadd.f32 %v2925_v11, %v2897_v53 }
 0x38a   : > { %2967 = vst [vmem:[%s7671_s30] sm:$0xff] %v2959_v33  ;;  %v2978_v47 = vperm.slane %v2959_v33, %v7443_v23 }
 0x38c   : > { %3015 = vst [vmem:[#allocation1] ss:$2 sm:$0xff] %v2978_v47 }
 0x38d   : > { %v2941_v38 = vpop.f32.mrf.mxu2 }
 0x38e   : > { %v2942_v37 = vadd.f32 %v2941_v38, %v2913_v18 }
 0x390   : > { %v2960_v51 = vmax.f32 %v2942_v37, 0.0 }
 0x392   : > { %2968 = vst [vmem:[%s7671_s30 + $0x8] sm:$0xff] %v2960_v51  ;;  %v2982_v60 = vperm.slane %v2960_v51, %v7443_v23 }
 0x394   : > { %3017 = vst [vmem:[#allocation1 + $0x1] ss:$2 sm:$0xff] %v2982_v60 }
 0x395   : > { %v2944_v0 = vpop.f32.mrf.mxu2 }
 0x396   : > { %v2945_v1 = vadd.f32 %v2944_v0, %v2916_v43 }
 0x398   : > { %v2961_v41 = vmax.f32 %v2945_v1, 0.0 }
 0x39a   : > { %2969 = vst [vmem:[%s7671_s30 + $0x10] sm:$0xff] %v2961_v41  ;;  %v2986_v52 = vperm.slane %v2961_v41, %v7443_v23  ;;  %v5843_v41 = vld [vmem:[%s8464_s9 + $0x30] sm:$0xff] }
 0x39b   : > { %v3030_v4 = vld.sshfl [vmem:[#allocation1 + $0x8] sm:$0xff pattern:$0x75316420]  ;;  %3594 = vmatpush.bf16.msrb.mxu1 %v5843_v41 }
 0x39c   : > { %3046 = vst [vmem:[#allocation1] ss:$2 sm:$0xff] %v2978_v47  ;;  %v3034_v56 = vrot.slane %v3030_v4, 7  ;;  %v5823_v47 = vld [vmem:[%s8462_s7 + $0x50] sm:$0xff]  ;;  %s4465_s7 = scalar_lea.hbm %s8248_s18, %s5934_s2  ;;  %s6032_s2 = scalar_lea.hbm %s8248_s18, 64 }
 0x39d   : > { %3048 = vst [vmem:[#allocation1 + $0x1] ss:$2 sm:$0xff] %v2982_v60  ;;  %v2946_v2 = vpop.f32.mrf.mxu2  ;;  %3303 = vmatpush.bf16.msra.mxu3 %v5823_v47 }
 0x39e   : > { %3019 = vst [vmem:[#allocation1 + $0x10] ss:$2 sm:$0xff] %v2986_v52  ;;  %v2947_v45 = vadd.f32 %v2946_v2, %v2918_v48 }
 0x3a0   : > { %v2962_v35 = vmax.f32 %v2947_v45, 0.0 }
 0x3a1   : > { %3304 = vmatpush.bf16.msra.mxu3 %v5822_v61 }
 0x3a2   : > { %2970 = vst [vmem:[%s7671_s30 + $0x18] sm:$0xff] %v2962_v35  ;;  %v2990_v31 = vperm.slane %v2962_v35, %v7443_v23 }
 0x3a4   : > { %3021 = vst [vmem:[#allocation1 + $0x11] ss:$2 sm:$0xff] %v2990_v31  ;;  %v3062_v50 = vld.sshfl [vmem:[#allocation1 + $0x8] sm:$0xff pattern:$0x75316420] }
 0x3a5   : > { %v2949_v3 = vpop.f32.mrf.mxu2  ;;  %3305 = vmatpush.bf16.msra.mxu3 %v5821_v27  ;;  %v3061_v48 = vld.sshfl [vmem:[#allocation1] sm:$0xff pattern:$0x75316420] }
 0x3a6   : > { %v2950_v8 = vadd.f32 %v2949_v3, %v2921_v54  ;;  %v5841_v54 = vld [vmem:[%s8464_s9 + $0x20] sm:$0xff]  ;;  %v5840_v3 = vld [vmem:[%s8464_s9 + $0x18] sm:$0xff] }
 0x3a8   : > { %v2963_v58 = vmax.f32 %v2950_v8, 0.0 }
 0x3aa   : > { %2971 = vst [vmem:[%s7671_s30 + $0x20] sm:$0xff] %v2963_v58  ;;  %v2994_v24 = vperm.slane %v2963_v58, %v7443_v23  ;;  %v5850_v58 = vld [vmem:[%s8464_s9 + $0x68] sm:$0xff] }
 0x3ab   : > { %v3031_v28 = vld.sshfl [vmem:[#allocation1 + $0x18] sm:$0xff pattern:$0x75316420]  ;;  %3609 = vmatpush.bf16.msra.mxu2 %v5850_v58  ;;  %v5867_v58 = vld [vmem:[%s8466_s11 + $0x30] sm:$0xff] }
 0x3ac   : > { %3023 = vst [vmem:[#allocation1 + $0x20] ss:$2 sm:$0xff] %v2994_v24  ;;  %v3035_v26 = vrot.slane %v3031_v28, 7  ;;  %v5849_v28 = vld [vmem:[%s8464_s9 + $0x60] sm:$0xff] }
 0x3ad   : > { %3050 = vst [vmem:[#allocation1 + $0x10] ss:$2 sm:$0xff] %v2986_v52  ;;  %v2951_v62 = vpop.f32.mrf.mxu2 }
 0x3ae   : > { %3052 = vst [vmem:[#allocation1 + $0x11] ss:$2 sm:$0xff] %v2990_v31  ;;  %v2952_v21 = vadd.f32 %v2951_v62, %v2923_v59  ;;  %v3036_v12 = vsel %vm1252_vm2, %v3034_v56, %v3035_v26  ;;  %v5842_v31 = vld [vmem:[%s8464_s9 + $0x28] sm:$0xff]  ;;  %v5860_v59 = vld [vmem:[%s8464_s9 + $0xb8] sm:$0xff]  ;;  %v6007_v62 = vld [vmem:[%s8465_s8] ss:$0 sm:$0xff] }
 0x3af   : > { %v5286_v20 = vpack.c.bf16 %v3036_v12, %v3034_v56  ;;  %3595 = vmatpush.bf16.msrb.mxu1 %v5842_v31  ;;  %v5838_v56 = vld [vmem:[%s8464_s9 + $0x8] sm:$0xff]  ;;  %3610 = vmatpush.bf16.msra.mxu2 %v5849_v28  ;;  %v5865_v28 = vld [vmem:[%s8466_s11 + $0x20] sm:$0xff]  ;;  %s4514_s8 = sshll.u32 %s714_s23, 4  ;;  %s8096_s8 = int_to_ptr.vmem [resolvable:$true] %s4514_s8 }
 0x3b0   : > { %v2964_v42 = vmax.f32 %v2952_v21, 0.0  ;;  %v5859_v21 = vld [vmem:[%s8464_s9 + $0xb0] sm:$0xff] }
 0x3b1   : > { %5287 = vmatmul.msk.bf16.vlgmr.msrb.gmra.mxu3 %vm7500_vm12, %v5286_v20  ;;  %v5858_v20 = vld [vmem:[%s8464_s9 + $0xa8] sm:$0xff] }
 0x3b2   : > { %2972 = vst [vmem:[%s7671_s30 + $0x28] sm:$0xff] %v2964_v42  ;;  %v2998_v29 = vperm.slane %v2964_v42, %v7443_v23  ;;  %3621 = vmatpush.bf16.msrb.mxu3 %v5860_v59  ;;  %v5847_v42 = vld [vmem:[%s8464_s9 + $0x50] sm:$0xff] }
 0x3b3   : > { %3596 = vmatpush.bf16.msrb.mxu1 %v5841_v54  ;;  %v5883_v59 = vld [vmem:[%s8466_s11 + $0xb0] sm:$0xff] }
 0x3b4   : > { %3025 = vst [vmem:[#allocation1 + $0x21] ss:$2 sm:$0xff] %v2998_v29 }
 0x3b5   : > { %v2954_v33 = vpop.f32.mrf.mxu2  ;;  %v3064_v32 = vld.sshfl [vmem:[#allocation1 + $0x18] sm:$0xff pattern:$0x75316420]  ;;  %v3063_v4 = vld.sshfl [vmem:[#allocation1 + $0x10] sm:$0xff pattern:$0x75316420] }
 0x3b6   : > { %v2955_v19 = vadd.f32 %v2954_v33, %v2926_v30  ;;  %v3079_v40 = vpack.c.bf16 %v3064_v32, %v3062_v50  ;;  %v3078_v2 = vpack.c.bf16 %v3063_v4, %v3061_v48  ;;  %3622 = vmatpush.bf16.msrb.mxu3 %v5859_v21  ;;  %v5857_v30 = vld [vmem:[%s8464_s9 + $0xa0] sm:$0xff]  ;;  %v5846_v50 = vld [vmem:[%s8464_s9 + $0x48] sm:$0xff] }
 0x3b7   : > { %3597 = vmatpush.bf16.msrb.mxu1 %v5840_v3  ;;  %v5873_v21 = vld [vmem:[%s8466_s11 + $0x60] sm:$0xff] }
 0x3b8   : > { %v2965_v18 = vmax.f32 %v2955_v19, 0.0  ;;  %3325 = vmatmul.bf16.vlgmr.msrb.gmra.mxu0 %v3079_v40  ;;  %v5856_v40 = vld [vmem:[%s8464_s9 + $0x98] sm:$0xff] }
 0x3ba   : > { %2973 = vst [vmem:[%s7671_s30 + $0x30] sm:$0xff] %v2965_v18  ;;  %v3002_v38 = vperm.slane %v2965_v18, %v7443_v23  ;;  %3623 = vmatpush.bf16.msrb.mxu3 %v5858_v20  ;;  %v5845_v18 = vld [vmem:[%s8464_s9 + $0x40] sm:$0xff] }
 0x3bb   : > { %v3032_v37 = vld.sshfl [vmem:[#allocation1 + $0x28] sm:$0xff pattern:$0x75316420]  ;;  %3598 = vmatpush.bf16.msrb.mxu1 %v5839_v22  ;;  %v5884_v22 = vld [vmem:[%s8466_s11 + $0xb8] sm:$0xff] }
 0x3bc   : > { %3027 = vst [vmem:[#allocation1 + $0x30] ss:$2 sm:$0xff] %v3002_v38  ;;  %v3037_v49 = vrot.slane %v3032_v37, 7  ;;  %v5855_v37 = vld [vmem:[%s8464_s9 + $0x90] sm:$0xff] }
 0x3bd   : > { %v2956_v51 = vpop.f32.mrf.mxu2  ;;  %3054 = vst [vmem:[#allocation1 + $0x20] ss:$2 sm:$0xff] %v2994_v24 }
 0x3be   : > { %v2957_v63 = vadd.f32 %v2956_v51, %v2928_v6  ;;  %3056 = vst [vmem:[#allocation1 + $0x21] ss:$2 sm:$0xff] %v2998_v29  ;;  %v3038_v16 = vsel %vm1252_vm2, %v3035_v26, %v3037_v49  ;;  %v5848_v26 = vld [vmem:[%s8464_s9 + $0x58] sm:$0xff]  ;;  %v5837_v29 = vld [vmem:[%s8464_s9] sm:$0xff]  ;;  %3624 = vmatpush.bf16.msrb.mxu3 %v5857_v30 }
 0x3bf   : > { %3599 = vmatpush.bf16.msrb.mxu1 %v5838_v56  ;;  %3611 = vmatpush.bf16.msra.mxu2 %v5848_v26  ;;  %v5882_v56 = vld [vmem:[%s8466_s11 + $0xa8] sm:$0xff]  ;;  %v5864_v26 = vld [vmem:[%s8466_s11 + $0x18] sm:$0xff]  ;;  %v6008_v30 = vld [vmem:[%s8467_s10] ss:$0 sm:$0xff]  ;;  %s4468_s10 = sshll.u32 %s4465_s7, 4  ;;  %s4469_s10 = int_to_ptr.hbm [resolvable:$true] %s4468_s10 }
 0x3c0   : > { %v2966_v39 = vmax.f32 %v2957_v63, 0.0  ;;  %v5854_v63 = vld [vmem:[%s8464_s9 + $0x88] sm:$0xff] }
 0x3c2   : > { %2974 = vst [vmem:[%s7671_s30 + $0x38] sm:$0xff] %v2966_v39  ;;  %v3006_v60 = vperm.slane %v2966_v39, %v7443_v23  ;;  %3625 = vmatpush.bf16.msrb.mxu3 %v5856_v40 }
 0x3c3   : > { %3612 = vmatpush.bf16.msra.mxu2 %v5847_v42  ;;  %3600 = vmatpush.bf16.msrb.mxu1 %v5837_v29  ;;  %v5862_v42 = vld [vmem:[%s8466_s11 + $0x8] sm:$0xff]  ;;  %v5871_v29 = vld [vmem:[%s8466_s11 + $0x50] sm:$0xff] }
 0x3c4   : > { %3029 = vst [vmem:[#allocation1 + $0x31] ss:$2 sm:$0xff] %v3006_v60 }
 0x3c5   : > { %v3066_v10 = vld.sshfl [vmem:[#allocation1 + $0x28] sm:$0xff pattern:$0x75316420]  ;;  %v3065_v35 = vld.sshfl [vmem:[#allocation1 + $0x20] sm:$0xff pattern:$0x75316420] }
 0x3c6   : > { %3626 = vmatpush.bf16.msrb.mxu3 %v5855_v37 }
 0x3c7   : > { %3613 = vmatpush.bf16.msra.mxu2 %v5846_v50  ;;  %3875 = vmatpush.bf16.msra.mxu1 %v5876_v15  ;;  %v5861_v50 = vld [vmem:[%s8466_s11] sm:$0xff]  ;;  %v5886_v15 = vld [vmem:[%s8470_s13 + $0x8] sm:$0xff] }
 0x3ca   : > { %3627 = vmatpush.bf16.msrb.mxu3 %v5854_v63 }
 0x3cb   : > { %v3033_v9 = vld.sshfl [vmem:[#allocation1 + $0x38] sm:$0xff pattern:$0x75316420]  ;;  %3614 = vmatpush.bf16.msra.mxu2 %v5845_v18  ;;  %v5869_v18 = vld [vmem:[%s8466_s11 + $0x40] sm:$0xff] }
 0x3cc   : > { %v3039_v43 = vrot.slane %v3033_v9, 7  ;;  %3058 = vst [vmem:[#allocation1 + $0x30] ss:$2 sm:$0xff] %v3002_v38  ;;  %v5853_v9 = vld [vmem:[%s8464_s9 + $0x80] sm:$0xff] }
 0x3cd   : > { %3060 = vst [vmem:[#allocation1 + $0x31] ss:$2 sm:$0xff] %v3006_v60 }
 0x3ce   : > { %v3040_v0 = vsel %vm1252_vm2, %v3037_v49, %v3039_v43  ;;  %3628 = vmatpush.bf16.msrb.mxu3 %v5853_v9 }
 0x3cf   : > { %v3080_v1 = vpack.c.bf16 %v3040_v0, %v3038_v16  ;;  %3888 = vmatpush.bf16.msrb.mxu2 %v5884_v22  ;;  %v5895_v22 = vld [vmem:[%s8470_s13 + $0x50] sm:$0xff] }
 0x3d1   : > { %3292 = vmatmul.bf16.gmra.mxu3 %v3080_v1 }
 0x3d3   : > { %3889 = vmatpush.bf16.msrb.mxu2 %v5883_v59 }
 0x3d4   : > { %v3068_v52 = vld.sshfl [vmem:[#allocation1 + $0x38] sm:$0xff pattern:$0x75316420]  ;;  %v3067_v45 = vld.sshfl [vmem:[#allocation1 + $0x30] sm:$0xff pattern:$0x75316420] }
 0x3d5   : > { %v3082_v44 = vpack.c.bf16 %v3068_v52, %v3066_v10  ;;  %v3081_v7 = vpack.c.bf16 %v3067_v45, %v3065_v35 }
 0x3d7   : > { %3330 = vmatmul.bf16.gmra.mxu0 %v3082_v44  ;;  %3890 = vmatpush.bf16.msrb.mxu2 %v5882_v56  ;;  %v5893_v56 = vld [vmem:[%s8470_s13 + $0x40] sm:$0xff] }
 0x3e1   : > { %3306 = vmatmul.bf16.vlgmr.msra.gmra.mxu3 %v3078_v2 }
 0x3e2   : > { %4117 = vmatpush.bf16.msra.mxu3 %v5892_v55  ;;  %v5909_v55 = vld [vmem:[%s8472_s15] sm:$0xff] }
 0x3f1   : > { %3311 = vmatmul.bf16.gmra.mxu3 %v3081_v7 }
 0x434   : > { %v3288_v8 = vpop.f32.mrf.mxu3 }
 0x435   : > { %v3326_v11 = vpop.f32.mrf.mxu0  ;;  %v3289_v12 = vadd.f32 %v6007_v62, %v3288_v8 }
 0x43c   : > { %v3290_v13 = vpop.f32.mrf.mxu3 }
 0x43d   : > { %v3291_v32 = vadd.f32 %v6007_v62, %v3290_v13  ;;  %v3328_v47 = vpop.f32.mrf.mxu0  ;;  %v5868_v13 = vld [vmem:[%s8466_s11 + $0x38] sm:$0xff] }
 0x43e   : > { %3862 = vmatpush.bf16.msra.mxu0 %v5868_v13  ;;  %v5896_v13 = vld [vmem:[%s8470_s13 + $0x58] sm:$0xff] }
 0x442   : > { %3863 = vmatpush.bf16.msra.mxu0 %v5867_v58  ;;  %v5904_v58 = vld [vmem:[%s8470_s13 + $0x98] sm:$0xff] }
 0x454   : > { %v3293_v24 = vpop.f32.mrf.mxu3  ;;  %v3331_v27 = vpop.f32.mrf.mxu0 }
 0x455   : > { %v3294_v6 = vadd.f32 %v6007_v62, %v3293_v24  ;;  %v5866_v24 = vld [vmem:[%s8466_s11 + $0x28] sm:$0xff] }
 0x456   : > { %3864 = vmatpush.bf16.msra.mxu0 %v5866_v24  ;;  %v5903_v24 = vld [vmem:[%s8470_s13 + $0x90] sm:$0xff] }
 0x45a   : > { %3865 = vmatpush.bf16.msra.mxu0 %v5865_v28  ;;  %v5894_v28 = vld [vmem:[%s8470_s13 + $0x48] sm:$0xff] }
 0x45c   : > { %v3295_v17 = vpop.f32.mrf.mxu3  ;;  %v3333_v10 = vpop.f32.mrf.mxu0 }
 0x45d   : > { %v3296_v16 = vadd.f32 %v6007_v62, %v3295_v17  ;;  %v5875_v17 = vld [vmem:[%s8466_s11 + $0x70] sm:$0xff]  ;;  %v5874_v62 = vld [vmem:[%s8466_s11 + $0x68] sm:$0xff] }
 0x45e   : > { %3876 = vmatpush.bf16.msra.mxu1 %v5875_v17  ;;  %3866 = vmatpush.bf16.msra.mxu0 %v5864_v26  ;;  %v5885_v17 = vld [vmem:[%s8470_s13] sm:$0xff] }
 0x45f   : > { %v5901_v26 = vld [vmem:[%s8470_s13 + $0x80] sm:$0xff] }
 0x462   : > { %3877 = vmatpush.bf16.msra.mxu1 %v5874_v62  ;;  %v5902_v62 = vld [vmem:[%s8470_s13 + $0x88] sm:$0xff] }
 0x464   : > { %v3307_v5 = vpop.f32.mrf.mxu3 }
 0x465   : > { %v3308_v53 = vadd.f32 %v3307_v5, %v3289_v12  ;;  %v5863_v12 = vld [vmem:[%s8466_s11 + $0x10] sm:$0xff]  ;;  %v5872_v5 = vld [vmem:[%s8466_s11 + $0x58] sm:$0xff] }
 0x466   : > { %3878 = vmatpush.bf16.msra.mxu1 %v5873_v21  ;;  %3867 = vmatpush.bf16.msra.mxu0 %v5863_v12  ;;  %v6009_v21 = vld [vmem:[%s8471_s12] ss:$0 sm:$0xff]  ;;  %v5924_v12 = vld [vmem:[%s8472_s15 + $0x78] sm:$0xff] }
 0x467   : > { %v3327_v36 = vadd.f32 %v3326_v11, %v3308_v53  ;;  %v5881_v11 = vld [vmem:[%s8466_s11 + $0xa0] sm:$0xff]  ;;  %v5880_v53 = vld [vmem:[%s8466_s11 + $0x98] sm:$0xff] }
 0x468   : > { %3891 = vmatpush.bf16.msrb.mxu2 %v5881_v11  ;;  %v5916_v11 = vld [vmem:[%s8472_s15 + $0x38] sm:$0xff] }
 0x469   : > { %v3336_v33 = vmax.f32 %v3327_v36, 0.0  ;;  %v5879_v36 = vld [vmem:[%s8466_s11 + $0x90] sm:$0xff] }
 0x46a   : > { %3879 = vmatpush.bf16.msra.mxu1 %v5872_v5  ;;  %3868 = vmatpush.bf16.msra.mxu0 %v5862_v42 }
 0x46b   : > { %3340 = vst [vmem:[%s7810_s3] sm:$0xff] %v3336_v33  ;;  %v3347_v19 = vperm.slane %v3336_v33, %v7443_v23  ;;  %v5870_v33 = vld [vmem:[%s8466_s11 + $0x48] sm:$0xff] }
 0x46c   : > { %v3309_v34 = vpop.f32.mrf.mxu3  ;;  %3892 = vmatpush.bf16.msrb.mxu2 %v5880_v53  ;;  %v5932_v53 = vld [vmem:[%s8472_s15 + $0xb8] sm:$0xff] }
 0x46d   : > { %3364 = vst [vmem:[#allocation1] ss:$2 sm:$0xff] %v3347_v19  ;;  %v3310_v25 = vadd.f32 %v3309_v34, %v3291_v32  ;;  %v5878_v32 = vld [vmem:[%s8466_s11 + $0x88] sm:$0xff] }
 0x46e   : > { %3880 = vmatpush.bf16.msra.mxu1 %v5871_v29  ;;  %3869 = vmatpush.bf16.msra.mxu0 %v5861_v50  ;;  %v5923_v29 = vld [vmem:[%s8472_s15 + $0x70] sm:$0xff] }
 0x46f   : > { %v3329_v38 = vadd.f32 %v3328_v47, %v3310_v25  ;;  %v5877_v25 = vld [vmem:[%s8466_s11 + $0x80] sm:$0xff] }
 0x470   : > { %3893 = vmatpush.bf16.msrb.mxu2 %v5879_v36 }
 0x471   : > { %v3337_v61 = vmax.f32 %v3329_v38, 0.0 }
 0x472   : > { %3881 = vmatpush.bf16.msra.mxu1 %v5870_v33 }
 0x473   : > { %3341 = vst [vmem:[%s7810_s3 + $0x8] sm:$0xff] %v3337_v61  ;;  %v3351_v51 = vperm.slane %v3337_v61, %v7443_v23 }
 0x474   : > { %v3312_v39 = vpop.f32.mrf.mxu3  ;;  %3894 = vmatpush.bf16.msrb.mxu2 %v5878_v32  ;;  %v5914_v32 = vld [vmem:[%s8472_s15 + $0x28] sm:$0xff] }
 0x475   : > { %3366 = vst [vmem:[#allocation1 + $0x1] ss:$2 sm:$0xff] %v3351_v51  ;;  %v3313_v60 = vadd.f32 %v3312_v39, %v3294_v6 }
 0x476   : > { %3882 = vmatpush.bf16.msra.mxu1 %v5869_v18 }
 0x477   : > { %v3332_v49 = vadd.f32 %v3331_v27, %v3313_v60 }
 0x478   : > { %3895 = vmatpush.bf16.msrb.mxu2 %v5877_v25  ;;  %v5913_v25 = vld [vmem:[%s8472_s15 + $0x20] sm:$0xff] }
 0x479   : > { %v3338_v43 = vmax.f32 %v3332_v49, 0.0 }
 0x47b   : > { %3342 = vst [vmem:[%s7810_s3 + $0x10] sm:$0xff] %v3338_v43  ;;  %v3355_v0 = vperm.slane %v3338_v43, %v7443_v23 }
 0x47c   : > { %v3371_v1 = vld.sshfl [vmem:[#allocation1 + $0x8] sm:$0xff pattern:$0x75316420]  ;;  %v3314_v57 = vpop.f32.mrf.mxu3 }
 0x47d   : > { %3381 = vst [vmem:[#allocation1 + $0x1] ss:$2 sm:$0xff] %v3351_v51  ;;  %v3315_v41 = vadd.f32 %v3314_v57, %v3296_v16  ;;  %v3373_v2 = vrot.slane %v3371_v1, 7 }
 0x47e   : > { %3379 = vst [vmem:[#allocation1] ss:$2 sm:$0xff] %v3347_v19 }
 0x47f   : > { %3368 = vst [vmem:[#allocation1 + $0x10] ss:$2 sm:$0xff] %v3355_v0  ;;  %v3334_v52 = vadd.f32 %v3333_v10, %v3315_v41 }
 0x481   : > { %v3339_v44 = vmax.f32 %v3334_v52, 0.0 }
 0x483   : > { %3343 = vst [vmem:[%s7810_s3 + $0x18] sm:$0xff] %v3339_v44  ;;  %v3359_v4 = vperm.slane %v3339_v44, %v7443_v23  ;;  %v5891_v44 = vld [vmem:[%s8470_s13 + $0x30] sm:$0xff]  ;;  %s4498_s3 = scalar_lea.hbm %s8250_s20, %s5703_s1 }
 0x484   : > { %4118 = vmatpush.bf16.msra.mxu3 %v5891_v44  ;;  %v5918_v44 = vld [vmem:[%s8472_s15 + $0x48] sm:$0xff] }
 0x485   : > { %3370 = vst [vmem:[#allocation1 + $0x11] ss:$2 sm:$0xff] %v3359_v4  ;;  %v3386_v31 = vld.sshfl [vmem:[#allocation1] sm:$0xff pattern:$0x75316420] }
 0x486   : > { %v3387_v54 = vld.sshfl [vmem:[#allocation1 + $0x8] sm:$0xff pattern:$0x75316420] }
 0x48c   : > { %v3372_v48 = vld.sshfl [vmem:[#allocation1 + $0x18] sm:$0xff pattern:$0x75316420] }
 0x48d   : > { %v3374_v45 = vrot.slane %v3372_v48, 7  ;;  %3383 = vst [vmem:[#allocation1 + $0x10] ss:$2 sm:$0xff] %v3355_v0  ;;  %v5908_v48 = vld [vmem:[%s8470_s13 + $0xb8] sm:$0xff] }
 0x48e   : > { %3385 = vst [vmem:[#allocation1 + $0x11] ss:$2 sm:$0xff] %v3359_v4  ;;  %v5900_v4 = vld [vmem:[%s8470_s13 + $0x78] sm:$0xff] }
 0x48f   : > { %v3375_v35 = vsel %vm1252_vm2, %v3373_v2, %v3374_v45  ;;  %4130 = vmatpush.bf16.msrb.mxu0 %v5900_v4  ;;  %v5899_v45 = vld [vmem:[%s8470_s13 + $0x70] sm:$0xff]  ;;  %v5926_v4 = vld [vmem:[%s8472_s15 + $0x88] sm:$0xff] }
 0x490   : > { %v5386_v7 = vpack.c.bf16 %v3375_v35, %v3373_v2  ;;  %v5890_v2 = vld [vmem:[%s8470_s13 + $0x28] sm:$0xff]  ;;  %v5907_v35 = vld [vmem:[%s8470_s13 + $0xb0] sm:$0xff] }
 0x491   : > { %4119 = vmatpush.bf16.msra.mxu3 %v5890_v2  ;;  %v5925_v2 = vld [vmem:[%s8472_s15 + $0x80] sm:$0xff] }
 0x492   : > { %5387 = vmatmul.msk.bf16.vlgmr.msrb.gmra.mxu1 %vm7500_vm12, %v5386_v7  ;;  %v5889_v7 = vld [vmem:[%s8470_s13 + $0x20] sm:$0xff] }
 0x493   : > { %4143 = vmatpush.bf16.msrb.mxu1 %v5908_v48  ;;  %4131 = vmatpush.bf16.msrb.mxu0 %v5899_v45  ;;  %v5917_v48 = vld [vmem:[%s8472_s15 + $0x40] sm:$0xff] }
 0x494   : > { %v6010_v45 = vld [vmem:[%s8473_s14] ss:$0 sm:$0xff] }
 0x495   : > { %v3388_v46 = vld.sshfl [vmem:[#allocation1 + $0x10] sm:$0xff pattern:$0x75316420]  ;;  %v3389_v3 = vld.sshfl [vmem:[#allocation1 + $0x18] sm:$0xff pattern:$0x75316420]  ;;  %4120 = vmatpush.bf16.msra.mxu3 %v5889_v7 }
 0x496   : > { %v3395_v14 = vpack.c.bf16 %v3388_v46, %v3386_v31  ;;  %v3396_v8 = vpack.c.bf16 %v3389_v3, %v3387_v54  ;;  %v5898_v31 = vld [vmem:[%s8470_s13 + $0x68] sm:$0xff]  ;;  %v5888_v46 = vld [vmem:[%s8470_s13 + $0x18] sm:$0xff]  ;;  %v5897_v3 = vld [vmem:[%s8470_s13 + $0x60] sm:$0xff] }
 0x497   : > { %4144 = vmatpush.bf16.msrb.mxu1 %v5907_v35  ;;  %v5906_v54 = vld [vmem:[%s8470_s13 + $0xa8] sm:$0xff]  ;;  %4132 = vmatpush.bf16.msrb.mxu0 %v5898_v31 }
 0x498   : > { %3615 = vmatmul.bf16.vlgmr.msra.gmra.mxu2 %v3395_v14  ;;  %3629 = vmatmul.bf16.vlgmr.msrb.gmra.mxu3 %v3396_v8  ;;  %v5905_v14 = vld [vmem:[%s8470_s13 + $0xa0] sm:$0xff]  ;;  %v5887_v8 = vld [vmem:[%s8470_s13 + $0x10] sm:$0xff]  ;;  %s6026_s13 = sshra.s32 %s4469_s10, 4  ;;  %s6027_s13 = int_to_ptr.hbm [resolvable:$true] %s6026_s13 }
 0x499   : > { %4121 = vmatpush.bf16.msra.mxu3 %v5888_v46  ;;  %4370 = vmatpush.bf16.msra.mxu2 %v5916_v11  ;;  %s6028_s14 = scalar_lea.hbm %s6027_s13, 32  ;;  %p6033_p0 = scmp.lt.s32.totalorder %s6027_s13, %s8248_s18 }
 0x49a   : > { %p6029_p11 = scmp.ne.s32.totalorder %s6027_s13, %s6028_s14  ;;  %p6034_p1 = scmp.lt.s32.totalorder %s6032_s2, %s6028_s14 }
 0x49b   : > { %4145 = vmatpush.bf16.msrb.mxu1 %v5906_v54  ;;  %4133 = vmatpush.bf16.msrb.mxu0 %v5897_v3 }
 0x49c   : > { %p6030_p12 = pnand %p6029_p11, %p6387_p5  ;;  %p6035_p2 = por %p6034_p1, %p6033_p0 }
 0x49d   : > { %4122 = vmatpush.bf16.msra.mxu3 %v5887_v8 }
 0x49e   : > { %p6031_p13 = pneg %p6030_p12 }
 0x49f   : > { %4146 = vmatpush.bf16.msrb.mxu1 %v5905_v14  ;;  %4134 = vmatpush.bf16.msrb.mxu0 %v5896_v13 }
 0x4a0   : > { %p6036_p3 = pnand %p6035_p2, %p6031_p13 }
 0x4a1   : > { %4123 = vmatpush.bf16.msra.mxu3 %v5886_v15 }
 0x4a3   : > { %4147 = vmatpush.bf16.msrb.mxu1 %v5904_v58  ;;  %4135 = vmatpush.bf16.msrb.mxu0 %v5895_v22 }
 0x4a5   : > { %4124 = vmatpush.bf16.msra.mxu3 %v5885_v17 }
 0x4a7   : > { %4148 = vmatpush.bf16.msrb.mxu1 %v5903_v24  ;;  %4136 = vmatpush.bf16.msrb.mxu0 %v5894_v28 }
 0x4a9   : > { %4383 = vmatpush.bf16.msrb.mxu3 %v5924_v12 }
 0x4ab   : > { %4149 = vmatpush.bf16.msrb.mxu1 %v5902_v62  ;;  %4137 = vmatpush.bf16.msrb.mxu0 %v5893_v56 }
 0x4ad   : > { %4384 = vmatpush.bf16.msrb.mxu3 %v5923_v29 }
 0x4af   : > { %4150 = vmatpush.bf16.msrb.mxu1 %v5901_v26 }
 0x50f   : > { %v3602_v20 = vpop.f32.mrf.mxu1 }
 0x510   : > { %v3603_v19 = vadd.f32 %v6008_v30, %v3602_v20  ;;  %v5915_v20 = vld [vmem:[%s8472_s15 + $0x30] sm:$0xff] }
 0x511   : > { %4371 = vmatpush.bf16.msra.mxu2 %v5915_v20 }
 0x515   : > { %4372 = vmatpush.bf16.msra.mxu2 %v5914_v32 }
 0x517   : > { %v3604_v37 = vpop.f32.mrf.mxu1 }
 0x518   : > { %v3605_v6 = vadd.f32 %v6008_v30, %v3604_v37  ;;  %v5931_v30 = vld [vmem:[%s8472_s15 + $0xb0] sm:$0xff] }
 0x519   : > { %4373 = vmatpush.bf16.msra.mxu2 %v5913_v25 }
 0x51b   : > { %v3616_v40 = vpop.f32.mrf.mxu2  ;;  %v3630_v47 = vpop.f32.mrf.mxu3 }
 0x51c   : > { %v3617_v34 = vadd.f32 %v3616_v40, %v3603_v19  ;;  %v5922_v19 = vld [vmem:[%s8472_s15 + $0x68] sm:$0xff] }
 0x51d   : > { %4385 = vmatpush.bf16.msrb.mxu3 %v5922_v19 }
 0x51e   : > { %v3631_v38 = vadd.f32 %v3630_v47, %v3617_v34  ;;  %v5930_v47 = vld [vmem:[%s8472_s15 + $0xa8] sm:$0xff] }
 0x520   : > { %v3635_v61 = vmax.f32 %v3631_v38, 0.0 }
 0x522   : > { %3637 = vst [vmem:[%s7914_s24] sm:$0xff] %v3635_v61  ;;  %v3642_v51 = vperm.slane %v3635_v61, %v7443_v23 }
 0x523   : > { %v3618_v63 = vpop.f32.mrf.mxu2  ;;  %v3632_v39 = vpop.f32.mrf.mxu3 }
 0x524   : > { %3649 = vst [vmem:[#allocation1] ss:$2 sm:$0xff] %v3642_v51  ;;  %v3619_v27 = vadd.f32 %v3618_v63, %v3605_v6 }
 0x526   : > { %v3633_v60 = vadd.f32 %v3632_v39, %v3619_v27 }
 0x528   : > { %v3636_v49 = vmax.f32 %v3633_v60, 0.0 }
 0x52a   : > { %3638 = vst [vmem:[%s7914_s24 + $0x8] sm:$0xff] %v3636_v49  ;;  %v3646_v9 = vperm.slane %v3636_v49, %v7443_v23  ;;  %v5912_v49 = vld [vmem:[%s8472_s15 + $0x18] sm:$0xff]  ;;  %s4500_s24 = sshll.u32 %s8035_s22, 4  ;;  %s4501_s24 = int_to_ptr.vmem [resolvable:$true] %s4500_s24 }
 0x52b   : > { %4374 = vmatpush.bf16.msra.mxu2 %v5912_v49 }
 0x52c   : > { %3651 = vst [vmem:[#allocation1 + $0x1] ss:$2 sm:$0xff] %v3646_v9 }
 0x533   : > { %v3652_v43 = vld.sshfl [vmem:[#allocation1 + $0x8] sm:$0xff pattern:$0x75316420] }
 0x534   : > { %v3653_v16 = vrot.slane %v3652_v43, 7  ;;  %3656 = vst [vmem:[#allocation1] ss:$2 sm:$0xff] %v3642_v51  ;;  %v5929_v43 = vld [vmem:[%s8472_s15 + $0xa0] sm:$0xff] }
 0x535   : > { %3658 = vst [vmem:[#allocation1 + $0x1] ss:$2 sm:$0xff] %v3646_v9  ;;  %v5921_v9 = vld [vmem:[%s8472_s15 + $0x60] sm:$0xff] }
 0x536   : > { %v5487_v1 = vpack.c.bf16 %v3653_v16, %v3653_v16  ;;  %4386 = vmatpush.bf16.msrb.mxu3 %v5921_v9  ;;  %v5911_v16 = vld [vmem:[%s8472_s15 + $0x10] sm:$0xff] }
 0x537   : > { %4375 = vmatpush.bf16.msra.mxu2 %v5911_v16 }
 0x538   : > { %5488 = vmatmul.msk.bf16.vlgmr.msra.gmra.mxu0 %vm7923_vm13, %v5487_v1  ;;  %v5920_v1 = vld [vmem:[%s8472_s15 + $0x58] sm:$0xff] }
 0x539   : > { %4396 = vmatpush.bf16.msra.mxu0 %v5932_v53 }
 0x53a   : > { %4387 = vmatpush.bf16.msrb.mxu3 %v5920_v1 }
 0x53c   : > { %v3659_v57 = vld.sshfl [vmem:[#allocation1] sm:$0xff pattern:$0x75316420]  ;;  %v3660_v41 = vld.sshfl [vmem:[#allocation1 + $0x8] sm:$0xff pattern:$0x75316420] }
 0x53d   : > { %v3664_v10 = vpack.c.bf16 %v3659_v57, %v3659_v57  ;;  %v3665_v52 = vpack.c.bf16 %v3660_v41, %v3660_v41  ;;  %4397 = vmatpush.bf16.msra.mxu0 %v5931_v30  ;;  %v5928_v57 = vld [vmem:[%s8472_s15 + $0x98] sm:$0xff]  ;;  %v5910_v41 = vld [vmem:[%s8472_s15 + $0x8] sm:$0xff] }
 0x53e   : > { %4376 = vmatpush.bf16.msra.mxu2 %v5910_v41 }
 0x53f   : > { %3883 = vmatmul.bf16.vlgmr.msra.gmra.mxu1 %v3664_v10  ;;  %3896 = vmatmul.bf16.vlgmr.msrb.gmra.mxu2 %v3665_v52  ;;  %v5919_v10 = vld [vmem:[%s8472_s15 + $0x50] sm:$0xff] }
 0x540   : > { %v5927_v52 = vld [vmem:[%s8472_s15 + $0x90] sm:$0xff]  ;;  %4388 = vmatpush.bf16.msrb.mxu3 %v5919_v10 }
 0x541   : > { %4398 = vmatpush.bf16.msra.mxu0 %v5930_v47 }
 0x542   : > { %4377 = vmatpush.bf16.msra.mxu2 %v5909_v55 }
 0x544   : > { %4389 = vmatpush.bf16.msrb.mxu3 %v5918_v44 }
 0x545   : > { %4399 = vmatpush.bf16.msra.mxu0 %v5929_v43 }
 0x548   : > { %4390 = vmatpush.bf16.msrb.mxu3 %v5917_v48 }
 0x549   : > { %4400 = vmatpush.bf16.msra.mxu0 %v5928_v57 }
 0x54d   : > { %4401 = vmatpush.bf16.msra.mxu0 %v5927_v52 }
 0x551   : > { %4402 = vmatpush.bf16.msra.mxu0 %v5926_v4 }
 0x555   : > { %4403 = vmatpush.bf16.msra.mxu0 %v5925_v2 }
 0x5b5   : > { %v3871_v59 = vpop.f32.mrf.mxu0 }
 0x5b6   : > { %v3872_v36 = vadd.f32 %v6009_v21, %v3871_v59 }
 0x5bc   : > { %v3884_v5 = vpop.f32.mrf.mxu1 }
 0x5bd   : > { %v3873_v42 = vpop.f32.mrf.mxu0  ;;  %v3885_v50 = vadd.f32 %v3884_v5, %v3872_v36 }
 0x5c2   : > { %v3897_v33 = vpop.f32.mrf.mxu2 }
 0x5c3   : > { %v3898_v40 = vadd.f32 %v3897_v33, %v3885_v50 }
 0x5c4   : > { %v3886_v34 = vpop.f32.mrf.mxu1 }
 0x5c5   : > { %v3901_v18 = vmax.f32 %v3898_v40, 0.0 }
 0x5c7   : > { %3902 = vst [vmem:[%s8035_s22] sm:$0xff] %v3901_v18  ;;  %v3906_v38 = vperm.slane %v3901_v18, %v7443_v23 }
 0x5c9   : > { %3908 = vst [vmem:[#allocation1] ss:$2 sm:$0xff] %v3906_v38 }
 0x5ca   : > { %v3899_v37 = vpop.f32.mrf.mxu2 }
 0x5d0   : > { %v3909_v61 = vld.sshfl [vmem:[#allocation1 + $0x8] sm:$0xff pattern:$0x75316420] }
 0x5d1   : > { %v3910_v6 = vrot.slane %v3909_v61, 7  ;;  %3913 = vst [vmem:[#allocation1] ss:$2 sm:$0xff] %v3906_v38 }
 0x5d3   : > { %v5588_v51 = vpack.c.bf16 %v3910_v6, %v3910_v6 }
 0x5d5   : > { %5589 = vmatmul.msk.bf16.vlgmr.msra.gmra.mxu3 %vm7923_vm13, %v5588_v51 }
 0x5d8   : > { %v3914_v63 = vld.sshfl [vmem:[#allocation1] sm:$0xff pattern:$0x75316420]  ;;  %v3915_v27 = vld.sshfl [vmem:[#allocation1 + $0x8] sm:$0xff pattern:$0x75316420] }
 0x5d9   : > { %v3919_v39 = vpack.c.bf16 %v3914_v63, %v3914_v63  ;;  %v3920_v60 = vpack.c.bf16 %v3915_v27, %v3915_v27 }
 0x5db   : > { %4138 = vmatmul.bf16.vlgmr.msrb.gmra.mxu0 %v3919_v39  ;;  %4151 = vmatmul.bf16.vlgmr.msrb.gmra.mxu1 %v3920_v60 }
 0x658   : > { %v4126_v35 = vpop.f32.mrf.mxu3  ;;  %v4139_v7 = vpop.f32.mrf.mxu0 }
 0x659   : > { %v4127_v31 = vadd.f32 %v6010_v45, %v4126_v35  ;;  %v4152_v54 = vpop.f32.mrf.mxu1 }
 0x65b   : > { %v4140_v46 = vadd.f32 %v4139_v7, %v4127_v31 }
 0x65d   : > { %v4153_v3 = vadd.f32 %v4152_v54, %v4140_v46 }
 0x65f   : > { %v4156_v14 = vmax.f32 %v4153_v3, 0.0 }
 0x660   : > { %v4128_v8 = vpop.f32.mrf.mxu3  ;;  %v4141_v13 = vpop.f32.mrf.mxu0 }
 0x661   : > { %4157 = vst [vmem:[%s714_s23] sm:$0xf] %v4156_v14  ;;  %v4161_v58 = vperm.slane %v4156_v14, %v7443_v23  ;;  %v4154_v15 = vpop.f32.mrf.mxu1  ;;  %s8108_s23 = scalar_lea.sflag [#allocation5], %s4416_s25 }
 0x663   : > { %v4163_v22 = vperm.slane %v4161_v58, 4  ;;  %4166 = vst [vmem:[#allocation1] ss:$2 sm:$0xff] %v4161_v58 }
 0x665   : > { %v5689_v24 = vpack.c.bf16 %v4163_v22, %v4163_v22 }
 0x667   : > { %5690 = vmatmul.msk.bf16.vlgmr.msra.gmra.mxu2 %vm7923_vm13, %v5689_v24 }
 0x66a   : > { %v4167_v17 = vld.sshfl [vmem:[#allocation1] sm:$0xff pattern:$0x75316420]  ;;  %v4168_v59 = vld.sshfl [vmem:[#allocation1 + $0x8] sm:$0xff pattern:$0x75316420] }
 0x66b   : > { %v4172_v28 = vpack.c.bf16 %v4167_v17, %v4167_v17  ;;  %v4173_v62 = vpack.c.bf16 %v4168_v59, %v4168_v59 }
 0x66d   : > { %4391 = vmatmul.bf16.vlgmr.msrb.gmra.mxu3 %v4172_v28  ;;  %4404 = vmatmul.bf16.vlgmr.msra.gmra.mxu0 %v4173_v62 }
 0x66e   : > { %6039 = shalt.err (!%p6036_p3)
}
 0x66f   : > { %s8307_s11 = smov 128   ;;  %s8309_s12 = smov 8  }
 0x670   : > { %5937 = dma.vmem_to_hbm [thread:$0]  (%p6387_p5), %s8092_s29, 512, %s4469_s10, %s8108_s23, %s8307_s11, %s8307_s11, %s8309_s12  }
 0x671   : > { %s4502_s15 = sshll.u32 %s4498_s3, 4  ;;  %s8125_s22 = scalar_lea.sflag [#allocation8], %s4416_s25  ;;  %s4503_s15 = int_to_ptr.hbm [resolvable:$true] %s4502_s15 }
 0x672   : > { %s6054_s13 = sshra.s32 %s4503_s15, 4  ;;  %s6060_s2 = scalar_lea.hbm %s8250_s20, 16  ;;  %s6055_s13 = int_to_ptr.hbm [resolvable:$true] %s6054_s13 }
 0x673   : > { %s6056_s14 = scalar_lea.hbm %s6055_s13, 8  ;;  %p6061_p9 = scmp.lt.s32.totalorder %s6055_s13, %s8250_s20 }
 0x674   : > { %p6057_p4 = scmp.ne.s32.totalorder %s6055_s13, %s6056_s14  ;;  %p6062_p10 = scmp.lt.s32.totalorder %s6060_s2, %s6056_s14 }
 0x676   : > { %p6058_p7 = pnand %p6057_p4, %p6387_p5  ;;  %p6063_p11 = por %p6062_p10, %p6061_p9 }
 0x678   : > { %p6059_p8 = pneg %p6058_p7 }
 0x67a   : > { %p6064_p12 = pnand %p6063_p11, %p6059_p8 }
 0x67c   : > { %6067 = shalt.err (!%p6064_p12)
}
 0x67d   : > { %5939 = dma.vmem_to_hbm [thread:$0]  (%p6387_p5), %s4501_s24, 128, %s4503_s15, %s8125_s22  }
 0x67e   : > { %s5933_s10 = sshll.u32 %s6368_s4, 6  ;;  %s4449_s29 = sshll.u32 %s7671_s30, 4  ;;  %s4450_s29 = int_to_ptr.vmem [resolvable:$true] %s4449_s29 }
 0x67f   : > { %s8474_s17 = sld [smem:[#allocation72_spill]]  ;;  %s5935_s14 = sshll.u32 %s6368_s4, 4 }
 0x680   : > { %s4482_s9 = scalar_lea.hbm %s8249_s19, %s5935_s14  ;;  %s4412_s7 = scalar_lea.sflag [#allocation3], %s7657_s0 }
 0x685   : > { %s4448_s1 = scalar_lea.hbm %s8474_s17, %s5933_s10  ;;  %s6088_s15 = scalar_lea.hbm %s8474_s17, 128 }
 0x686   : > { %s4451_s13 = sshll.u32 %s4448_s1, 4  ;;  %s4452_s13 = int_to_ptr.hbm [resolvable:$true] %s4451_s13 }
 0x687   : > { %s6082_s11 = sshra.s32 %s4452_s13, 4  ;;  %s6083_s11 = int_to_ptr.hbm [resolvable:$true] %s6082_s11 }
 0x688   : > { %s6084_s12 = scalar_lea.hbm %s6083_s11, 64  ;;  %p6089_p2 = scmp.lt.s32.totalorder %s6083_s11, %s8474_s17 }
 0x689   : > { %p6085_p13 = scmp.ne.s32.totalorder %s6083_s11, %s6084_s12  ;;  %p6090_p3 = scmp.lt.s32.totalorder %s6088_s15, %s6084_s12 }
 0x68b   : > { %p6086_p0 = pnand %p6085_p13, %p6387_p5  ;;  %p6091_p4 = por %p6090_p3, %p6089_p2 }
 0x68d   : > { %p6087_p1 = pneg %p6086_p0 }
 0x68f   : > { %p6092_p7 = pnand %p6091_p4, %p6087_p1 }
 0x691   : > { %6095 = shalt.err (!%p6092_p7)
}
 0x692   : > { %s8475_s3 = smov 8   ;;  %s8476_s1 = smov 128  }
 0x693   : > { %5936 = dma.vmem_to_hbm [thread:$0]  (%p6387_p5), %s4450_s29, 1024, %s4452_s13, %s4412_s7, %s8476_s1, %s8476_s1, %s8475_s3  }
 0x694   : > { %s4485_s14 = sshll.u32 %s4482_s9, 4  ;;  %s5704_s5 = sshll.u32 %s6368_s4, 2  ;;  %s4486_s14 = int_to_ptr.hbm [resolvable:$true] %s4485_s14 }
 0x695   : > { %s4512_s24 = scalar_lea.hbm %s8251_s21, %s5704_s5  ;;  %s6110_s11 = sshra.s32 %s4486_s14, 4  ;;  %s6111_s11 = int_to_ptr.hbm [resolvable:$true] %s6110_s11 }
 0x696   : > { %s6112_s12 = scalar_lea.hbm %s6111_s11, 16  ;;  %s6116_s25 = scalar_lea.hbm %s8249_s19, 32 }
 0x697   : > { %p6113_p8 = scmp.ne.s32.totalorder %s6111_s11, %s6112_s12  ;;  %p6117_p11 = scmp.lt.s32.totalorder %s6111_s11, %s8249_s19 }
 0x698   : > { %p6118_p12 = scmp.lt.s32.totalorder %s6116_s25, %s6112_s12 }
 0x699   : > { %p6114_p9 = pnand %p6113_p8, %p6387_p5 }
 0x69a   : > { %p6119_p13 = por %p6118_p12, %p6117_p11 }
 0x69b   : > { %p6115_p10 = pneg %p6114_p9 }
 0x69d   : > { %p6120_p0 = pnand %p6119_p13, %p6115_p10 }
 0x69f   : > { %6123 = shalt.err (!%p6120_p0)
}
 0x6a0   : > { %5938 = dma.vmem_to_hbm [thread:$0]  (%p6387_p5), %s8094_s26, 256, %s4486_s14, %s8108_s23, %s8476_s1, %s8476_s1, %s8475_s3  }
 0x6a1   : > { %s4516_s13 = sshll.u32 %s4512_s24, 4  ;;  %s6144_s2 = scalar_lea.hbm %s8251_s21, 8  ;;  %s4517_s13 = int_to_ptr.hbm [resolvable:$true] %s4516_s13 }
 0x6a2   : > { %s6138_s9 = sshra.s32 %s4517_s13, 4  ;;  %s6139_s9 = int_to_ptr.hbm [resolvable:$true] %s6138_s9 }
 0x6a3   : > { %s6140_s7 = scalar_lea.hbm %s6139_s9, 4  ;;  %p6145_p4 = scmp.lt.s32.totalorder %s6139_s9, %s8251_s21 }
 0x6a4   : > { %p6141_p1 = scmp.ne.s32.totalorder %s6139_s9, %s6140_s7  ;;  %p6146_p7 = scmp.lt.s32.totalorder %s6144_s2, %s6140_s7 }
 0x6a6   : > { %p6142_p2 = pnand %p6141_p1, %p6387_p5  ;;  %p6147_p8 = por %p6146_p7, %p6145_p4 }
 0x6a8   : > { %p6143_p3 = pneg %p6142_p2 }
 0x6aa   : > { %p6148_p9 = pnand %p6147_p8, %p6143_p3 }
 0x6ac   : > { %6151 = shalt.err (!%p6148_p9)
}
 0x6ad   : > { %5940 = dma.vmem_to_hbm [thread:$0]  (%p6387_p5), %s8096_s8, 64, %s4517_s13, %s8125_s22   ;;  %v6011_v56 = vld [vmem:[%s8246_s16] ss:$0 sm:$0xff] }
 0x6ae   : > { %s4758_s3 = sshll.u32 %s7657_s0, 1  ;;  %s5705_s1 = sshll.u32 %s6368_s4, 1 }
 0x6af   : > { %s8477_s12 = sld [smem:[#allocation73_spill]]  ;;  %s721_s8 = scalar_lea.vmem [#allocation10], %s4758_s3 }
 0x6b0   : > { %s4528_s22 = sshll.u32 %s721_s8, 4  ;;  %s4437_s4 = scalar_lea.sflag [#allocation11], %s7657_s0  ;;  %s4529_s22 = int_to_ptr.vmem [resolvable:$true] %s4528_s22 }
 0x6b5   : > { %s4526_s15 = scalar_lea.hbm %s8477_s12, %s5705_s1  ;;  %s6172_s7 = scalar_lea.hbm %s8477_s12, 4 }
 0x6b6   : > { %s4530_s10 = sshll.u32 %s4526_s15, 4  ;;  %s4531_s10 = int_to_ptr.hbm [resolvable:$true] %s4530_s10 }
 0x6b7   : > { %s6166_s25 = sshra.s32 %s4531_s10, 4  ;;  %s6167_s25 = int_to_ptr.hbm [resolvable:$true] %s6166_s25 }
 0x6b8   : > { %s6168_s29 = scalar_lea.hbm %s6167_s25, 2  ;;  %p6173_p13 = scmp.lt.s32.totalorder %s6167_s25, %s8477_s12 }
 0x6b9   : > { %p6169_p10 = scmp.ne.s32.totalorder %s6167_s25, %s6168_s29  ;;  %p6174_p0 = scmp.lt.s32.totalorder %s6172_s7, %s6168_s29 }
 0x6bb   : > { %p6170_p11 = pnand %p6169_p10, %p6387_p5  ;;  %p6175_p1 = por %p6174_p0, %p6173_p13 }
 0x6bd   : > { %p6171_p12 = pneg %p6170_p11 }
 0x6bf   : > { %p6176_p2 = pnand %p6175_p1, %p6171_p12 }
 0x6ea   : > { %v4379_v23 = vpop.f32.mrf.mxu2  ;;  %v4405_v0 = vpop.f32.mrf.mxu0 }
 0x6eb   : > { %v4380_v26 = vadd.f32 %v6011_v56, %v4379_v23 }
 0x6f0   : > { %v4392_v21 = vpop.f32.mrf.mxu3 }
 0x6f1   : > { %v4393_v11 = vadd.f32 %v4392_v21, %v4380_v26 }
 0x6f2   : > { %v4381_v12 = vpop.f32.mrf.mxu2  ;;  %v4407_v5 = vpop.f32.mrf.mxu0 }
 0x6f3   : > { %v4406_v53 = vadd.f32 %v4405_v0, %v4393_v11 }
 0x6f5   : > { %v4409_v42 = vmax.f32 %v4406_v53, 0.0 }
 0x6f7   : > { %4410 = vst [vmem:[%s721_s8] sm:$0x3] %v4409_v42 }
 0x6f8   : > { %v4394_v20 = vpop.f32.mrf.mxu3 }
 0x6f9   : > { %6179 = shalt.err (!%p6176_p2)
}
 0x6fa   : > { %5941 = dma.vmem_to_hbm [thread:$0]  (%p6387_p5), %s4529_s22, 32, %s4531_s10, %s4437_s4  }
 0x6fb PF: > { %s8478_s0 = sld [smem:[#allocation18_spill]] }
 0x6fc   : > { %s8479_s2 = sld [smem:[#allocation16_spill]] }
 0x701   : > { %p5967_p3 = scmp.ge.s32.totalorder %s8478_s0, 2 }
 0x702   : > { %s4542_s11 = sand.u32 1, %s8479_s2  }
 0x703   : > { %p5949_p4 = pnand %p5967_p3, %p6391_p6  ;;  %s4543_s26 = scalar_lea.sflag [#allocation3], %s4542_s11 }
 0x705   : > { %p5950_p7 = pneg %p5949_p4 }
 0x707   : > { %6197 = dma.done.wait (%p5950_p7), %s4543_s26, 1024  }
 0x708   : > { %6199 = vsyncadd (%p5950_p7), %s4543_s26, 4294966272  ;;  %s8481_s23 = sadd.s32 4294967294, %s8478_s0  }
 0x709   : > { %s4552_s3 = sand.u32 1, %s8481_s23  }
 0x70a   : > { %s4553_s1 = scalar_lea.sflag [#allocation5], %s4552_s3 }
 0x70b   : > { %6201 = dma.done.wait (%p5950_p7), %s4553_s1, 768  }
 0x70c   : > { %6203 = vsyncadd (%p5950_p7), %s4553_s1, 4294966528  ;;  %s4573_s6 = scalar_lea.sflag [#allocation8], %s4552_s3 }
 0x70d   : > { %6205 = dma.done.wait (%p5950_p7), %s4573_s6, 192  }
 0x70e   : > { %6207 = vsyncadd (%p5950_p7), %s4573_s6, 4294967104  ;;  %s4593_s14 = scalar_lea.sflag [#allocation11], %s4542_s11 }
 0x70f   : > { %6209 = dma.done.wait (%p5950_p7), %s4593_s14, 32  }
 0x710   : > { %6211 = vsyncadd (%p5950_p7), %s4593_s14, 4294967264  ;;  %s8482_s30 = sld [smem:[#allocation19_spill]]  ;;  %s8485_s3 = smov %s6218_s28 }
 0x711   : > { %s8483_s24 = sld [smem:[#allocation17_spill]] }
 0x712   : > { %s8484_s29 = sld [smem:[#allocation20_spill]] }
 0x716   : > { %p42_p5 = scmp.ge.s32.totalorder %s8482_s30, 4  }
 0x717   : > { %s8486_s28 = smov %s8483_s24 }
 0x718   :  { %44 = sbr.rel (!%p42_p5) target bundleno = 28 (0x1c), region = 233 }
 0x71d   :  { %4599 = vsyncpa [#allocation3], 1 }
 0x71e   :  { %4601 = vsyncpa [#allocation3 + $0x1], 1 }
 0x71f   :  { %4602 = vsyncpa [#allocation5], 1 }
 0x720   :  { %4604 = vsyncpa [#allocation5 + $0x1], 1 }
 0x721   :  { %4605 = vsyncpa [#allocation8], 1 }
 0x722   :  { %4607 = vsyncpa [#allocation8 + $0x1], 1 }
 0x723   :  { %4608 = vsyncpa [#allocation11], 1 }
 0x724   :  { %4610 = vsyncpa [#allocation11 + $0x1], 1 }

</bundles_post_ra>
